<compile_context>
chip_gen: v7x
topology: tpu7x:2x2x1
jax: 0.10.0
libtpu: 0.0.40
codegen_flags: <defaults>
</compile_context>

<pallas_src>
import functools

import jax
import jax.numpy as jnp
from jax.experimental import pallas as pl
from jax.experimental.pallas import tpu as pltpu


# ----------------------------------------------------------------------------
# Fused kernel: conv stack + interleaved cross-attention + final FC
# ----------------------------------------------------------------------------
def pitch_kernel(x_ref, p_ref, cw_ref, cb_ref,
                 wq_ref, bq_ref, wkv_ref, bkv_ref,
                 wo_ref, bo_ref, fcw_ref, fcb_ref,
                 o_ref,
                 *, n_layers, n_att_layers, conv_in_stacks,
                 n_heads, seq_len, batch_block):
    x = x_ref[...]                       # (Bb*T, H)  activation, stays resident
    memf = p_ref[...]                    # (Bb*Tp, H) prompt_encoder_output (flat)
    rows, H = x.shape
    T = seq_len
    Bb = batch_block
    Tp = memf.shape[0] // Bb
    dk = H // n_heads
    scale = 1.0 / (dk ** 0.5)

    # Hoisted once: per-sequence halo masks for the conv shifts.  roll wraps
    # rows across sequence boundaries; these masks zero exactly those rows.
    t_idx = jax.lax.broadcasted_iota(jnp.int32, (rows, H), 0) % T
    first_row = t_idx == 0
    last_row = t_idx == T - 1

    a = 0
    for i in range(n_layers):
        # ---- Conv1d(kernel=3, padding=1) + ReLU (dropout == identity) -------
        # Shifted copies via XLU roll; activation never leaves vregs/VMEM.
        x_prev = jnp.where(first_row, 0.0, pltpu.roll(x, shift=1, axis=0))
        x_next = jnp.where(last_row, 0.0, pltpu.roll(x, shift=rows - 1, axis=0))
        # Three taps packed along the contraction axis -> one K=3H MXU push.
        xcat = jnp.concatenate([x_prev, x, x_next], axis=-1)       # (rows, 3H)
        y = jnp.dot(xcat, cw_ref[i], preferred_element_type=jnp.float32) + cb_ref[i]
        x = jnp.maximum(y, 0.0)

        # ---- interleaved cross-attention (q = x, kv = prompt) + residual ----
        if (i + 1) % conv_in_stacks == 0 and a < n_att_layers:
            # Full-width projections (MXU-friendly: N = H and N = 2H).
            q = jnp.dot(x, wq_ref[a], preferred_element_type=jnp.float32) + bq_ref[a]
            kv = jnp.dot(memf, wkv_ref[a], preferred_element_type=jnp.float32) + bkv_ref[a]
            q3 = q.reshape(Bb, T, H)
            kv3 = kv.reshape(Bb, Tp, 2 * H)

            # Heads only for the tiny score / context math (batched over Bb).
            ctx_heads = []
            for h in range(n_heads):
                qh = q3[:, :, h * dk:(h + 1) * dk]                  # (Bb, T,  dk)
                kh = kv3[:, :, h * dk:(h + 1) * dk]                 # (Bb, Tp, dk)
                vh = kv3[:, :, H + h * dk:H + (h + 1) * dk]         # (Bb, Tp, dk)
                s = jnp.einsum('bqd,bkd->bqk', qh, kh,
                               preferred_element_type=jnp.float32) * scale
                s = s - jnp.max(s, axis=-1, keepdims=True)
                p = jnp.exp(s)
                # approx reciprocal (EUP slot): intentional inference-only approx.
                p = p * pl.reciprocal(jnp.sum(p, axis=-1, keepdims=True), approx=True)
                ctx_heads.append(jnp.einsum('bqk,bkd->bqd', p, vh,
                                            preferred_element_type=jnp.float32))
            # Repack heads into one (rows, H) tile -> single K=H output matmul.
            ctx = jnp.concatenate(ctx_heads, axis=-1).reshape(rows, H)
            x = x + jnp.dot(ctx, wo_ref[a], preferred_element_type=jnp.float32) + bo_ref[a]
            # TODO(synk): attention dropout omitted (inference semantics).
            a += 1

    # ---- final Linear(H -> 1) + ReLU, lane-dense: one (1, rows) row ---------
    y = jnp.einsum('oh,rh->or', fcw_ref[...], x,
                   preferred_element_type=jnp.float32) + fcb_ref[0, 0]
    o_ref[0] = jnp.maximum(y, 0.0).astype(o_ref.dtype)


# ----------------------------------------------------------------------------
# Wrapper: host-side weight packing + single pallas_call
# ----------------------------------------------------------------------------
def pitch_predictor_forward(x, prompt, params, *, conv_in_stacks, n_heads,
                            batch_block=None):
    B, T, H = x.shape
    _, Tp, _ = prompt.shape
    n_layers = len(params["conv"])
    n_att_layers = len(params["attn"])

    Bb = B if batch_block is None else batch_block   # fold whole batch by default
    assert B % Bb == 0, "batch must be divisible by batch_block"
    G = B // Bb
    rows = Bb * T

    # --- pack weights into matmul-friendly layouts (cheap, one-time) ---------
    cw = jnp.stack([w for w, _ in params["conv"]]).reshape(n_layers, 3 * H, H)
    cb = jnp.stack([b for _, b in params["conv"]])                   # (L, 1, H)
    attn = params["attn"]
    wq = jnp.stack([p["wq"] for p in attn])                          # (A, H, H)
    bq = jnp.stack([p["bq"] for p in attn])                          # (A, 1, H)
    wkv = jnp.stack([jnp.concatenate([p["wk"], p["wv"]], axis=1) for p in attn])  # (A, H, 2H)
    bkv = jnp.stack([jnp.concatenate([p["bk"], p["bv"]], axis=1) for p in attn])  # (A, 1, 2H)
    wo = jnp.stack([p["wo"] for p in attn])                          # (A, H, H)
    bo = jnp.stack([p["bo"] for p in attn])                          # (A, 1, H)
    fcw = params["fc_w"].T                                           # (1, H)
    fcb = params["fc_b"]                                             # (1, 1) -> SMEM

    x_flat = x.reshape(B * T, H)
    p_flat = prompt.reshape(B * Tp, H)

    kern = functools.partial(
        pitch_kernel, n_layers=n_layers, n_att_layers=n_att_layers,
        conv_in_stacks=conv_in_stacks, n_heads=n_heads,
        seq_len=T, batch_block=Bb)

    def const_spec(arr):
        nd = arr.ndim
        return pl.BlockSpec(arr.shape, lambda i, _n=nd: (0,) * _n)

    # Derive the VMEM limit from the actual footprint instead of a blanket cap
    # (weights + activations are double-buffered by the pipeliner).
    def nbytes(a):
        return int(a.size) * a.dtype.itemsize
    weight_bytes = sum(nbytes(a) for a in (cw, cb, wq, bq, wkv, bkv, wo, bo, fcw))
    act_bytes = (rows * H + Bb * Tp * H + rows) * 4
    vmem_limit = int(min(100 * 1024 * 1024,
                         max(16 * 1024 * 1024,
                             2 * weight_bytes + 8 * act_bytes + (4 << 20))))

    out = pl.pallas_call(
        kern,
        out_shape=jax.ShapeDtypeStruct((G, 1, rows), x.dtype),
        grid=(G,),
        in_specs=[
            pl.BlockSpec((rows, H), lambda i: (i, 0)),
            pl.BlockSpec((Bb * Tp, H), lambda i: (i, 0)),
            const_spec(cw), const_spec(cb),
            const_spec(wq), const_spec(bq),
            const_spec(wkv), const_spec(bkv),
            const_spec(wo), const_spec(bo),
            const_spec(fcw),
            pl.BlockSpec(memory_space=pltpu.MemorySpace.SMEM),
        ],
        out_specs=pl.BlockSpec((1, 1, rows), lambda i: (i, 0, 0)),
        compiler_params=pltpu.CompilerParams(
            dimension_semantics=("parallel",),
            vmem_limit_bytes=vmem_limit),
    )(x_flat, p_flat, cw, cb, wq, bq, wkv, bkv, wo, bo, fcw, fcb)
    return out.reshape(B, T)


# ----------------------------------------------------------------------------
# Pure-JAX reference (for correctness check only)
# ----------------------------------------------------------------------------
def ref_forward(x, prompt, params, *, conv_in_stacks, n_heads):
    hp = dict(precision="highest")
    n = 0
    for i, (cw, cb) in enumerate(params["conv"]):
        xp = jnp.pad(x, ((0, 0), (1, 1), (0, 0)))
        y = (jnp.einsum("bth,ho->bto", xp[:, :-2], cw[0], **hp)
             + jnp.einsum("bth,ho->bto", xp[:, 1:-1], cw[1], **hp)
             + jnp.einsum("bth,ho->bto", xp[:, 2:], cw[2], **hp) + cb)
        x = jnp.maximum(y, 0.0)
        if (i + 1) % conv_in_stacks == 0 and n < len(params["attn"]):
            p = params["attn"][n]
            B, T, H = x.shape
            Tp = prompt.shape[1]
            dk = H // n_heads
            q = (jnp.einsum("bth,hd->btd", x, p["wq"], **hp) + p["bq"]).reshape(B, T, n_heads, dk)
            k = (jnp.einsum("bth,hd->btd", prompt, p["wk"], **hp) + p["bk"]).reshape(B, Tp, n_heads, dk)
            v = (jnp.einsum("bth,hd->btd", prompt, p["wv"], **hp) + p["bv"]).reshape(B, Tp, n_heads, dk)
            s = jnp.einsum("bqnd,bknd->bnqk", q, k, **hp) / (dk ** 0.5)
            a = jax.nn.softmax(s, axis=-1)
            ctx = jnp.einsum("bnqk,bknd->bqnd", a, v, **hp).reshape(B, T, H)
            out = jnp.einsum("bth,hd->btd", ctx, p["wo"], **hp) + p["bo"]
            x = x + out
            n += 1
    y = jnp.einsum("bth,ho->bto", x, params["fc_w"], **hp) + params["fc_b"]
    return jnp.maximum(y[..., 0], 0.0)


# ----------------------------------------------------------------------------
# Deterministic parameter construction
# ----------------------------------------------------------------------------
def make_params(key, *, n_layers, n_att_layers, hidden):
    keys = jax.random.split(key, n_layers + n_att_layers + 1)
    conv = []
    for i in range(n_layers):
        kw, kb = jax.random.split(keys[i])
        w = jax.random.normal(kw, (3, hidden, hidden), jnp.float32) * 0.07
        b = jax.random.normal(kb, (1, hidden), jnp.float32) * 0.01
        conv.append((w, b))
    attn = []
    for j in range(n_att_layers):
        ks = jax.random.split(keys[n_layers + j], 8)
        scale = 1.0 / (hidden ** 0.5)
        attn.append({
            "wq": jax.random.normal(ks[0], (hidden, hidden), jnp.float32) * scale,
            "bq": jax.random.normal(ks[1], (1, hidden), jnp.float32) * 0.01,
            "wk": jax.random.normal(ks[2], (hidden, hidden), jnp.float32) * scale,
            "bk": jax.random.normal(ks[3], (1, hidden), jnp.float32) * 0.01,
            "wv": jax.random.normal(ks[4], (hidden, hidden), jnp.float32) * scale,
            "bv": jax.random.normal(ks[5], (1, hidden), jnp.float32) * 0.01,
            "wo": jax.random.normal(ks[6], (hidden, hidden), jnp.float32) * scale,
            "bo": jax.random.normal(ks[7], (1, hidden), jnp.float32) * 0.01,
        })
    kf1, kf2 = jax.random.split(keys[-1])
    fc_w = jax.random.normal(kf1, (hidden, 1), jnp.float32) * (1.0 / (hidden ** 0.5))
    fc_b = jax.random.normal(kf2, (1, 1), jnp.float32) * 0.01
    return {"conv": conv, "attn": attn, "fc_w": fc_w, "fc_b": fc_b}


if __name__ == "__main__":
    # Small, module-consistent configuration.
    B, T, Tp, H = 2, 16, 8, 64
    n_layers, n_att_layers, n_heads, conv_in_stacks = 6, 2, 4, 3

    key = jax.random.PRNGKey(0)
    kx, kp, kparams = jax.random.split(key, 3)
    x = jax.random.normal(kx, (B, T, H), jnp.float32)            # (B, T, hidden)
    prompt = jax.random.normal(kp, (B, Tp, H), jnp.float32)      # prompt_encoder_output
    params = make_params(kparams, n_layers=n_layers,
                         n_att_layers=n_att_layers, hidden=H)

    out = pitch_predictor_forward(x, prompt, params,
                                  conv_in_stacks=conv_in_stacks, n_heads=n_heads)
    out = jax.block_until_ready(out)

    ref = ref_forward(x, prompt, params,
                      conv_in_stacks=conv_in_stacks, n_heads=n_heads)
    assert out.shape == (B, T)
    assert jnp.all(jnp.isfinite(out))
    assert jnp.allclose(out, ref, rtol=1e-2, atol=1e-2)
    print("KERNEL_OK")
</pallas_src>

<mosaic_0001>
module attributes {stable_mosaic.version = 11 : i64} {
  func.func @pitch_kernel(%arg0: i32, %arg1: memref<32x64xf32, #tpu.memory_space<vmem>>, %arg2: memref<16x64xf32, #tpu.memory_space<vmem>>, %arg3: memref<6x192x64xf32, #tpu.memory_space<vmem>>, %arg4: memref<6x1x64xf32, #tpu.memory_space<vmem>>, %arg5: memref<2x64x64xf32, #tpu.memory_space<vmem>>, %arg6: memref<2x1x64xf32, #tpu.memory_space<vmem>>, %arg7: memref<2x64x128xf32, #tpu.memory_space<vmem>>, %arg8: memref<2x1x128xf32, #tpu.memory_space<vmem>>, %arg9: memref<2x64x64xf32, #tpu.memory_space<vmem>>, %arg10: memref<2x1x64xf32, #tpu.memory_space<vmem>>, %arg11: memref<1x64xf32, #tpu.memory_space<vmem>>, %arg12: memref<1x1xf32, #tpu.memory_space<smem>>, %arg13: memref<1x1x32xf32, #tpu.memory_space<vmem>>) attributes {dimension_semantics = [#tpu.dimension_semantics<parallel>], iteration_bounds = array<i64: 1>, scalar_prefetch = 0 : i64, scratch_operands = 0 : i64, tpu.core_type = #tpu.core_type<tc>, window_params = [{transform_indices = @transform_0, window_bounds = array<i64: 32, 64>}, {transform_indices = @transform_1, window_bounds = array<i64: 16, 64>}, {pipeline_mode = #tpu.pipeline_mode<synchronous>, transform_indices = @transform_2, window_bounds = array<i64: 6, 192, 64>}, {pipeline_mode = #tpu.pipeline_mode<synchronous>, transform_indices = @transform_3, window_bounds = array<i64: 6, 1, 64>}, {pipeline_mode = #tpu.pipeline_mode<synchronous>, transform_indices = @transform_4, window_bounds = array<i64: 2, 64, 64>}, {pipeline_mode = #tpu.pipeline_mode<synchronous>, transform_indices = @transform_5, window_bounds = array<i64: 2, 1, 64>}, {pipeline_mode = #tpu.pipeline_mode<synchronous>, transform_indices = @transform_6, window_bounds = array<i64: 2, 64, 128>}, {pipeline_mode = #tpu.pipeline_mode<synchronous>, transform_indices = @transform_7, window_bounds = array<i64: 2, 1, 128>}, {pipeline_mode = #tpu.pipeline_mode<synchronous>, transform_indices = @transform_8, window_bounds = array<i64: 2, 64, 64>}, {pipeline_mode = #tpu.pipeline_mode<synchronous>, transform_indices = @transform_9, window_bounds = array<i64: 2, 1, 64>}, {pipeline_mode = #tpu.pipeline_mode<synchronous>, transform_indices = @transform_10, window_bounds = array<i64: 1, 64>}, {transform_indices = @transform_11, window_bounds = array<i64: 1, 1>}, {transform_indices = @transform_12, window_bounds = array<i64: 1, 1, 32>}]} {
    %c0 = arith.constant 0 : index
    %c0_0 = arith.constant 0 : index
    %0 = vector.load %arg1[%c0, %c0_0] : memref<32x64xf32, #tpu.memory_space<vmem>>, vector<32x64xf32>
    %c0_1 = arith.constant 0 : index
    %c0_2 = arith.constant 0 : index
    %1 = vector.load %arg2[%c0_1, %c0_2] : memref<16x64xf32, #tpu.memory_space<vmem>>, vector<16x64xf32>
    %2 = tpu.iota {dimensions = array<i32: 0>} : vector<32x64xi32>
    %c16_i32 = arith.constant 16 : i32
    %c0_i32 = arith.constant 0 : i32
    %3 = arith.cmpi eq, %c16_i32, %c0_i32 : i32
    %c1_i32 = arith.constant 1 : i32
    %4 = arith.select %3, %c1_i32, %c16_i32 : i32
    %5 = vector.broadcast %4 : i32 to vector<32x64xi32>
    %6 = arith.remsi %2, %5 : vector<32x64xi32>
    %c0_i32_3 = arith.constant 0 : i32
    %7 = vector.broadcast %c0_i32_3 : i32 to vector<32x64xi32>
    %8 = arith.cmpi ne, %6, %7 : vector<32x64xi32>
    %c0_i32_4 = arith.constant 0 : i32
    %9 = vector.broadcast %c0_i32_4 : i32 to vector<32x64xi32>
    %10 = arith.cmpi slt, %6, %9 : vector<32x64xi32>
    %c0_i32_5 = arith.constant 0 : i32
    %11 = arith.cmpi slt, %4, %c0_i32_5 : i32
    %12 = vector.broadcast %11 : i1 to vector<32x64xi1>
    %13 = vector.broadcast %12 : vector<32x64xi1> to vector<32x64xi1>
    %14 = arith.xori %10, %13 : vector<32x64xi1>
    %15 = arith.andi %14, %8 : vector<32x64xi1>
    %16 = vector.broadcast %4 : i32 to vector<32x64xi32>
    %17 = arith.addi %6, %16 : vector<32x64xi32>
    %18 = arith.select %15, %17, %6 : vector<32x64xi1>, vector<32x64xi32>
    %c0_i32_6 = arith.constant 0 : i32
    %19 = vector.broadcast %c0_i32_6 : i32 to vector<32x64xi32>
    %20 = arith.cmpi eq, %18, %19 : vector<32x64xi32>
    %c15_i32 = arith.constant 15 : i32
    %21 = vector.broadcast %c15_i32 : i32 to vector<32x64xi32>
    %22 = arith.cmpi eq, %18, %21 : vector<32x64xi32>
    %c1_i32_7 = arith.constant 1 : i32
    %23 = tpu.dynamic_rotate %0 by %c1_i32_7 dim 0 : vector<32x64xf32>, i32 -> vector<32x64xf32>
    %cst = arith.constant 0.000000e+00 : f32
    %24 = vector.broadcast %cst : f32 to vector<32x64xf32>
    %25 = arith.select %20, %24, %23 : vector<32x64xi1>, vector<32x64xf32>
    %c31_i32 = arith.constant 31 : i32
    %26 = tpu.dynamic_rotate %0 by %c31_i32 dim 0 : vector<32x64xf32>, i32 -> vector<32x64xf32>
    %cst_8 = arith.constant 0.000000e+00 : f32
    %27 = vector.broadcast %cst_8 : f32 to vector<32x64xf32>
    %28 = arith.select %22, %27, %26 : vector<32x64xi1>, vector<32x64xf32>
    %29 = tpu.concatenate %25, %0, %28 in 1 : vector<32x64xf32>, vector<32x64xf32>, vector<32x64xf32> -> vector<32x192xf32>
    %c0_9 = arith.constant 0 : index
    %c0_10 = arith.constant 0 : index
    %c0_11 = arith.constant 0 : index
    %30 = vector.load %arg3[%c0_9, %c0_10, %c0_11] : memref<6x192x64xf32, #tpu.memory_space<vmem>>, vector<1x192x64xf32>
    %31 = vector.shape_cast %30 : vector<1x192x64xf32> to vector<192x64xf32>
    %cst_12 = arith.constant dense<0.000000e+00> : vector<32x64xf32>
    %32 = tpu.matmul %29, %31, %cst_12 {dimension_numbers = #tpu.dot_dimension_numbers<[1], [0], [0], [1], [0, 0, 1, 1], [], []>} : vector<32x192xf32>, vector<192x64xf32>, vector<32x64xf32> -> vector<32x64xf32>
    %c0_13 = arith.constant 0 : index
    %c0_14 = arith.constant 0 : index
    %c0_15 = arith.constant 0 : index
    %33 = vector.load %arg4[%c0_13, %c0_14, %c0_15] : memref<6x1x64xf32, #tpu.memory_space<vmem>>, vector<1x1x64xf32>
    %34 = vector.shape_cast %33 : vector<1x1x64xf32> to vector<1x64xf32>
    %35 = vector.broadcast %34 : vector<1x64xf32> to vector<32x64xf32>
    %36 = arith.addf %32, %35 : vector<32x64xf32>
    %cst_16 = arith.constant 0.000000e+00 : f32
    %37 = vector.broadcast %cst_16 : f32 to vector<32x64xf32>
    %38 = arith.maximumf %36, %37 : vector<32x64xf32>
    %c1_i32_17 = arith.constant 1 : i32
    %39 = tpu.dynamic_rotate %38 by %c1_i32_17 dim 0 : vector<32x64xf32>, i32 -> vector<32x64xf32>
    %cst_18 = arith.constant 0.000000e+00 : f32
    %40 = vector.broadcast %cst_18 : f32 to vector<32x64xf32>
    %41 = arith.select %20, %40, %39 : vector<32x64xi1>, vector<32x64xf32>
    %c31_i32_19 = arith.constant 31 : i32
    %42 = tpu.dynamic_rotate %38 by %c31_i32_19 dim 0 : vector<32x64xf32>, i32 -> vector<32x64xf32>
    %cst_20 = arith.constant 0.000000e+00 : f32
    %43 = vector.broadcast %cst_20 : f32 to vector<32x64xf32>
    %44 = arith.select %22, %43, %42 : vector<32x64xi1>, vector<32x64xf32>
    %45 = tpu.concatenate %41, %38, %44 in 1 : vector<32x64xf32>, vector<32x64xf32>, vector<32x64xf32> -> vector<32x192xf32>
    %c1 = arith.constant 1 : index
    %c0_21 = arith.constant 0 : index
    %c0_22 = arith.constant 0 : index
    %46 = vector.load %arg3[%c1, %c0_21, %c0_22] : memref<6x192x64xf32, #tpu.memory_space<vmem>>, vector<1x192x64xf32>
    %47 = vector.shape_cast %46 : vector<1x192x64xf32> to vector<192x64xf32>
    %cst_23 = arith.constant dense<0.000000e+00> : vector<32x64xf32>
    %48 = tpu.matmul %45, %47, %cst_23 {dimension_numbers = #tpu.dot_dimension_numbers<[1], [0], [0], [1], [0, 0, 1, 1], [], []>} : vector<32x192xf32>, vector<192x64xf32>, vector<32x64xf32> -> vector<32x64xf32>
    %c1_24 = arith.constant 1 : index
    %c0_25 = arith.constant 0 : index
    %c0_26 = arith.constant 0 : index
    %49 = vector.load %arg4[%c1_24, %c0_25, %c0_26] : memref<6x1x64xf32, #tpu.memory_space<vmem>>, vector<1x1x64xf32>
    %50 = vector.shape_cast %49 : vector<1x1x64xf32> to vector<1x64xf32>
    %51 = vector.broadcast %50 : vector<1x64xf32> to vector<32x64xf32>
    %52 = arith.addf %48, %51 : vector<32x64xf32>
    %cst_27 = arith.constant 0.000000e+00 : f32
    %53 = vector.broadcast %cst_27 : f32 to vector<32x64xf32>
    %54 = arith.maximumf %52, %53 : vector<32x64xf32>
    %c1_i32_28 = arith.constant 1 : i32
    %55 = tpu.dynamic_rotate %54 by %c1_i32_28 dim 0 : vector<32x64xf32>, i32 -> vector<32x64xf32>
    %cst_29 = arith.constant 0.000000e+00 : f32
    %56 = vector.broadcast %cst_29 : f32 to vector<32x64xf32>
    %57 = arith.select %20, %56, %55 : vector<32x64xi1>, vector<32x64xf32>
    %c31_i32_30 = arith.constant 31 : i32
    %58 = tpu.dynamic_rotate %54 by %c31_i32_30 dim 0 : vector<32x64xf32>, i32 -> vector<32x64xf32>
    %cst_31 = arith.constant 0.000000e+00 : f32
    %59 = vector.broadcast %cst_31 : f32 to vector<32x64xf32>
    %60 = arith.select %22, %59, %58 : vector<32x64xi1>, vector<32x64xf32>
    %61 = tpu.concatenate %57, %54, %60 in 1 : vector<32x64xf32>, vector<32x64xf32>, vector<32x64xf32> -> vector<32x192xf32>
    %c2 = arith.constant 2 : index
    %c0_32 = arith.constant 0 : index
    %c0_33 = arith.constant 0 : index
    %62 = vector.load %arg3[%c2, %c0_32, %c0_33] : memref<6x192x64xf32, #tpu.memory_space<vmem>>, vector<1x192x64xf32>
    %63 = vector.shape_cast %62 : vector<1x192x64xf32> to vector<192x64xf32>
    %cst_34 = arith.constant dense<0.000000e+00> : vector<32x64xf32>
    %64 = tpu.matmul %61, %63, %cst_34 {dimension_numbers = #tpu.dot_dimension_numbers<[1], [0], [0], [1], [0, 0, 1, 1], [], []>} : vector<32x192xf32>, vector<192x64xf32>, vector<32x64xf32> -> vector<32x64xf32>
    %c2_35 = arith.constant 2 : index
    %c0_36 = arith.constant 0 : index
    %c0_37 = arith.constant 0 : index
    %65 = vector.load %arg4[%c2_35, %c0_36, %c0_37] : memref<6x1x64xf32, #tpu.memory_space<vmem>>, vector<1x1x64xf32>
    %66 = vector.shape_cast %65 : vector<1x1x64xf32> to vector<1x64xf32>
    %67 = vector.broadcast %66 : vector<1x64xf32> to vector<32x64xf32>
    %68 = arith.addf %64, %67 : vector<32x64xf32>
    %cst_38 = arith.constant 0.000000e+00 : f32
    %69 = vector.broadcast %cst_38 : f32 to vector<32x64xf32>
    %70 = arith.maximumf %68, %69 : vector<32x64xf32>
    %c0_39 = arith.constant 0 : index
    %c0_40 = arith.constant 0 : index
    %c0_41 = arith.constant 0 : index
    %71 = vector.load %arg5[%c0_39, %c0_40, %c0_41] : memref<2x64x64xf32, #tpu.memory_space<vmem>>, vector<1x64x64xf32>
    %72 = vector.shape_cast %71 : vector<1x64x64xf32> to vector<64x64xf32>
    %cst_42 = arith.constant dense<0.000000e+00> : vector<32x64xf32>
    %73 = tpu.matmul %70, %72, %cst_42 {dimension_numbers = #tpu.dot_dimension_numbers<[1], [0], [0], [1], [0, 0, 1, 1], [], []>} : vector<32x64xf32>, vector<64x64xf32>, vector<32x64xf32> -> vector<32x64xf32>
    %c0_43 = arith.constant 0 : index
    %c0_44 = arith.constant 0 : index
    %c0_45 = arith.constant 0 : index
    %74 = vector.load %arg6[%c0_43, %c0_44, %c0_45] : memref<2x1x64xf32, #tpu.memory_space<vmem>>, vector<1x1x64xf32>
    %75 = vector.shape_cast %74 : vector<1x1x64xf32> to vector<1x64xf32>
    %76 = vector.broadcast %75 : vector<1x64xf32> to vector<32x64xf32>
    %77 = arith.addf %73, %76 : vector<32x64xf32>
    %c0_46 = arith.constant 0 : index
    %c0_47 = arith.constant 0 : index
    %c0_48 = arith.constant 0 : index
    %78 = vector.load %arg7[%c0_46, %c0_47, %c0_48] : memref<2x64x128xf32, #tpu.memory_space<vmem>>, vector<1x64x128xf32>
    %79 = vector.shape_cast %78 : vector<1x64x128xf32> to vector<64x128xf32>
    %cst_49 = arith.constant dense<0.000000e+00> : vector<16x128xf32>
    %80 = tpu.matmul %1, %79, %cst_49 {dimension_numbers = #tpu.dot_dimension_numbers<[1], [0], [0], [1], [0, 0, 1, 1], [], []>} : vector<16x64xf32>, vector<64x128xf32>, vector<16x128xf32> -> vector<16x128xf32>
    %c0_50 = arith.constant 0 : index
    %c0_51 = arith.constant 0 : index
    %c0_52 = arith.constant 0 : index
    %81 = vector.load %arg8[%c0_50, %c0_51, %c0_52] : memref<2x1x128xf32, #tpu.memory_space<vmem>>, vector<1x1x128xf32>
    %82 = vector.shape_cast %81 : vector<1x1x128xf32> to vector<1x128xf32>
    %83 = vector.broadcast %82 : vector<1x128xf32> to vector<16x128xf32>
    %84 = arith.addf %80, %83 : vector<16x128xf32>
    %85 = vector.shape_cast %77 : vector<32x64xf32> to vector<2x16x64xf32>
    %86 = vector.shape_cast %84 : vector<16x128xf32> to vector<2x8x128xf32>
    %87 = vector.extract_strided_slice %85 {offsets = [0, 0, 0], sizes = [2, 16, 16], strides = [1, 1, 1]} : vector<2x16x64xf32> to vector<2x16x16xf32>
    %88 = vector.extract_strided_slice %86 {offsets = [0, 0, 0], sizes = [2, 8, 16], strides = [1, 1, 1]} : vector<2x8x128xf32> to vector<2x8x16xf32>
    %89 = vector.extract_strided_slice %86 {offsets = [0, 0, 64], sizes = [2, 8, 16], strides = [1, 1, 1]} : vector<2x8x128xf32> to vector<2x8x16xf32>
    "tpu.trace_start"() <{level = 10 : i32, message = "bqd,bkd->bqk"}> : () -> ()
    %cst_53 = arith.constant dense<0.000000e+00> : vector<2x16x8xf32>
    %90 = tpu.matmul %87, %88, %cst_53 {dimension_numbers = #tpu.dot_dimension_numbers<[2], [2], [1], [1], [0, 0, 0, 1, 1, 1], [0], [0]>} : vector<2x16x16xf32>, vector<2x8x16xf32>, vector<2x16x8xf32> -> vector<2x16x8xf32>
    "tpu.trace_stop"() : () -> ()
    %cst_54 = arith.constant 2.500000e-01 : f32
    %91 = vector.broadcast %cst_54 : f32 to vector<2x16x8xf32>
    %92 = arith.mulf %90, %91 : vector<2x16x8xf32>
    %cst_55 = arith.constant dense<0xFF800000> : vector<2x16xf32>
    %93 = vector.multi_reduction <maximumf>, %92, %cst_55 [2] : vector<2x16x8xf32> to vector<2x16xf32>
    %94 = vector.shape_cast %93 : vector<2x16xf32> to vector<2x16x1xf32>
    %95 = vector.broadcast %94 : vector<2x16x1xf32> to vector<2x16x8xf32>
    %96 = arith.subf %92, %95 : vector<2x16x8xf32>
    %97 = math.exp %96 : vector<2x16x8xf32>
    %cst_56 = arith.constant dense<0.000000e+00> : vector<2x16xf32>
    %98 = vector.multi_reduction <add>, %97, %cst_56 [2] : vector<2x16x8xf32> to vector<2x16xf32>
    %99 = vector.shape_cast %98 : vector<2x16xf32> to vector<2x16x1xf32>
    %100 = tpu.reciprocal %99 {approx = true} : vector<2x16x1xf32> -> vector<2x16x1xf32>
    %101 = vector.broadcast %100 : vector<2x16x1xf32> to vector<2x16x8xf32>
    %102 = arith.mulf %97, %101 : vector<2x16x8xf32>
    "tpu.trace_start"() <{level = 10 : i32, message = "bqk,bkd->bqd"}> : () -> ()
    %cst_57 = arith.constant dense<0.000000e+00> : vector<2x16x16xf32>
    %103 = tpu.matmul %102, %89, %cst_57 {dimension_numbers = #tpu.dot_dimension_numbers<[2], [1], [1], [2], [0, 0, 0, 1, 1, 2], [0], [0]>} : vector<2x16x8xf32>, vector<2x8x16xf32>, vector<2x16x16xf32> -> vector<2x16x16xf32>
    "tpu.trace_stop"() : () -> ()
    %104 = vector.extract_strided_slice %85 {offsets = [0, 0, 16], sizes = [2, 16, 16], strides = [1, 1, 1]} : vector<2x16x64xf32> to vector<2x16x16xf32>
    %105 = vector.extract_strided_slice %86 {offsets = [0, 0, 16], sizes = [2, 8, 16], strides = [1, 1, 1]} : vector<2x8x128xf32> to vector<2x8x16xf32>
    %106 = vector.extract_strided_slice %86 {offsets = [0, 0, 80], sizes = [2, 8, 16], strides = [1, 1, 1]} : vector<2x8x128xf32> to vector<2x8x16xf32>
    "tpu.trace_start"() <{level = 10 : i32, message = "bqd,bkd->bqk"}> : () -> ()
    %cst_58 = arith.constant dense<0.000000e+00> : vector<2x16x8xf32>
    %107 = tpu.matmul %104, %105, %cst_58 {dimension_numbers = #tpu.dot_dimension_numbers<[2], [2], [1], [1], [0, 0, 0, 1, 1, 1], [0], [0]>} : vector<2x16x16xf32>, vector<2x8x16xf32>, vector<2x16x8xf32> -> vector<2x16x8xf32>
    "tpu.trace_stop"() : () -> ()
    %cst_59 = arith.constant 2.500000e-01 : f32
    %108 = vector.broadcast %cst_59 : f32 to vector<2x16x8xf32>
    %109 = arith.mulf %107, %108 : vector<2x16x8xf32>
    %cst_60 = arith.constant dense<0xFF800000> : vector<2x16xf32>
    %110 = vector.multi_reduction <maximumf>, %109, %cst_60 [2] : vector<2x16x8xf32> to vector<2x16xf32>
    %111 = vector.shape_cast %110 : vector<2x16xf32> to vector<2x16x1xf32>
    %112 = vector.broadcast %111 : vector<2x16x1xf32> to vector<2x16x8xf32>
    %113 = arith.subf %109, %112 : vector<2x16x8xf32>
    %114 = math.exp %113 : vector<2x16x8xf32>
    %cst_61 = arith.constant dense<0.000000e+00> : vector<2x16xf32>
    %115 = vector.multi_reduction <add>, %114, %cst_61 [2] : vector<2x16x8xf32> to vector<2x16xf32>
    %116 = vector.shape_cast %115 : vector<2x16xf32> to vector<2x16x1xf32>
    %117 = tpu.reciprocal %116 {approx = true} : vector<2x16x1xf32> -> vector<2x16x1xf32>
    %118 = vector.broadcast %117 : vector<2x16x1xf32> to vector<2x16x8xf32>
    %119 = arith.mulf %114, %118 : vector<2x16x8xf32>
    "tpu.trace_start"() <{level = 10 : i32, message = "bqk,bkd->bqd"}> : () -> ()
    %cst_62 = arith.constant dense<0.000000e+00> : vector<2x16x16xf32>
    %120 = tpu.matmul %119, %106, %cst_62 {dimension_numbers = #tpu.dot_dimension_numbers<[2], [1], [1], [2], [0, 0, 0, 1, 1, 2], [0], [0]>} : vector<2x16x8xf32>, vector<2x8x16xf32>, vector<2x16x16xf32> -> vector<2x16x16xf32>
    "tpu.trace_stop"() : () -> ()
    %121 = vector.extract_strided_slice %85 {offsets = [0, 0, 32], sizes = [2, 16, 16], strides = [1, 1, 1]} : vector<2x16x64xf32> to vector<2x16x16xf32>
    %122 = vector.extract_strided_slice %86 {offsets = [0, 0, 32], sizes = [2, 8, 16], strides = [1, 1, 1]} : vector<2x8x128xf32> to vector<2x8x16xf32>
    %123 = vector.extract_strided_slice %86 {offsets = [0, 0, 96], sizes = [2, 8, 16], strides = [1, 1, 1]} : vector<2x8x128xf32> to vector<2x8x16xf32>
    "tpu.trace_start"() <{level = 10 : i32, message = "bqd,bkd->bqk"}> : () -> ()
    %cst_63 = arith.constant dense<0.000000e+00> : vector<2x16x8xf32>
    %124 = tpu.matmul %121, %122, %cst_63 {dimension_numbers = #tpu.dot_dimension_numbers<[2], [2], [1], [1], [0, 0, 0, 1, 1, 1], [0], [0]>} : vector<2x16x16xf32>, vector<2x8x16xf32>, vector<2x16x8xf32> -> vector<2x16x8xf32>
    "tpu.trace_stop"() : () -> ()
    %cst_64 = arith.constant 2.500000e-01 : f32
    %125 = vector.broadcast %cst_64 : f32 to vector<2x16x8xf32>
    %126 = arith.mulf %124, %125 : vector<2x16x8xf32>
    %cst_65 = arith.constant dense<0xFF800000> : vector<2x16xf32>
    %127 = vector.multi_reduction <maximumf>, %126, %cst_65 [2] : vector<2x16x8xf32> to vector<2x16xf32>
    %128 = vector.shape_cast %127 : vector<2x16xf32> to vector<2x16x1xf32>
    %129 = vector.broadcast %128 : vector<2x16x1xf32> to vector<2x16x8xf32>
    %130 = arith.subf %126, %129 : vector<2x16x8xf32>
    %131 = math.exp %130 : vector<2x16x8xf32>
    %cst_66 = arith.constant dense<0.000000e+00> : vector<2x16xf32>
    %132 = vector.multi_reduction <add>, %131, %cst_66 [2] : vector<2x16x8xf32> to vector<2x16xf32>
    %133 = vector.shape_cast %132 : vector<2x16xf32> to vector<2x16x1xf32>
    %134 = tpu.reciprocal %133 {approx = true} : vector<2x16x1xf32> -> vector<2x16x1xf32>
    %135 = vector.broadcast %134 : vector<2x16x1xf32> to vector<2x16x8xf32>
    %136 = arith.mulf %131, %135 : vector<2x16x8xf32>
    "tpu.trace_start"() <{level = 10 : i32, message = "bqk,bkd->bqd"}> : () -> ()
    %cst_67 = arith.constant dense<0.000000e+00> : vector<2x16x16xf32>
    %137 = tpu.matmul %136, %123, %cst_67 {dimension_numbers = #tpu.dot_dimension_numbers<[2], [1], [1], [2], [0, 0, 0, 1, 1, 2], [0], [0]>} : vector<2x16x8xf32>, vector<2x8x16xf32>, vector<2x16x16xf32> -> vector<2x16x16xf32>
    "tpu.trace_stop"() : () -> ()
    %138 = vector.extract_strided_slice %85 {offsets = [0, 0, 48], sizes = [2, 16, 16], strides = [1, 1, 1]} : vector<2x16x64xf32> to vector<2x16x16xf32>
    %139 = vector.extract_strided_slice %86 {offsets = [0, 0, 48], sizes = [2, 8, 16], strides = [1, 1, 1]} : vector<2x8x128xf32> to vector<2x8x16xf32>
    %140 = vector.extract_strided_slice %86 {offsets = [0, 0, 112], sizes = [2, 8, 16], strides = [1, 1, 1]} : vector<2x8x128xf32> to vector<2x8x16xf32>
    "tpu.trace_start"() <{level = 10 : i32, message = "bqd,bkd->bqk"}> : () -> ()
    %cst_68 = arith.constant dense<0.000000e+00> : vector<2x16x8xf32>
    %141 = tpu.matmul %138, %139, %cst_68 {dimension_numbers = #tpu.dot_dimension_numbers<[2], [2], [1], [1], [0, 0, 0, 1, 1, 1], [0], [0]>} : vector<2x16x16xf32>, vector<2x8x16xf32>, vector<2x16x8xf32> -> vector<2x16x8xf32>
    "tpu.trace_stop"() : () -> ()
    %cst_69 = arith.constant 2.500000e-01 : f32
    %142 = vector.broadcast %cst_69 : f32 to vector<2x16x8xf32>
    %143 = arith.mulf %141, %142 : vector<2x16x8xf32>
    %cst_70 = arith.constant dense<0xFF800000> : vector<2x16xf32>
    %144 = vector.multi_reduction <maximumf>, %143, %cst_70 [2] : vector<2x16x8xf32> to vector<2x16xf32>
    %145 = vector.shape_cast %144 : vector<2x16xf32> to vector<2x16x1xf32>
    %146 = vector.broadcast %145 : vector<2x16x1xf32> to vector<2x16x8xf32>
    %147 = arith.subf %143, %146 : vector<2x16x8xf32>
    %148 = math.exp %147 : vector<2x16x8xf32>
    %cst_71 = arith.constant dense<0.000000e+00> : vector<2x16xf32>
    %149 = vector.multi_reduction <add>, %148, %cst_71 [2] : vector<2x16x8xf32> to vector<2x16xf32>
    %150 = vector.shape_cast %149 : vector<2x16xf32> to vector<2x16x1xf32>
    %151 = tpu.reciprocal %150 {approx = true} : vector<2x16x1xf32> -> vector<2x16x1xf32>
    %152 = vector.broadcast %151 : vector<2x16x1xf32> to vector<2x16x8xf32>
    %153 = arith.mulf %148, %152 : vector<2x16x8xf32>
    "tpu.trace_start"() <{level = 10 : i32, message = "bqk,bkd->bqd"}> : () -> ()
    %cst_72 = arith.constant dense<0.000000e+00> : vector<2x16x16xf32>
    %154 = tpu.matmul %153, %140, %cst_72 {dimension_numbers = #tpu.dot_dimension_numbers<[2], [1], [1], [2], [0, 0, 0, 1, 1, 2], [0], [0]>} : vector<2x16x8xf32>, vector<2x8x16xf32>, vector<2x16x16xf32> -> vector<2x16x16xf32>
    "tpu.trace_stop"() : () -> ()
    %155 = tpu.concatenate %103, %120, %137, %154 in 2 : vector<2x16x16xf32>, vector<2x16x16xf32>, vector<2x16x16xf32>, vector<2x16x16xf32> -> vector<2x16x64xf32>
    %156 = vector.shape_cast %155 : vector<2x16x64xf32> to vector<32x64xf32>
    %c0_73 = arith.constant 0 : index
    %c0_74 = arith.constant 0 : index
    %c0_75 = arith.constant 0 : index
    %157 = vector.load %arg9[%c0_73, %c0_74, %c0_75] : memref<2x64x64xf32, #tpu.memory_space<vmem>>, vector<1x64x64xf32>
    %158 = vector.shape_cast %157 : vector<1x64x64xf32> to vector<64x64xf32>
    %cst_76 = arith.constant dense<0.000000e+00> : vector<32x64xf32>
    %159 = tpu.matmul %156, %158, %cst_76 {dimension_numbers = #tpu.dot_dimension_numbers<[1], [0], [0], [1], [0, 0, 1, 1], [], []>} : vector<32x64xf32>, vector<64x64xf32>, vector<32x64xf32> -> vector<32x64xf32>
    %160 = arith.addf %70, %159 : vector<32x64xf32>
    %c0_77 = arith.constant 0 : index
    %c0_78 = arith.constant 0 : index
    %c0_79 = arith.constant 0 : index
    %161 = vector.load %arg10[%c0_77, %c0_78, %c0_79] : memref<2x1x64xf32, #tpu.memory_space<vmem>>, vector<1x1x64xf32>
    %162 = vector.shape_cast %161 : vector<1x1x64xf32> to vector<1x64xf32>
    %163 = vector.broadcast %162 : vector<1x64xf32> to vector<32x64xf32>
    %164 = arith.addf %160, %163 : vector<32x64xf32>
    %c1_i32_80 = arith.constant 1 : i32
    %165 = tpu.dynamic_rotate %164 by %c1_i32_80 dim 0 : vector<32x64xf32>, i32 -> vector<32x64xf32>
    %cst_81 = arith.constant 0.000000e+00 : f32
    %166 = vector.broadcast %cst_81 : f32 to vector<32x64xf32>
    %167 = arith.select %20, %166, %165 : vector<32x64xi1>, vector<32x64xf32>
    %c31_i32_82 = arith.constant 31 : i32
    %168 = tpu.dynamic_rotate %164 by %c31_i32_82 dim 0 : vector<32x64xf32>, i32 -> vector<32x64xf32>
    %cst_83 = arith.constant 0.000000e+00 : f32
    %169 = vector.broadcast %cst_83 : f32 to vector<32x64xf32>
    %170 = arith.select %22, %169, %168 : vector<32x64xi1>, vector<32x64xf32>
    %171 = tpu.concatenate %167, %164, %170 in 1 : vector<32x64xf32>, vector<32x64xf32>, vector<32x64xf32> -> vector<32x192xf32>
    %c3 = arith.constant 3 : index
    %c0_84 = arith.constant 0 : index
    %c0_85 = arith.constant 0 : index
    %172 = vector.load %arg3[%c3, %c0_84, %c0_85] : memref<6x192x64xf32, #tpu.memory_space<vmem>>, vector<1x192x64xf32>
    %173 = vector.shape_cast %172 : vector<1x192x64xf32> to vector<192x64xf32>
    %cst_86 = arith.constant dense<0.000000e+00> : vector<32x64xf32>
    %174 = tpu.matmul %171, %173, %cst_86 {dimension_numbers = #tpu.dot_dimension_numbers<[1], [0], [0], [1], [0, 0, 1, 1], [], []>} : vector<32x192xf32>, vector<192x64xf32>, vector<32x64xf32> -> vector<32x64xf32>
    %c3_87 = arith.constant 3 : index
    %c0_88 = arith.constant 0 : index
    %c0_89 = arith.constant 0 : index
    %175 = vector.load %arg4[%c3_87, %c0_88, %c0_89] : memref<6x1x64xf32, #tpu.memory_space<vmem>>, vector<1x1x64xf32>
    %176 = vector.shape_cast %175 : vector<1x1x64xf32> to vector<1x64xf32>
    %177 = vector.broadcast %176 : vector<1x64xf32> to vector<32x64xf32>
    %178 = arith.addf %174, %177 : vector<32x64xf32>
    %cst_90 = arith.constant 0.000000e+00 : f32
    %179 = vector.broadcast %cst_90 : f32 to vector<32x64xf32>
    %180 = arith.maximumf %178, %179 : vector<32x64xf32>
    %c1_i32_91 = arith.constant 1 : i32
    %181 = tpu.dynamic_rotate %180 by %c1_i32_91 dim 0 : vector<32x64xf32>, i32 -> vector<32x64xf32>
    %cst_92 = arith.constant 0.000000e+00 : f32
    %182 = vector.broadcast %cst_92 : f32 to vector<32x64xf32>
    %183 = arith.select %20, %182, %181 : vector<32x64xi1>, vector<32x64xf32>
    %c31_i32_93 = arith.constant 31 : i32
    %184 = tpu.dynamic_rotate %180 by %c31_i32_93 dim 0 : vector<32x64xf32>, i32 -> vector<32x64xf32>
    %cst_94 = arith.constant 0.000000e+00 : f32
    %185 = vector.broadcast %cst_94 : f32 to vector<32x64xf32>
    %186 = arith.select %22, %185, %184 : vector<32x64xi1>, vector<32x64xf32>
    %187 = tpu.concatenate %183, %180, %186 in 1 : vector<32x64xf32>, vector<32x64xf32>, vector<32x64xf32> -> vector<32x192xf32>
    %c4 = arith.constant 4 : index
    %c0_95 = arith.constant 0 : index
    %c0_96 = arith.constant 0 : index
    %188 = vector.load %arg3[%c4, %c0_95, %c0_96] : memref<6x192x64xf32, #tpu.memory_space<vmem>>, vector<1x192x64xf32>
    %189 = vector.shape_cast %188 : vector<1x192x64xf32> to vector<192x64xf32>
    %cst_97 = arith.constant dense<0.000000e+00> : vector<32x64xf32>
    %190 = tpu.matmul %187, %189, %cst_97 {dimension_numbers = #tpu.dot_dimension_numbers<[1], [0], [0], [1], [0, 0, 1, 1], [], []>} : vector<32x192xf32>, vector<192x64xf32>, vector<32x64xf32> -> vector<32x64xf32>
    %c4_98 = arith.constant 4 : index
    %c0_99 = arith.constant 0 : index
    %c0_100 = arith.constant 0 : index
    %191 = vector.load %arg4[%c4_98, %c0_99, %c0_100] : memref<6x1x64xf32, #tpu.memory_space<vmem>>, vector<1x1x64xf32>
    %192 = vector.shape_cast %191 : vector<1x1x64xf32> to vector<1x64xf32>
    %193 = vector.broadcast %192 : vector<1x64xf32> to vector<32x64xf32>
    %194 = arith.addf %190, %193 : vector<32x64xf32>
    %cst_101 = arith.constant 0.000000e+00 : f32
    %195 = vector.broadcast %cst_101 : f32 to vector<32x64xf32>
    %196 = arith.maximumf %194, %195 : vector<32x64xf32>
    %c1_i32_102 = arith.constant 1 : i32
    %197 = tpu.dynamic_rotate %196 by %c1_i32_102 dim 0 : vector<32x64xf32>, i32 -> vector<32x64xf32>
    %cst_103 = arith.constant 0.000000e+00 : f32
    %198 = vector.broadcast %cst_103 : f32 to vector<32x64xf32>
    %199 = arith.select %20, %198, %197 : vector<32x64xi1>, vector<32x64xf32>
    %c31_i32_104 = arith.constant 31 : i32
    %200 = tpu.dynamic_rotate %196 by %c31_i32_104 dim 0 : vector<32x64xf32>, i32 -> vector<32x64xf32>
    %cst_105 = arith.constant 0.000000e+00 : f32
    %201 = vector.broadcast %cst_105 : f32 to vector<32x64xf32>
    %202 = arith.select %22, %201, %200 : vector<32x64xi1>, vector<32x64xf32>
    %203 = tpu.concatenate %199, %196, %202 in 1 : vector<32x64xf32>, vector<32x64xf32>, vector<32x64xf32> -> vector<32x192xf32>
    %c5 = arith.constant 5 : index
    %c0_106 = arith.constant 0 : index
    %c0_107 = arith.constant 0 : index
    %204 = vector.load %arg3[%c5, %c0_106, %c0_107] : memref<6x192x64xf32, #tpu.memory_space<vmem>>, vector<1x192x64xf32>
    %205 = vector.shape_cast %204 : vector<1x192x64xf32> to vector<192x64xf32>
    %cst_108 = arith.constant dense<0.000000e+00> : vector<32x64xf32>
    %206 = tpu.matmul %203, %205, %cst_108 {dimension_numbers = #tpu.dot_dimension_numbers<[1], [0], [0], [1], [0, 0, 1, 1], [], []>} : vector<32x192xf32>, vector<192x64xf32>, vector<32x64xf32> -> vector<32x64xf32>
    %c5_109 = arith.constant 5 : index
    %c0_110 = arith.constant 0 : index
    %c0_111 = arith.constant 0 : index
    %207 = vector.load %arg4[%c5_109, %c0_110, %c0_111] : memref<6x1x64xf32, #tpu.memory_space<vmem>>, vector<1x1x64xf32>
    %208 = vector.shape_cast %207 : vector<1x1x64xf32> to vector<1x64xf32>
    %209 = vector.broadcast %208 : vector<1x64xf32> to vector<32x64xf32>
    %210 = arith.addf %206, %209 : vector<32x64xf32>
    %cst_112 = arith.constant 0.000000e+00 : f32
    %211 = vector.broadcast %cst_112 : f32 to vector<32x64xf32>
    %212 = arith.maximumf %210, %211 : vector<32x64xf32>
    %c1_113 = arith.constant 1 : index
    %c0_114 = arith.constant 0 : index
    %c0_115 = arith.constant 0 : index
    %213 = vector.load %arg5[%c1_113, %c0_114, %c0_115] : memref<2x64x64xf32, #tpu.memory_space<vmem>>, vector<1x64x64xf32>
    %214 = vector.shape_cast %213 : vector<1x64x64xf32> to vector<64x64xf32>
    %cst_116 = arith.constant dense<0.000000e+00> : vector<32x64xf32>
    %215 = tpu.matmul %212, %214, %cst_116 {dimension_numbers = #tpu.dot_dimension_numbers<[1], [0], [0], [1], [0, 0, 1, 1], [], []>} : vector<32x64xf32>, vector<64x64xf32>, vector<32x64xf32> -> vector<32x64xf32>
    %c1_117 = arith.constant 1 : index
    %c0_118 = arith.constant 0 : index
    %c0_119 = arith.constant 0 : index
    %216 = vector.load %arg6[%c1_117, %c0_118, %c0_119] : memref<2x1x64xf32, #tpu.memory_space<vmem>>, vector<1x1x64xf32>
    %217 = vector.shape_cast %216 : vector<1x1x64xf32> to vector<1x64xf32>
    %218 = vector.broadcast %217 : vector<1x64xf32> to vector<32x64xf32>
    %219 = arith.addf %215, %218 : vector<32x64xf32>
    %c1_120 = arith.constant 1 : index
    %c0_121 = arith.constant 0 : index
    %c0_122 = arith.constant 0 : index
    %220 = vector.load %arg7[%c1_120, %c0_121, %c0_122] : memref<2x64x128xf32, #tpu.memory_space<vmem>>, vector<1x64x128xf32>
    %221 = vector.shape_cast %220 : vector<1x64x128xf32> to vector<64x128xf32>
    %cst_123 = arith.constant dense<0.000000e+00> : vector<16x128xf32>
    %222 = tpu.matmul %1, %221, %cst_123 {dimension_numbers = #tpu.dot_dimension_numbers<[1], [0], [0], [1], [0, 0, 1, 1], [], []>} : vector<16x64xf32>, vector<64x128xf32>, vector<16x128xf32> -> vector<16x128xf32>
    %c1_124 = arith.constant 1 : index
    %c0_125 = arith.constant 0 : index
    %c0_126 = arith.constant 0 : index
    %223 = vector.load %arg8[%c1_124, %c0_125, %c0_126] : memref<2x1x128xf32, #tpu.memory_space<vmem>>, vector<1x1x128xf32>
    %224 = vector.shape_cast %223 : vector<1x1x128xf32> to vector<1x128xf32>
    %225 = vector.broadcast %224 : vector<1x128xf32> to vector<16x128xf32>
    %226 = arith.addf %222, %225 : vector<16x128xf32>
    %227 = vector.shape_cast %219 : vector<32x64xf32> to vector<2x16x64xf32>
    %228 = vector.shape_cast %226 : vector<16x128xf32> to vector<2x8x128xf32>
    %229 = vector.extract_strided_slice %227 {offsets = [0, 0, 0], sizes = [2, 16, 16], strides = [1, 1, 1]} : vector<2x16x64xf32> to vector<2x16x16xf32>
    %230 = vector.extract_strided_slice %228 {offsets = [0, 0, 0], sizes = [2, 8, 16], strides = [1, 1, 1]} : vector<2x8x128xf32> to vector<2x8x16xf32>
    %231 = vector.extract_strided_slice %228 {offsets = [0, 0, 64], sizes = [2, 8, 16], strides = [1, 1, 1]} : vector<2x8x128xf32> to vector<2x8x16xf32>
    "tpu.trace_start"() <{level = 10 : i32, message = "bqd,bkd->bqk"}> : () -> ()
    %cst_127 = arith.constant dense<0.000000e+00> : vector<2x16x8xf32>
    %232 = tpu.matmul %229, %230, %cst_127 {dimension_numbers = #tpu.dot_dimension_numbers<[2], [2], [1], [1], [0, 0, 0, 1, 1, 1], [0], [0]>} : vector<2x16x16xf32>, vector<2x8x16xf32>, vector<2x16x8xf32> -> vector<2x16x8xf32>
    "tpu.trace_stop"() : () -> ()
    %cst_128 = arith.constant 2.500000e-01 : f32
    %233 = vector.broadcast %cst_128 : f32 to vector<2x16x8xf32>
    %234 = arith.mulf %232, %233 : vector<2x16x8xf32>
    %cst_129 = arith.constant dense<0xFF800000> : vector<2x16xf32>
    %235 = vector.multi_reduction <maximumf>, %234, %cst_129 [2] : vector<2x16x8xf32> to vector<2x16xf32>
    %236 = vector.shape_cast %235 : vector<2x16xf32> to vector<2x16x1xf32>
    %237 = vector.broadcast %236 : vector<2x16x1xf32> to vector<2x16x8xf32>
    %238 = arith.subf %234, %237 : vector<2x16x8xf32>
    %239 = math.exp %238 : vector<2x16x8xf32>
    %cst_130 = arith.constant dense<0.000000e+00> : vector<2x16xf32>
    %240 = vector.multi_reduction <add>, %239, %cst_130 [2] : vector<2x16x8xf32> to vector<2x16xf32>
    %241 = vector.shape_cast %240 : vector<2x16xf32> to vector<2x16x1xf32>
    %242 = tpu.reciprocal %241 {approx = true} : vector<2x16x1xf32> -> vector<2x16x1xf32>
    %243 = vector.broadcast %242 : vector<2x16x1xf32> to vector<2x16x8xf32>
    %244 = arith.mulf %239, %243 : vector<2x16x8xf32>
    "tpu.trace_start"() <{level = 10 : i32, message = "bqk,bkd->bqd"}> : () -> ()
    %cst_131 = arith.constant dense<0.000000e+00> : vector<2x16x16xf32>
    %245 = tpu.matmul %244, %231, %cst_131 {dimension_numbers = #tpu.dot_dimension_numbers<[2], [1], [1], [2], [0, 0, 0, 1, 1, 2], [0], [0]>} : vector<2x16x8xf32>, vector<2x8x16xf32>, vector<2x16x16xf32> -> vector<2x16x16xf32>
    "tpu.trace_stop"() : () -> ()
    %246 = vector.extract_strided_slice %227 {offsets = [0, 0, 16], sizes = [2, 16, 16], strides = [1, 1, 1]} : vector<2x16x64xf32> to vector<2x16x16xf32>
    %247 = vector.extract_strided_slice %228 {offsets = [0, 0, 16], sizes = [2, 8, 16], strides = [1, 1, 1]} : vector<2x8x128xf32> to vector<2x8x16xf32>
    %248 = vector.extract_strided_slice %228 {offsets = [0, 0, 80], sizes = [2, 8, 16], strides = [1, 1, 1]} : vector<2x8x128xf32> to vector<2x8x16xf32>
    "tpu.trace_start"() <{level = 10 : i32, message = "bqd,bkd->bqk"}> : () -> ()
    %cst_132 = arith.constant dense<0.000000e+00> : vector<2x16x8xf32>
    %249 = tpu.matmul %246, %247, %cst_132 {dimension_numbers = #tpu.dot_dimension_numbers<[2], [2], [1], [1], [0, 0, 0, 1, 1, 1], [0], [0]>} : vector<2x16x16xf32>, vector<2x8x16xf32>, vector<2x16x8xf32> -> vector<2x16x8xf32>
    "tpu.trace_stop"() : () -> ()
    %cst_133 = arith.constant 2.500000e-01 : f32
    %250 = vector.broadcast %cst_133 : f32 to vector<2x16x8xf32>
    %251 = arith.mulf %249, %250 : vector<2x16x8xf32>
    %cst_134 = arith.constant dense<0xFF800000> : vector<2x16xf32>
    %252 = vector.multi_reduction <maximumf>, %251, %cst_134 [2] : vector<2x16x8xf32> to vector<2x16xf32>
    %253 = vector.shape_cast %252 : vector<2x16xf32> to vector<2x16x1xf32>
    %254 = vector.broadcast %253 : vector<2x16x1xf32> to vector<2x16x8xf32>
    %255 = arith.subf %251, %254 : vector<2x16x8xf32>
    %256 = math.exp %255 : vector<2x16x8xf32>
    %cst_135 = arith.constant dense<0.000000e+00> : vector<2x16xf32>
    %257 = vector.multi_reduction <add>, %256, %cst_135 [2] : vector<2x16x8xf32> to vector<2x16xf32>
    %258 = vector.shape_cast %257 : vector<2x16xf32> to vector<2x16x1xf32>
    %259 = tpu.reciprocal %258 {approx = true} : vector<2x16x1xf32> -> vector<2x16x1xf32>
    %260 = vector.broadcast %259 : vector<2x16x1xf32> to vector<2x16x8xf32>
    %261 = arith.mulf %256, %260 : vector<2x16x8xf32>
    "tpu.trace_start"() <{level = 10 : i32, message = "bqk,bkd->bqd"}> : () -> ()
    %cst_136 = arith.constant dense<0.000000e+00> : vector<2x16x16xf32>
    %262 = tpu.matmul %261, %248, %cst_136 {dimension_numbers = #tpu.dot_dimension_numbers<[2], [1], [1], [2], [0, 0, 0, 1, 1, 2], [0], [0]>} : vector<2x16x8xf32>, vector<2x8x16xf32>, vector<2x16x16xf32> -> vector<2x16x16xf32>
    "tpu.trace_stop"() : () -> ()
    %263 = vector.extract_strided_slice %227 {offsets = [0, 0, 32], sizes = [2, 16, 16], strides = [1, 1, 1]} : vector<2x16x64xf32> to vector<2x16x16xf32>
    %264 = vector.extract_strided_slice %228 {offsets = [0, 0, 32], sizes = [2, 8, 16], strides = [1, 1, 1]} : vector<2x8x128xf32> to vector<2x8x16xf32>
    %265 = vector.extract_strided_slice %228 {offsets = [0, 0, 96], sizes = [2, 8, 16], strides = [1, 1, 1]} : vector<2x8x128xf32> to vector<2x8x16xf32>
    "tpu.trace_start"() <{level = 10 : i32, message = "bqd,bkd->bqk"}> : () -> ()
    %cst_137 = arith.constant dense<0.000000e+00> : vector<2x16x8xf32>
    %266 = tpu.matmul %263, %264, %cst_137 {dimension_numbers = #tpu.dot_dimension_numbers<[2], [2], [1], [1], [0, 0, 0, 1, 1, 1], [0], [0]>} : vector<2x16x16xf32>, vector<2x8x16xf32>, vector<2x16x8xf32> -> vector<2x16x8xf32>
    "tpu.trace_stop"() : () -> ()
    %cst_138 = arith.constant 2.500000e-01 : f32
    %267 = vector.broadcast %cst_138 : f32 to vector<2x16x8xf32>
    %268 = arith.mulf %266, %267 : vector<2x16x8xf32>
    %cst_139 = arith.constant dense<0xFF800000> : vector<2x16xf32>
    %269 = vector.multi_reduction <maximumf>, %268, %cst_139 [2] : vector<2x16x8xf32> to vector<2x16xf32>
    %270 = vector.shape_cast %269 : vector<2x16xf32> to vector<2x16x1xf32>
    %271 = vector.broadcast %270 : vector<2x16x1xf32> to vector<2x16x8xf32>
    %272 = arith.subf %268, %271 : vector<2x16x8xf32>
    %273 = math.exp %272 : vector<2x16x8xf32>
    %cst_140 = arith.constant dense<0.000000e+00> : vector<2x16xf32>
    %274 = vector.multi_reduction <add>, %273, %cst_140 [2] : vector<2x16x8xf32> to vector<2x16xf32>
    %275 = vector.shape_cast %274 : vector<2x16xf32> to vector<2x16x1xf32>
    %276 = tpu.reciprocal %275 {approx = true} : vector<2x16x1xf32> -> vector<2x16x1xf32>
    %277 = vector.broadcast %276 : vector<2x16x1xf32> to vector<2x16x8xf32>
    %278 = arith.mulf %273, %277 : vector<2x16x8xf32>
    "tpu.trace_start"() <{level = 10 : i32, message = "bqk,bkd->bqd"}> : () -> ()
    %cst_141 = arith.constant dense<0.000000e+00> : vector<2x16x16xf32>
    %279 = tpu.matmul %278, %265, %cst_141 {dimension_numbers = #tpu.dot_dimension_numbers<[2], [1], [1], [2], [0, 0, 0, 1, 1, 2], [0], [0]>} : vector<2x16x8xf32>, vector<2x8x16xf32>, vector<2x16x16xf32> -> vector<2x16x16xf32>
    "tpu.trace_stop"() : () -> ()
    %280 = vector.extract_strided_slice %227 {offsets = [0, 0, 48], sizes = [2, 16, 16], strides = [1, 1, 1]} : vector<2x16x64xf32> to vector<2x16x16xf32>
    %281 = vector.extract_strided_slice %228 {offsets = [0, 0, 48], sizes = [2, 8, 16], strides = [1, 1, 1]} : vector<2x8x128xf32> to vector<2x8x16xf32>
    %282 = vector.extract_strided_slice %228 {offsets = [0, 0, 112], sizes = [2, 8, 16], strides = [1, 1, 1]} : vector<2x8x128xf32> to vector<2x8x16xf32>
    "tpu.trace_start"() <{level = 10 : i32, message = "bqd,bkd->bqk"}> : () -> ()
    %cst_142 = arith.constant dense<0.000000e+00> : vector<2x16x8xf32>
    %283 = tpu.matmul %280, %281, %cst_142 {dimension_numbers = #tpu.dot_dimension_numbers<[2], [2], [1], [1], [0, 0, 0, 1, 1, 1], [0], [0]>} : vector<2x16x16xf32>, vector<2x8x16xf32>, vector<2x16x8xf32> -> vector<2x16x8xf32>
    "tpu.trace_stop"() : () -> ()
    %cst_143 = arith.constant 2.500000e-01 : f32
    %284 = vector.broadcast %cst_143 : f32 to vector<2x16x8xf32>
    %285 = arith.mulf %283, %284 : vector<2x16x8xf32>
    %cst_144 = arith.constant dense<0xFF800000> : vector<2x16xf32>
    %286 = vector.multi_reduction <maximumf>, %285, %cst_144 [2] : vector<2x16x8xf32> to vector<2x16xf32>
    %287 = vector.shape_cast %286 : vector<2x16xf32> to vector<2x16x1xf32>
    %288 = vector.broadcast %287 : vector<2x16x1xf32> to vector<2x16x8xf32>
    %289 = arith.subf %285, %288 : vector<2x16x8xf32>
    %290 = math.exp %289 : vector<2x16x8xf32>
    %cst_145 = arith.constant dense<0.000000e+00> : vector<2x16xf32>
    %291 = vector.multi_reduction <add>, %290, %cst_145 [2] : vector<2x16x8xf32> to vector<2x16xf32>
    %292 = vector.shape_cast %291 : vector<2x16xf32> to vector<2x16x1xf32>
    %293 = tpu.reciprocal %292 {approx = true} : vector<2x16x1xf32> -> vector<2x16x1xf32>
    %294 = vector.broadcast %293 : vector<2x16x1xf32> to vector<2x16x8xf32>
    %295 = arith.mulf %290, %294 : vector<2x16x8xf32>
    "tpu.trace_start"() <{level = 10 : i32, message = "bqk,bkd->bqd"}> : () -> ()
    %cst_146 = arith.constant dense<0.000000e+00> : vector<2x16x16xf32>
    %296 = tpu.matmul %295, %282, %cst_146 {dimension_numbers = #tpu.dot_dimension_numbers<[2], [1], [1], [2], [0, 0, 0, 1, 1, 2], [0], [0]>} : vector<2x16x8xf32>, vector<2x8x16xf32>, vector<2x16x16xf32> -> vector<2x16x16xf32>
    "tpu.trace_stop"() : () -> ()
    %297 = tpu.concatenate %245, %262, %279, %296 in 2 : vector<2x16x16xf32>, vector<2x16x16xf32>, vector<2x16x16xf32>, vector<2x16x16xf32> -> vector<2x16x64xf32>
    %298 = vector.shape_cast %297 : vector<2x16x64xf32> to vector<32x64xf32>
    %c1_147 = arith.constant 1 : index
    %c0_148 = arith.constant 0 : index
    %c0_149 = arith.constant 0 : index
    %299 = vector.load %arg9[%c1_147, %c0_148, %c0_149] : memref<2x64x64xf32, #tpu.memory_space<vmem>>, vector<1x64x64xf32>
    %300 = vector.shape_cast %299 : vector<1x64x64xf32> to vector<64x64xf32>
    %cst_150 = arith.constant dense<0.000000e+00> : vector<32x64xf32>
    %301 = tpu.matmul %298, %300, %cst_150 {dimension_numbers = #tpu.dot_dimension_numbers<[1], [0], [0], [1], [0, 0, 1, 1], [], []>} : vector<32x64xf32>, vector<64x64xf32>, vector<32x64xf32> -> vector<32x64xf32>
    %302 = arith.addf %212, %301 : vector<32x64xf32>
    %c1_151 = arith.constant 1 : index
    %c0_152 = arith.constant 0 : index
    %c0_153 = arith.constant 0 : index
    %303 = vector.load %arg10[%c1_151, %c0_152, %c0_153] : memref<2x1x64xf32, #tpu.memory_space<vmem>>, vector<1x1x64xf32>
    %304 = vector.shape_cast %303 : vector<1x1x64xf32> to vector<1x64xf32>
    %305 = vector.broadcast %304 : vector<1x64xf32> to vector<32x64xf32>
    %306 = arith.addf %302, %305 : vector<32x64xf32>
    %c0_154 = arith.constant 0 : index
    %c0_155 = arith.constant 0 : index
    %307 = vector.load %arg11[%c0_154, %c0_155] : memref<1x64xf32, #tpu.memory_space<vmem>>, vector<1x64xf32>
    "tpu.trace_start"() <{level = 10 : i32, message = "oh,rh->or"}> : () -> ()
    %cst_156 = arith.constant dense<0.000000e+00> : vector<1x32xf32>
    %308 = tpu.matmul %307, %306, %cst_156 {dimension_numbers = #tpu.dot_dimension_numbers<[1], [1], [0], [0], [0, 0, 1, 0], [], []>} : vector<1x64xf32>, vector<32x64xf32>, vector<1x32xf32> -> vector<1x32xf32>
    "tpu.trace_stop"() : () -> ()
    %c0_157 = arith.constant 0 : index
    %c0_158 = arith.constant 0 : index
    %309 = memref.load %arg12[%c0_157, %c0_158] : memref<1x1xf32, #tpu.memory_space<smem>>
    %310 = vector.broadcast %309 : f32 to vector<1x32xf32>
    %311 = arith.addf %308, %310 : vector<1x32xf32>
    %cst_159 = arith.constant 0.000000e+00 : f32
    %312 = vector.broadcast %cst_159 : f32 to vector<1x32xf32>
    %313 = arith.maximumf %311, %312 : vector<1x32xf32>
    %c0_160 = arith.constant 0 : index
    %c0_161 = arith.constant 0 : index
    %c0_162 = arith.constant 0 : index
    %314 = vector.load %arg13[%c0_160, %c0_161, %c0_162] : memref<1x1x32xf32, #tpu.memory_space<vmem>>, vector<1x1x32xf32>
    %315 = vector.shape_cast %314 : vector<1x1x32xf32> to vector<1x32xf32>
    %316 = vector.shape_cast %313 : vector<1x32xf32> to vector<1x1x32xf32>
    tpu.vector_store %arg13[%c0_160, %c0_161, %c0_162], %316 {strides = array<i32>} : memref<1x1x32xf32, #tpu.memory_space<vmem>>, vector<1x1x32xf32>,
    return
  }
  func.func @transform_0(%arg0: i32) -> (i32, i32) {
    %c0_i32 = arith.constant 0 : i32
    %c0_i32_0 = arith.constant 0 : i32
    return %arg0, %c0_i32 : i32, i32
  }
  func.func @transform_1(%arg0: i32) -> (i32, i32) {
    %c0_i32 = arith.constant 0 : i32
    %c0_i32_0 = arith.constant 0 : i32
    return %arg0, %c0_i32 : i32, i32
  }
  func.func @transform_2(%arg0: i32) -> (i32, i32, i32) {
    %c0_i32 = arith.constant 0 : i32
    %c0_i32_0 = arith.constant 0 : i32
    %c0_i32_1 = arith.constant 0 : i32
    %c0_i32_2 = arith.constant 0 : i32
    return %c0_i32, %c0_i32_0, %c0_i32_1 : i32, i32, i32
  }
  func.func @transform_3(%arg0: i32) -> (i32, i32, i32) {
    %c0_i32 = arith.constant 0 : i32
    %c0_i32_0 = arith.constant 0 : i32
    %c0_i32_1 = arith.constant 0 : i32
    %c0_i32_2 = arith.constant 0 : i32
    return %c0_i32, %c0_i32_0, %c0_i32_1 : i32, i32, i32
  }
  func.func @transform_4(%arg0: i32) -> (i32, i32, i32) {
    %c0_i32 = arith.constant 0 : i32
    %c0_i32_0 = arith.constant 0 : i32
    %c0_i32_1 = arith.constant 0 : i32
    %c0_i32_2 = arith.constant 0 : i32
    return %c0_i32, %c0_i32_0, %c0_i32_1 : i32, i32, i32
  }
  func.func @transform_5(%arg0: i32) -> (i32, i32, i32) {
    %c0_i32 = arith.constant 0 : i32
    %c0_i32_0 = arith.constant 0 : i32
    %c0_i32_1 = arith.constant 0 : i32
    %c0_i32_2 = arith.constant 0 : i32
    return %c0_i32, %c0_i32_0, %c0_i32_1 : i32, i32, i32
  }
  func.func @transform_6(%arg0: i32) -> (i32, i32, i32) {
    %c0_i32 = arith.constant 0 : i32
    %c0_i32_0 = arith.constant 0 : i32
    %c0_i32_1 = arith.constant 0 : i32
    %c0_i32_2 = arith.constant 0 : i32
    return %c0_i32, %c0_i32_0, %c0_i32_1 : i32, i32, i32
  }
  func.func @transform_7(%arg0: i32) -> (i32, i32, i32) {
    %c0_i32 = arith.constant 0 : i32
    %c0_i32_0 = arith.constant 0 : i32
    %c0_i32_1 = arith.constant 0 : i32
    %c0_i32_2 = arith.constant 0 : i32
    return %c0_i32, %c0_i32_0, %c0_i32_1 : i32, i32, i32
  }
  func.func @transform_8(%arg0: i32) -> (i32, i32, i32) {
    %c0_i32 = arith.constant 0 : i32
    %c0_i32_0 = arith.constant 0 : i32
    %c0_i32_1 = arith.constant 0 : i32
    %c0_i32_2 = arith.constant 0 : i32
    return %c0_i32, %c0_i32_0, %c0_i32_1 : i32, i32, i32
  }
  func.func @transform_9(%arg0: i32) -> (i32, i32, i32) {
    %c0_i32 = arith.constant 0 : i32
    %c0_i32_0 = arith.constant 0 : i32
    %c0_i32_1 = arith.constant 0 : i32
    %c0_i32_2 = arith.constant 0 : i32
    return %c0_i32, %c0_i32_0, %c0_i32_1 : i32, i32, i32
  }
  func.func @transform_10(%arg0: i32) -> (i32, i32) {
    %c0_i32 = arith.constant 0 : i32
    %c0_i32_0 = arith.constant 0 : i32
    %c0_i32_1 = arith.constant 0 : i32
    return %c0_i32, %c0_i32_0 : i32, i32
  }
  func.func @transform_11(%arg0: i32) -> (i32, i32) {
    %c0_i32 = arith.constant 0 : i32
    %c0_i32_0 = arith.constant 0 : i32
    %c0_i32_1 = arith.constant 0 : i32
    return %c0_i32, %c0_i32_0 : i32, i32
  }
  func.func @transform_12(%arg0: i32) -> (i32, i32, i32) {
    %c0_i32 = arith.constant 0 : i32
    %c0_i32_0 = arith.constant 0 : i32
    %c0_i32_1 = arith.constant 0 : i32
    return %arg0, %c0_i32, %c0_i32_0 : i32, i32, i32
  }
}

</mosaic_0001>

<bundles_post_ra>
// kernel: tpu_custom_call.1
= control target key start
LH: loop header
LB: loop body
LE: loop exit
PB: predicated region body
PF: predicated region fallthrough
CT: control target
= control target key end

     0   :  { %v49_v3 = vlaneseq  ;;  %s6416_s27 = smov 64   ;;  %v6417_v10 = vmov 0.0|0.0   ;;  %vm152_vm0 = vcmask 523264   ;;  %s7972_s0 = inlined_call_operand.vmem [shape: f32[32,64], index: 0, kind: input, shape index: {}]   ;;  %s7973_s1 = inlined_call_operand.vmem [shape: f32[16,64], index: 1, kind: input, shape index: {}]   ;;  %s7974_s2 = inlined_call_operand.vmem [shape: f32[6,192,64], index: 2, kind: input, shape index: {}]   ;;  %s7975_s3 = inlined_call_operand.vmem [shape: f32[6,1,64], index: 3, kind: input, shape index: {}]   ;;  %s7976_s4 = inlined_call_operand.vmem [shape: f32[2,64,64], index: 4, kind: input, shape index: {}]   ;;  %s7977_s5 = inlined_call_operand.vmem [shape: f32[2,1,64], index: 5, kind: input, shape index: {}]   ;;  %s7978_s6 = inlined_call_operand.vmem [shape: f32[2,64,128], index: 6, kind: input, shape index: {}]   ;;  %s7979_s7 = inlined_call_operand.vmem [shape: f32[2,1,128], index: 7, kind: input, shape index: {}]   ;;  %s7980_s8 = inlined_call_operand.vmem [shape: f32[2,64,64], index: 8, kind: input, shape index: {}]   ;;  %s7981_s9 = inlined_call_operand.vmem [shape: f32[2,1,64], index: 9, kind: input, shape index: {}]   ;;  %s7982_s10 = inlined_call_operand.vmem [shape: f32[1,64], index: 10, kind: input, shape index: {}]   ;;  %s7983_s11 = inlined_call_operand.<no memory space> [shape: f32[1,1], index: 11, kind: input, shape index: {}]   ;;  %s7984_s12 = inlined_call_operand.hbm [shape: f32[1,1,32], index: 12, kind: output, shape index: {}]  }
   0x1   :  { %v43_v0 = vld [vmem:[%s7972_s0] sm:$0xff]  ;;  %v44_v1 = vld [vmem:[%s7972_s0 + $0x8] sm:$0xff]  ;;  %v45_v2 = vld [vmem:[%s7972_s0 + $0x10] sm:$0xff]  ;;  %5931 = vmatprep.subr.bf16.mxu0 %v6417_v10  ;;  %5967 = vmatprep.subr.bf16.mxu1 %v6417_v10 }
   0x2   :  { %140 = vrot.lane.b32.xlu0 %v43_v0, %s6416_s27  ;;  %144 = vrot.lane.b32.xlu1 %v45_v2, %s6416_s27  ;;  %v46_v4 = vld [vmem:[%s7972_s0 + $0x18] sm:$0xff]  ;;  %v157_v5 = vld [vmem:[%s7974_s2] sm:$0xff]  ;;  %v110_v6 = vrot.slane %v43_v0, 7  ;;  %v123_v7 = vrot.slane %v43_v0, 1  ;;  %v124_v8 = vrot.slane %v44_v1, 1  ;;  %v125_v12 = vrot.slane %v45_v2, 1 }
   0x3   :  { %v113_v9 = vrot.slane %v46_v4, 7  ;;  %v158_v11 = vld [vmem:[%s7974_s2 + $0x8] sm:$0xff]  ;;  %v159_v14 = vld [vmem:[%s7974_s2 + $0x10] sm:$0xff]  ;;  %v160_v15 = vld [vmem:[%s7974_s2 + $0x18] sm:$0xff]  ;;  %v6520_v16 = vshrl.u32 %v49_v3, 7  ;;  %v111_v17 = vrot.slane %v44_v1, 7 }
   0x4   :  { %v5932_v13 = vpack.c.bf16 %v158_v11, %v157_v5  ;;  %v126_v18 = vrot.slane %v46_v4, 1  ;;  %v112_v19 = vrot.slane %v45_v2, 7  ;;  %v5935_v20 = vpack.c.bf16 %v160_v15, %v159_v14  ;;  %v161_v23 = vld [vmem:[%s7974_s2 + $0x20] sm:$0xff]  ;;  %v162_v24 = vld [vmem:[%s7974_s2 + $0x28] sm:$0xff]  ;;  %v163_v30 = vld [vmem:[%s7974_s2 + $0x30] sm:$0xff] }
   0x5   :  { %vm127_vm1 = vcmp.lt.s32.totalorder %v6520_v16, 7  ;;  %vm114_vm2 = vcmp.lt.s32.totalorder %v6520_v16, 1  ;;  %v5938_v28 = vpack.c.bf16 %v162_v24, %v161_v23  ;;  %v164_v31 = vld [vmem:[%s7974_s2 + $0x38] sm:$0xff] }
   0x6   :  { %142 = vrot.lane.b32.xlu0 %v44_v1, %s6416_s27  ;;  %146 = vrot.lane.b32.xlu1 %v46_v4, %s6416_s27  ;;  %v130_v21 = vsel %vm127_vm1, %v123_v7, %v124_v8  ;;  %v6530_v22 = vsel %vm114_vm2, %v113_v9, %v110_v6  ;;  %v6542_v25 = vsel %vm127_vm1, %v124_v8, %v125_v12 }
   0x7   :  { %5933 = vmatpush1.bf16.msra.mxu0 %v5932_v13  ;;  %5173 = vmatprep.mubr.msk.f32.mxu0 %vm152_vm0, %v130_v21  ;;  %v6546_v26 = vsel %vm114_vm2, %v110_v6, %v111_v17  ;;  %v6550_v27 = vsel %vm127_vm1, %v125_v12, %v126_v18  ;;  %v6554_v29 = vsel %vm114_vm2, %v111_v17, %v112_v19 }
   0x8   :  { %5934 = vmatprep.subr.bf16.mxu0 %v6417_v10  ;;  %v6565_v32 = vsel %vm127_vm1, %v126_v18, %v123_v7 }
   0xb   :  { %5936 = vmatpush1.bf16.msra.mxu0 %v5935_v20 }
   0xc   :  { %5937 = vmatprep.subr.bf16.mxu0 %v6417_v10 }
   0xd   :  { %18 = vsyncpa [#allocation4], 0  ;;  %v6569_v33 = vsel %vm114_vm2, %v112_v19, %v113_v9  ;;  %v5941_v34 = vpack.c.bf16 %v164_v31, %v163_v30  ;;  %v165_v35 = vld [vmem:[%s7974_s2 + $0x40] sm:$0xff]  ;;  %v166_v36 = vld [vmem:[%s7974_s2 + $0x48] sm:$0xff]  ;;  %v51_v59 = vadd.s32 8, %v6520_v16  ;;  %v58_v60 = vand.u32 15, %v6520_v16 }
   0xe   :  { %v5944_v37 = vpack.c.bf16 %v166_v36, %v165_v35  ;;  %v167_v38 = vld [vmem:[%s7974_s2 + $0x50] sm:$0xff]  ;;  %v168_v39 = vld [vmem:[%s7974_s2 + $0x58] sm:$0xff]  ;;  %v169_v41 = vld [vmem:[%s7974_s2 + $0x60] sm:$0xff]  ;;  %v52_v62 = vadd.s32 16, %v6520_v16  ;;  %v53_v2 = vadd.s32 24, %v6520_v16  ;;  %vm853_vm7 = vcmask 130048  }
   0xf   :  { %5939 = vmatpush1.bf16.msra.mxu0 %v5938_v28  ;;  %v5947_v40 = vpack.c.bf16 %v168_v39, %v167_v38  ;;  %v170_v42 = vld [vmem:[%s7974_s2 + $0x68] sm:$0xff]  ;;  %v171_v44 = vld [vmem:[%s7974_s2 + $0x70] sm:$0xff]  ;;  %v172_v45 = vld [vmem:[%s7974_s2 + $0x78] sm:$0xff]  ;;  %v65_v61 = vand.u32 15, %v51_v59  ;;  %vm6632_vm3 = vcmp.eq.s32.totalorder %v58_v60, 0  ;;  %vm1026_vm8 = vcmask 64512  }
  0x10   :  { %5940 = vmatprep.subr.bf16.mxu0 %v6417_v10  ;;  %v5950_v43 = vpack.c.bf16 %v170_v42, %v169_v41  ;;  %v5953_v46 = vpack.c.bf16 %v172_v45, %v171_v44  ;;  %v173_v47 = vld [vmem:[%s7974_s2 + $0x80] sm:$0xff]  ;;  %v174_v48 = vld [vmem:[%s7974_s2 + $0x88] sm:$0xff]  ;;  %v175_v50 = vld [vmem:[%s7974_s2 + $0x90] sm:$0xff]  ;;  %v72_v1 = vand.u32 15, %v52_v62  ;;  %v119_v3 = vsel %vm6632_vm3, 0.0, %v6530_v22  ;;  %s6418_s21 = smov 112  }
  0x11   :  { %v5956_v49 = vpack.c.bf16 %v174_v48, %v173_v47  ;;  %v176_v51 = vld [vmem:[%s7974_s2 + $0x98] sm:$0xff]  ;;  %v177_v53 = vld [vmem:[%s7974_s2 + $0xa0] sm:$0xff]  ;;  %v178_v54 = vld [vmem:[%s7974_s2 + $0xa8] sm:$0xff]  ;;  %vm6636_vm4 = vcmp.eq.s32.totalorder %v65_v61, 15  ;;  %v79_v8 = vand.u32 15, %v53_v2  ;;  %s6419_s22 = smov 48  }
  0x12   :  { %v5959_v52 = vpack.c.bf16 %v176_v51, %v175_v50  ;;  %v5962_v55 = vpack.c.bf16 %v178_v54, %v177_v53  ;;  %v179_v56 = vld [vmem:[%s7974_s2 + $0xb0] sm:$0xff]  ;;  %v180_v57 = vld [vmem:[%s7974_s2 + $0xb8] sm:$0xff]  ;;  %v133_v5 = vsel %vm6636_vm4, 0.0, %v6542_v25  ;;  %vm6648_vm5 = vcmp.eq.s32.totalorder %v72_v1, 0  ;;  %v5177_v20 = vld [vmem:[%s7974_s2 + $0xc0] sm:$0xff]  ;;  %s6420_s23 = smov 96  }
  0x13   :  { %5942 = vmatpush1.bf16.msra.mxu0 %v5941_v34  ;;  %v5965_v58 = vpack.c.bf16 %v180_v57, %v179_v56  ;;  %v121_v12 = vsel %vm6648_vm5, 0.0, %v6554_v29  ;;  %vm6658_vm6 = vcmp.eq.s32.totalorder %v79_v8, 15  ;;  %v5178_v21 = vld [vmem:[%s7974_s2 + $0xc8] sm:$0xff]  ;;  %v5179_v22 = vld [vmem:[%s7974_s2 + $0xd0] sm:$0xff]  ;;  %v5180_v24 = vld [vmem:[%s7974_s2 + $0xd8] sm:$0xff]  ;;  %s6421_s24 = smov 32  }
  0x14   :  { %5943 = vmatprep.subr.bf16.mxu0 %v6417_v10  ;;  %v135_v18 = vsel %vm6658_vm6, 0.0, %v6565_v32  ;;  %v5968_v23 = vpack.c.bf16 %v5178_v21, %v5177_v20  ;;  %v5971_v25 = vpack.c.bf16 %v5180_v24, %v5179_v22  ;;  %v5183_v29 = vld [vmem:[%s7974_s2 + $0xf0] sm:$0xff]  ;;  %v5184_v30 = vld [vmem:[%s7974_s2 + $0xf8] sm:$0xff]  ;;  %v5185_v32 = vld [vmem:[%s7974_s2 + $0x100] sm:$0xff]  ;;  %s6422_s25 = smov 80   ;;  %s6423_s26 = smov 16  }
  0x15   :  { %v5977_v31 = vpack.c.bf16 %v5184_v30, %v5183_v29  ;;  %v5187_v35 = vld [vmem:[%s7974_s2 + $0x110] sm:$0xff]  ;;  %v5188_v36 = vld [vmem:[%s7974_s2 + $0x118] sm:$0xff]  ;;  %v5189_v38 = vld [vmem:[%s7974_s2 + $0x120] sm:$0xff]  ;;  %vm2461_vm9 = vcmask 261120   ;;  %vm2466_vm10 = vcmask 392192   ;;  %vm6424_vm11 = vmmov 0  }
  0x16   :  { %5969 = vmatpush1.bf16.msra.mxu1 %v5968_v23  ;;  %v5190_v39 = vld [vmem:[%s7974_s2 + $0x128] sm:$0xff]  ;;  %v5191_v41 = vld [vmem:[%s7974_s2 + $0x130] sm:$0xff]  ;;  %v5192_v42 = vld [vmem:[%s7974_s2 + $0x138] sm:$0xff]  ;;  %s6426_s14 = smov [#allocation3]   ;;  %vm5156_vm13 = vcmask 253952  }
  0x17   :  { %5945 = vmatpush1.bf16.msra.mxu0 %v5944_v37  ;;  %5970 = vmatprep.subr.bf16.mxu1 %v6417_v10  ;;  %v5983_v37 = vpack.c.bf16 %v5188_v36, %v5187_v35  ;;  %v5193_v44 = vld [vmem:[%s7974_s2 + $0x140] sm:$0xff]  ;;  %v5194_v45 = vld [vmem:[%s7974_s2 + $0x148] sm:$0xff]  ;;  %v5195_v47 = vld [vmem:[%s7974_s2 + $0x150] sm:$0xff]  ;;  %s5164_s15 = sshll.u32 %s6426_s14, 4  ;;  %s5165_s15 = int_to_ptr.vmem [resolvable:$true] %s5164_s15 }
  0x18   :  { %5946 = vmatprep.subr.bf16.mxu0 %v6417_v10  ;;  %v5196_v48 = vld [vmem:[%s7974_s2 + $0x158] sm:$0xff]  ;;  %v5197_v50 = vld [vmem:[%s7974_s2 + $0x160] sm:$0xff]  ;;  %v5198_v51 = vld [vmem:[%s7974_s2 + $0x168] sm:$0xff]  ;;  %s6396_s0 = scalar_lea.vmem %s5165_s15, 32  ;;  %p6397_p1 = scmp.lt.s32.totalorder %s5165_s15, %s5165_s15 }
  0x19   :  { %v5199_v53 = vld [vmem:[%s7974_s2 + $0x170] sm:$0xff]  ;;  %v5200_v54 = vld [vmem:[%s7974_s2 + $0x178] sm:$0xff]  ;;  %v5172_v56 = vld [vmem:[%s7975_s3] ss:$0 sm:$0xff] }
  0x1a   :  { %5972 = vmatpush1.bf16.msra.mxu1 %v5971_v25  ;;  %v5385_v7 = vld [vmem:[%s7976_s4 + $0x68] sm:$0xff]  ;;  %v5386_v14 = vld [vmem:[%s7976_s4 + $0x70] sm:$0xff]  ;;  %vm6245_vm12 = vmpackc.low %vm152_vm0, %vm152_vm0 }
  0x1b   :  { %5948 = vmatpush1.bf16.msra.mxu0 %v5947_v40  ;;  %5973 = vmatprep.subr.bf16.mxu1 %v6417_v10  ;;  %v5986_v40 = vpack.c.bf16 %v5190_v39, %v5189_v38 }
  0x1c   :  { %5949 = vmatprep.subr.bf16.mxu0 %v6417_v10 }
  0x1f   :  { %5951 = vmatpush1.bf16.msra.mxu0 %v5950_v43  ;;  %v5989_v43 = vpack.c.bf16 %v5192_v42, %v5191_v41 }
  0x20   :  { %5952 = vmatprep.subr.bf16.mxu0 %v6417_v10 }
  0x23   :  { %5954 = vmatpush1.bf16.msra.mxu0 %v5953_v46  ;;  %v5992_v46 = vpack.c.bf16 %v5194_v45, %v5193_v44  ;;  %v5208_v44 = vld [vmem:[%s7974_s2 + $0x188] sm:$0xff]  ;;  %v5209_v45 = vld [vmem:[%s7974_s2 + $0x190] sm:$0xff] }
  0x24   :  { %5955 = vmatprep.subr.bf16.mxu0 %v6417_v10 }
  0x27   :  { %5957 = vmatpush1.bf16.msra.mxu0 %v5956_v49  ;;  %v5995_v49 = vpack.c.bf16 %v5196_v48, %v5195_v47  ;;  %v5210_v47 = vld [vmem:[%s7974_s2 + $0x198] sm:$0xff] }
  0x28   :  { %5958 = vmatprep.subr.bf16.mxu0 %v6417_v10  ;;  %v6007_v48 = vpack.c.bf16 %v5210_v47, %v5209_v45 }
  0x2b   :  { %5960 = vmatpush1.bf16.msra.mxu0 %v5959_v52  ;;  %v5998_v52 = vpack.c.bf16 %v5198_v51, %v5197_v50  ;;  %v5212_v50 = vld [vmem:[%s7974_s2 + $0x1a8] sm:$0xff] }
  0x2c   :  { %5961 = vmatprep.subr.bf16.mxu0 %v6417_v10 }
  0x2f   :  { %5963 = vmatpush1.bf16.msra.mxu0 %v5962_v55  ;;  %v6001_v55 = vpack.c.bf16 %v5200_v54, %v5199_v53  ;;  %v5214_v53 = vld [vmem:[%s7974_s2 + $0x1b8] sm:$0xff] }
  0x30   :  { %5964 = vmatprep.subr.bf16.mxu0 %v6417_v10 }
  0x33   :  { %5966 = vmatpush1.bf16.msra.mxu0 %v5965_v58 }
  0x34   :  { %6003 = vmatprep.subr.bf16.mxu0 %v6417_v10 }
  0x74   :  { %v141_v4 = vpop.permute.xlu0 %140  ;;  %v145_v9 = vpop.permute.xlu1 %144 }
  0x75   :  { %v153_v6 = vsel %vm152_vm0, %v119_v3, %v141_v4  ;;  %v155_v15 = vsel %vm152_vm0, %v121_v12, %v145_v9 }
  0x76   :  { %265 = vmatmul.mubr.f32.vlgmr.msra.gmra.mrb[0].mxu0 %v153_v6 }
  0x77   :  { %5174 = vmatprep.mubr.msk.f32.mxu0 %vm152_vm0, %v133_v5 }
  0x78   :  { %v143_v11 = vpop.permute.xlu0 %142  ;;  %v147_v17 = vpop.permute.xlu1 %146 }
  0x79   :  { %v154_v13 = vsel %vm152_vm0, %v6546_v26, %v143_v11  ;;  %v156_v19 = vsel %vm152_vm0, %v6569_v33, %v147_v17  ;;  %v5181_v26 = vld [vmem:[%s7974_s2 + $0xe0] sm:$0xff]  ;;  %v5186_v33 = vld [vmem:[%s7974_s2 + $0x108] sm:$0xff] }
  0x7a   :  { %270 = vmatmul.mubr.f32.gmra.mrb[2].mxu0 %v154_v13  ;;  %v5980_v34 = vpack.c.bf16 %v5186_v33, %v5185_v32 }
  0x7b   :  { %5175 = vmatprep.mubr.msk.f32.mxu0 %vm152_vm0, %v6550_v27  ;;  %v5182_v27 = vld [vmem:[%s7974_s2 + $0xe8] sm:$0xff] }
  0x7c   :  { %v5974_v28 = vpack.c.bf16 %v5182_v27, %v5181_v26 }
  0x7e   :  { %275 = vmatmul.mubr.f32.gmra.mrb[4].mxu0 %v155_v15  ;;  %5975 = vmatpush1.bf16.msra.mxu1 %v5974_v28 }
  0x7f   :  { %5176 = vmatprep.mubr.msk.f32.mxu0 %vm152_vm0, %v135_v18  ;;  %5976 = vmatprep.subr.bf16.mxu1 %v6417_v10 }
  0x82   :  { %280 = vmatmul.mubr.f32.gmra.mrb[6].mxu0 %v156_v19  ;;  %5978 = vmatpush1.bf16.msra.mxu1 %v5977_v31 }
  0x83   :  { %5979 = vmatprep.subr.bf16.mxu1 %v6417_v10 }
  0x86   :  { %5981 = vmatpush1.bf16.msra.mxu1 %v5980_v34 }
  0x87   :  { %5982 = vmatprep.subr.bf16.mxu1 %v6417_v10 }
  0x8a   :  { %5984 = vmatpush1.bf16.msra.mxu1 %v5983_v37 }
  0x8b   :  { %5985 = vmatprep.subr.bf16.mxu1 %v6417_v10 }
  0x8e   :  { %5987 = vmatpush1.bf16.msra.mxu1 %v5986_v40 }
  0x8f   :  { %5988 = vmatprep.subr.bf16.mxu1 %v6417_v10 }
  0x92   :  { %5990 = vmatpush1.bf16.msra.mxu1 %v5989_v43  ;;  %v5207_v43 = vld [vmem:[%s7974_s2 + $0x180] sm:$0xff] }
  0x93   :  { %5991 = vmatprep.subr.bf16.mxu1 %v6417_v10 }
  0x96   :  { %5993 = vmatpush1.bf16.msra.mxu1 %v5992_v46  ;;  %v6004_v46 = vpack.c.bf16 %v5208_v44, %v5207_v43 }
  0x97   :  { %5994 = vmatprep.subr.bf16.mxu1 %v6417_v10 }
  0x98   :  { %6005 = vmatpush1.bf16.msra.mxu0 %v6004_v46 }
  0x99   :  { %6006 = vmatprep.subr.bf16.mxu0 %v6417_v10 }
  0x9a   :  { %5996 = vmatpush1.bf16.msra.mxu1 %v5995_v49  ;;  %v5211_v49 = vld [vmem:[%s7974_s2 + $0x1a0] sm:$0xff] }
  0x9b   :  { %5997 = vmatprep.subr.bf16.mxu1 %v6417_v10  ;;  %v6010_v51 = vpack.c.bf16 %v5212_v50, %v5211_v49 }
  0x9c   :  { %6008 = vmatpush1.bf16.msra.mxu0 %v6007_v48 }
  0x9d   :  { %6009 = vmatprep.subr.bf16.mxu0 %v6417_v10 }
  0x9e   :  { %5999 = vmatpush1.bf16.msra.mxu1 %v5998_v52  ;;  %v5213_v52 = vld [vmem:[%s7974_s2 + $0x1b0] sm:$0xff] }
  0x9f   :  { %6000 = vmatprep.subr.bf16.mxu1 %v6417_v10  ;;  %v6013_v54 = vpack.c.bf16 %v5214_v53, %v5213_v52 }
  0xa0   :  { %6011 = vmatpush1.bf16.msra.mxu0 %v6010_v51 }
  0xa1   :  { %6012 = vmatprep.subr.bf16.mxu0 %v6417_v10 }
  0xa2   :  { %6002 = vmatpush1.bf16.msra.mxu1 %v6001_v55  ;;  %v5215_v55 = vld [vmem:[%s7974_s2 + $0x1c0] sm:$0xff] }
  0xa4   :  { %6014 = vmatpush1.bf16.msra.mxu0 %v6013_v54 }
  0xa5   :  { %6015 = vmatprep.subr.bf16.mxu0 %v6417_v10 }
 0x149   :  { %v266_v57 = vpop.f32.mrb[0].mxu0 }
 0x14a   :  { %v267_v58 = vadd.f32 %v5172_v56, %v266_v57  ;;  %v268_v59 = vpop.f32.mrb[1].mxu0 }
 0x14b   :  { %v5218_v59 = vld [vmem:[%s7974_s2 + $0x1d8] sm:$0xff] }
 0x14c   :  { %v285_v60 = vmax.f32 %v267_v58, 0.0  ;;  %v5217_v58 = vld [vmem:[%s7974_s2 + $0x1d0] sm:$0xff] }
 0x14d   :  { %v271_v61 = vpop.f32.mrb[2].mxu0 }
 0x14e   :  { %v272_v62 = vadd.f32 %v5172_v56, %v271_v61  ;;  %317 = vrot.lane.b32.xlu0 %v285_v60, %s6416_s27  ;;  %v273_v1 = vpop.f32.mrb[3].mxu0  ;;  %v289_v3 = vrot.slane %v285_v60, 7  ;;  %v301_v9 = vrot.slane %v285_v60, 1  ;;  %v6019_v60 = vpack.c.bf16 %v5218_v59, %v5217_v58  ;;  %v5219_v61 = vld [vmem:[%s7974_s2 + $0x1e0] sm:$0xff] }
 0x150   :  { %v286_v2 = vmax.f32 %v272_v62, 0.0  ;;  %v5220_v62 = vld [vmem:[%s7974_s2 + $0x1e8] sm:$0xff] }
 0x151   :  { %v276_v4 = vpop.f32.mrb[4].mxu0  ;;  %v6022_v1 = vpack.c.bf16 %v5220_v62, %v5219_v61 }
 0x152   :  { %v290_v5 = vrot.slane %v286_v2, 7  ;;  %v277_v6 = vadd.f32 %v5172_v56, %v276_v4  ;;  %319 = vrot.lane.b32.xlu1 %v286_v2, %s6416_s27  ;;  %v278_v8 = vpop.f32.mrb[5].mxu0  ;;  %v302_v11 = vrot.slane %v286_v2, 1  ;;  %v5221_v2 = vld [vmem:[%s7974_s2 + $0x1f0] sm:$0xff] }
 0x154   :  { %v287_v12 = vmax.f32 %v277_v6, 0.0  ;;  %v307_v13 = vsel %vm127_vm1, %v301_v9, %v302_v11  ;;  %v295_v15 = vsel %vm114_vm2, %v289_v3, %v290_v5  ;;  %v5224_v6 = vld [vmem:[%s7974_s2 + $0x208] sm:$0xff] }
 0x155   :  { %v281_v17 = vpop.f32.mrb[6].mxu0  ;;  %5203 = vmatprep.mubr.msk.f32.mxu1 %vm152_vm0, %v307_v13  ;;  %v5227_v13 = vld [vmem:[%s7974_s2 + $0x220] sm:$0xff] }
 0x156   :  { %v291_v18 = vrot.slane %v287_v12, 7  ;;  %v303_v19 = vrot.slane %v287_v12, 1  ;;  %v282_v20 = vadd.f32 %v5172_v56, %v281_v17  ;;  %321 = vrot.lane.b32.xlu0 %v287_v12, %s6416_s27  ;;  %v283_v21 = vpop.f32.mrb[7].mxu0  ;;  %v5216_v56 = vld [vmem:[%s7974_s2 + $0x1c8] sm:$0xff] }
 0x157   :  { %v6016_v57 = vpack.c.bf16 %v5216_v56, %v5215_v55  ;;  %v5202_v21 = vld [vmem:[%s7975_s3 + $0x1] ss:$0 sm:$0xff] }
 0x158   :  { %v288_v22 = vmax.f32 %v282_v20, 0.0  ;;  %v306_v23 = vsel %vm127_vm1, %v302_v11, %v303_v19  ;;  %v294_v24 = vsel %vm114_vm2, %v290_v5, %v291_v18  ;;  %v5223_v5 = vld [vmem:[%s7974_s2 + $0x200] sm:$0xff]  ;;  %v5226_v11 = vld [vmem:[%s7974_s2 + $0x218] sm:$0xff] }
 0x159   :  { %v310_v34 = vsel %vm6636_vm4, 0.0, %v306_v23  ;;  %v299_v38 = vsel %vm6648_vm5, 0.0, %v294_v24  ;;  %6017 = vmatpush1.bf16.msra.mxu0 %v6016_v57  ;;  %v6028_v8 = vpack.c.bf16 %v5224_v6, %v5223_v5 }
 0x15a   :  { %v292_v25 = vrot.slane %v288_v22, 7  ;;  %v304_v26 = vrot.slane %v288_v22, 1  ;;  %323 = vrot.lane.b32.xlu1 %v288_v22, %s6416_s27  ;;  %6018 = vmatprep.subr.bf16.mxu0 %v6417_v10 }
 0x15c   :  { %v296_v27 = vsel %vm114_vm2, %v292_v25, %v289_v3  ;;  %v305_v28 = vsel %vm127_vm1, %v303_v19, %v304_v26  ;;  %v308_v29 = vsel %vm127_vm1, %v304_v26, %v301_v9  ;;  %v293_v30 = vsel %vm114_vm2, %v291_v18, %v292_v25  ;;  %v5222_v3 = vld [vmem:[%s7974_s2 + $0x1f8] sm:$0xff]  ;;  %v5225_v9 = vld [vmem:[%s7974_s2 + $0x210] sm:$0xff] }
 0x15d   :  { %v297_v32 = vsel %vm6632_vm3, 0.0, %v296_v27  ;;  %v312_v40 = vsel %vm6658_vm6, 0.0, %v308_v29  ;;  %6020 = vmatpush1.bf16.msra.mxu0 %v6019_v60  ;;  %v6025_v4 = vpack.c.bf16 %v5222_v3, %v5221_v2  ;;  %v6031_v12 = vpack.c.bf16 %v5226_v11, %v5225_v9  ;;  %v5229_v18 = vld [vmem:[%s7974_s2 + $0x230] sm:$0xff]  ;;  %v5230_v19 = vld [vmem:[%s7974_s2 + $0x238] sm:$0xff]  ;;  %v645_v29 = vld [vmem:[%s7976_s4] sm:$0xff] }
 0x15e   :  { %6021 = vmatprep.subr.bf16.mxu0 %v6417_v10  ;;  %v6037_v20 = vpack.c.bf16 %v5230_v19, %v5229_v18  ;;  %v652_v18 = vld [vmem:[%s7976_s4 + $0x38] sm:$0xff] }
 0x161   :  { %6023 = vmatpush1.bf16.msra.mxu0 %v6022_v1 }
 0x162   :  { %6024 = vmatprep.subr.bf16.mxu0 %v6417_v10 }
 0x165   :  { %6026 = vmatpush1.bf16.msra.mxu0 %v6025_v4 }
 0x166   :  { %6027 = vmatprep.subr.bf16.mxu0 %v6417_v10 }
 0x169   :  { %6029 = vmatpush1.bf16.msra.mxu0 %v6028_v8 }
 0x16a   :  { %6030 = vmatprep.subr.bf16.mxu0 %v6417_v10 }
 0x16d   :  { %6032 = vmatpush1.bf16.msra.mxu0 %v6031_v12  ;;  %v649_v12 = vld [vmem:[%s7976_s4 + $0x20] sm:$0xff] }
 0x16e   :  { %6033 = vmatprep.subr.bf16.mxu0 %v6417_v10 }
 0x1c0   :  { %v318_v31 = vpop.permute.xlu0 %317 }
 0x1c1   :  { %v329_v33 = vsel %vm152_vm0, %v297_v32, %v318_v31  ;;  %v647_v31 = vld [vmem:[%s7976_s4 + $0x10] sm:$0xff] }
 0x1c2   :  { %443 = vmatmul.mubr.f32.vlgmr.msra.gmra.mrb[0].mxu1 %v329_v33  ;;  %v648_v33 = vld [vmem:[%s7976_s4 + $0x18] sm:$0xff] }
 0x1c3   :  { %5204 = vmatprep.mubr.msk.f32.mxu1 %vm152_vm0, %v310_v34 }
 0x1c4   :  { %v320_v35 = vpop.permute.xlu1 %319 }
 0x1c5   :  { %v330_v36 = vsel %vm152_vm0, %v295_v15, %v320_v35  ;;  %v5228_v15 = vld [vmem:[%s7974_s2 + $0x228] sm:$0xff]  ;;  %v6043_v35 = vpack.c.bf16 %v648_v33, %v647_v31 }
 0x1c6   :  { %448 = vmatmul.mubr.f32.gmra.mrb[2].mxu1 %v330_v36  ;;  %v6034_v17 = vpack.c.bf16 %v5228_v15, %v5227_v13  ;;  %v650_v13 = vld [vmem:[%s7976_s4 + $0x28] sm:$0xff] }
 0x1c7   :  { %5205 = vmatprep.mubr.msk.f32.mxu1 %vm152_vm0, %v305_v28  ;;  %v6047_v15 = vpack.c.bf16 %v650_v13, %v649_v12 }
 0x1c8   :  { %v322_v37 = vpop.permute.xlu0 %321  ;;  %6035 = vmatpush1.bf16.msra.mxu0 %v6034_v17  ;;  %v651_v17 = vld [vmem:[%s7976_s4 + $0x30] sm:$0xff] }
 0x1c9   :  { %v331_v39 = vsel %vm152_vm0, %v299_v38, %v322_v37  ;;  %6036 = vmatprep.subr.bf16.mxu0 %v6417_v10  ;;  %v6051_v19 = vpack.c.bf16 %v652_v18, %v651_v17 }
 0x1ca   :  { %453 = vmatmul.mubr.f32.gmra.mrb[4].mxu1 %v331_v39 }
 0x1cb   :  { %5206 = vmatprep.mubr.msk.f32.mxu1 %vm152_vm0, %v312_v40 }
 0x1cc   :  { %v324_v41 = vpop.permute.xlu1 %323  ;;  %6038 = vmatpush1.bf16.msra.mxu0 %v6037_v20  ;;  %v757_v20 = vld [vmem:[%s7978_s6] sm:$0xff] }
 0x1cd   :  { %v332_v42 = vsel %vm152_vm0, %v293_v30, %v324_v41  ;;  %v646_v30 = vld [vmem:[%s7976_s4 + $0x8] sm:$0xff] }
 0x1ce   :  { %458 = vmatmul.mubr.f32.gmra.mrb[6].mxu1 %v332_v42  ;;  %v6039_v32 = vpack.c.bf16 %v646_v30, %v645_v29  ;;  %v759_v29 = vld [vmem:[%s7978_s6 + $0x10] sm:$0xff]  ;;  %v760_v30 = vld [vmem:[%s7978_s6 + $0x18] sm:$0xff] }
 0x1d0   :  { %6040 = vmatprep.subr.bf16.mxu1 %v6039_v32 }
 0x1d1   :  { %6042 = vmatpush3.bf16.msra.mxu1 %v6039_v32 }
 0x1d2   :  { %6044 = vmatprep.subr.bf16.mxu1 %v6043_v35 }
 0x1d5   :  { %6046 = vmatpush3.bf16.msra.mxu1 %v6043_v35 }
 0x1d6   :  { %6048 = vmatprep.subr.bf16.mxu1 %v6047_v15 }
 0x1d9   :  { %6050 = vmatpush3.bf16.msra.mxu1 %v6047_v15 }
 0x1da   :  { %6052 = vmatprep.subr.bf16.mxu1 %v6051_v19 }
 0x1dd   :  { %6054 = vmatpush3.bf16.msra.mxu1 %v6051_v19 }
 0x295   :  { %v444_v22 = vpop.f32.mrb[0].mxu1 }
 0x296   :  { %v445_v23 = vadd.f32 %v5202_v21, %v444_v22  ;;  %v446_v24 = vpop.f32.mrb[1].mxu1 }
 0x298   :  { %v463_v25 = vmax.f32 %v445_v23, 0.0  ;;  %v5232_v23 = vld [vmem:[%s7975_s3 + $0x2] ss:$0 sm:$0xff] }
 0x299   :  { %v449_v26 = vpop.f32.mrb[2].mxu1 }
 0x29a   :  { %v450_v27 = vadd.f32 %v5202_v21, %v449_v26  ;;  %495 = vrot.lane.b32.xlu0 %v463_v25, %s6416_s27  ;;  %v451_v28 = vpop.f32.mrb[3].mxu1  ;;  %v467_v36 = vrot.slane %v463_v25, 7  ;;  %v479_v38 = vrot.slane %v463_v25, 1 }
 0x29c   :  { %v464_v34 = vmax.f32 %v450_v27, 0.0 }
 0x29d   :  { %v454_v37 = vpop.f32.mrb[4].mxu1 }
 0x29e   :  { %v468_v39 = vrot.slane %v464_v34, 7  ;;  %v480_v40 = vrot.slane %v464_v34, 1  ;;  %v455_v41 = vadd.f32 %v5202_v21, %v454_v37  ;;  %497 = vrot.lane.b32.xlu1 %v464_v34, %s6416_s27  ;;  %v456_v42 = vpop.f32.mrb[5].mxu1  ;;  %v6059_v34 = vpack.c.bf16 %v760_v30, %v759_v29  ;;  %v762_v37 = vld [vmem:[%s7978_s6 + $0x28] sm:$0xff] }
 0x2a0   :  { %v465_v43 = vmax.f32 %v455_v41, 0.0  ;;  %v485_v44 = vsel %vm127_vm1, %v479_v38, %v480_v40  ;;  %v473_v45 = vsel %vm114_vm2, %v467_v36, %v468_v39 }
 0x2a1   :  { %v459_v46 = vpop.f32.mrb[6].mxu1  ;;  %5233 = vmatprep.mubr.msk.f32.mxu0 %vm152_vm0, %v485_v44  ;;  %v764_v44 = vld [vmem:[%s7978_s6 + $0x38] sm:$0xff] }
 0x2a2   :  { %v469_v47 = vrot.slane %v465_v43, 7  ;;  %v481_v48 = vrot.slane %v465_v43, 1  ;;  %v460_v49 = vadd.f32 %v5202_v21, %v459_v46  ;;  %v461_v50 = vpop.f32.mrb[7].mxu1  ;;  %499 = vrot.lane.b32.xlu0 %v465_v43, %s6416_s27  ;;  %v758_v21 = vld [vmem:[%s7978_s6 + $0x8] sm:$0xff]  ;;  %v763_v43 = vld [vmem:[%s7978_s6 + $0x30] sm:$0xff] }
 0x2a3   :  { %v6055_v22 = vpack.c.bf16 %v758_v21, %v757_v20  ;;  %v48_v50 = vld [vmem:[%s7973_s1 + $0x8] sm:$0xff] }
 0x2a4   :  { %v466_v51 = vmax.f32 %v460_v49, 0.0  ;;  %v484_v52 = vsel %vm127_vm1, %v480_v40, %v481_v48  ;;  %v472_v53 = vsel %vm114_vm2, %v468_v39, %v469_v47  ;;  %v47_v49 = vld [vmem:[%s7973_s1] sm:$0xff] }
 0x2a5   :  { %v488_v1 = vsel %vm6636_vm4, 0.0, %v484_v52  ;;  %v477_v5 = vsel %vm6648_vm5, 0.0, %v472_v53  ;;  %6056 = vmatprep.subr.bf16.mxu1 %v6055_v22 }
 0x2a6   :  { %v470_v54 = vrot.slane %v466_v51, 7  ;;  %v482_v55 = vrot.slane %v466_v51, 1  ;;  %501 = vrot.lane.b32.xlu1 %v466_v51, %s6416_s27  ;;  %v5237_v51 = vld [vmem:[%s7977_s5] ss:$0 sm:$0xff] }
 0x2a8   :  { %v474_v56 = vsel %vm114_vm2, %v470_v54, %v467_v36  ;;  %v483_v57 = vsel %vm127_vm1, %v481_v48, %v482_v55  ;;  %v486_v58 = vsel %vm127_vm1, %v482_v55, %v479_v38  ;;  %v471_v59 = vsel %vm114_vm2, %v469_v47, %v470_v54  ;;  %v761_v36 = vld [vmem:[%s7978_s6 + $0x20] sm:$0xff] }
 0x2a9   :  { %v475_v61 = vsel %vm6632_vm3, 0.0, %v474_v56  ;;  %v490_v8 = vsel %vm6658_vm6, 0.0, %v486_v58  ;;  %v6063_v41 = vpack.c.bf16 %v762_v37, %v761_v36  ;;  %v6067_v48 = vpack.c.bf16 %v764_v44, %v763_v43 }
 0x30c   :  { %v496_v60 = vpop.permute.xlu0 %495 }
 0x30d   :  { %v507_v62 = vsel %vm152_vm0, %v475_v61, %v496_v60 }
 0x30e   :  { %621 = vmatmul.mubr.f32.vlgmr.msra.gmra.mrb[8].mxu0 %v507_v62 }
 0x30f   :  { %5234 = vmatprep.mubr.msk.f32.mxu0 %vm152_vm0, %v488_v1 }
 0x310   :  { %v498_v2 = vpop.permute.xlu1 %497 }
 0x311   :  { %v508_v3 = vsel %vm152_vm0, %v473_v45, %v498_v2 }
 0x312   :  { %626 = vmatmul.mubr.f32.gmra.mrb[10].mxu0 %v508_v3 }
 0x313   :  { %5235 = vmatprep.mubr.msk.f32.mxu0 %vm152_vm0, %v483_v57  ;;  %v5242_v57 = vld [vmem:[%s7979_s7] ss:$0 sm:$0xff] }
 0x314   :  { %v500_v4 = vpop.permute.xlu0 %499 }
 0x315   :  { %v509_v6 = vsel %vm152_vm0, %v477_v5, %v500_v4 }
 0x316   :  { %631 = vmatmul.mubr.f32.gmra.mrb[12].mxu0 %v509_v6 }
 0x317   :  { %5236 = vmatprep.mubr.msk.f32.mxu0 %vm152_vm0, %v490_v8 }
 0x318   :  { %v502_v9 = vpop.permute.xlu1 %501 }
 0x319   :  { %v510_v11 = vsel %vm152_vm0, %v471_v59, %v502_v9 }
 0x31a   :  { %636 = vmatmul.mubr.f32.gmra.mrb[14].mxu0 %v510_v11 }
 0x3e1   :  { %v622_v24 = vpop.f32.mrb[8].mxu0 }
 0x3e2   :  { %v6948_v25 = vadd.f32 %v5232_v23, %v622_v24  ;;  %v624_v26 = vpop.f32.mrb[9].mxu0 }
 0x3e4   :  { %v641_v27 = vmax.f32 %v6948_v25, 0.0 }
 0x3e5   :  { %v627_v28 = vpop.f32.mrb[10].mxu0 }
 0x3e6   :  { %v6957_v31 = vadd.f32 %v5232_v23, %v627_v28  ;;  %v629_v32 = vpop.f32.mrb[11].mxu0  ;;  %5650 = vmatprep.mubr.msk.f32.mxu1 %vm152_vm0, %v641_v27 }
 0x3e8   :  { %v642_v33 = vmax.f32 %v6957_v31, 0.0 }
 0x3e9   :  { %v632_v35 = vpop.f32.mrb[12].mxu0 }
 0x3ea   :  { %v6969_v38 = vadd.f32 %v5232_v23, %v632_v35  ;;  %v634_v39 = vpop.f32.mrb[13].mxu0  ;;  %5651 = vmatmul.mubr.msk.f32.vlgmr.msra.gmra.mrb[8].mxu1 %vm152_vm0, %v642_v33 }
 0x3eb   :  { %6058 = vmatpush3.bf16.msra.mxu1 %v6055_v22 }
 0x3ec   :  { %v643_v40 = vmax.f32 %v6969_v38, 0.0  ;;  %6060 = vmatprep.subr.bf16.mxu1 %v6059_v34 }
 0x3ed   :  { %v637_v42 = vpop.f32.mrb[14].mxu0 }
 0x3ee   :  { %v6981_v45 = vadd.f32 %v5232_v23, %v637_v42  ;;  %v639_v46 = vpop.f32.mrb[15].mxu0  ;;  %5653 = vmatprep.mubr.msk.f32.mxu1 %vm152_vm0, %v643_v40 }
 0x3ef   :  { %6062 = vmatpush3.bf16.msra.mxu1 %v6059_v34 }
 0x3f0   :  { %v644_v47 = vmax.f32 %v6981_v45, 0.0  ;;  %6064 = vmatprep.subr.bf16.mxu1 %v6063_v41 }
 0x3f2   :  { %5654 = vmatmul.mubr.msk.f32.gmra.mrb[10].mxu1 %vm152_vm0, %v644_v47 }
 0x3f3   :  { %6066 = vmatpush3.bf16.msra.mxu1 %v6063_v41  ;;  %5672 = vmatprep.mubr.msk.f32.mxu1 %vm152_vm0, %v47_v49 }
 0x3f4   :  { %6068 = vmatprep.subr.bf16.mxu1 %v6067_v48 }
 0x3f7   :  { %6070 = vmatpush3.bf16.msra.mxu1 %v6067_v48 }
 0x3fa   :  { %5673 = vmatmul.mubr.msk.f32.vlgmr.msra.gmra.mrb[12].mxu1 %vm152_vm0, %v48_v50 }
 0x4bd   :  { %v5652_v52 = vpop.f32.mrb[8].mxu1 }
 0x4be   :  { %v738_v53 = vpop.f32.mrb[9].mxu1  ;;  %v7016_v62 = vadd.f32 %v5652_v52, %v5237_v51 }
 0x4bf   :  { %v7001_v54 = vadd.f32 %v5237_v51, %v738_v53 }
 0x4c1   :  { %5677 = vmatprep.mubr.msk.f32.mxu1 %vm853_vm7, %v7001_v54 }
 0x4c5   :  { %v5655_v55 = vpop.f32.mrb[10].mxu1 }
 0x4c6   :  { %v748_v56 = vpop.f32.mrb[11].mxu1  ;;  %v7028_v2 = vadd.f32 %v5655_v55, %v5237_v51 }
 0x4c7   :  { %v7020_v1 = vadd.f32 %v5237_v51, %v748_v56 }
 0x4cd   :  { %v5674_v58 = vpop.f32.mrb[12].mxu1 }
 0x4ce   :  { %v844_v59 = vpop.f32.mrb[13].mxu1  ;;  %v7010_v61 = vadd.f32 %v5674_v58, %v5242_v57 }
 0x4cf   :  { %v7008_v60 = vadd.f32 %v5242_v57, %v844_v59 }
 0x4d1   :  { %5675 = vmatprep.subr.msk.mxu1 %vm853_vm7, %v7008_v60 }
 0x4d2   :  { %5676 = vmatpush3.xpose.msk.msra.mxu1 %vm853_vm7, %v7008_v60 }
 0x4d3   :  { %5680 = vmatprep.subr.msk.mxu1 %vm853_vm7, %v7010_v61 }
 0x4d5   :  { %5678 = vmatmul.mubr.msk.f32.vlgmr.msra.gmra.mrb[14].mxu1 %vm853_vm7, %v7016_v62 }
 0x4d6   :  { %5681 = vmatpush3.xpose.msk.msra.mxu1 %vm853_vm7, %v7010_v61  ;;  %5682 = vmatprep.mubr.msk.f32.mxu1 %vm853_vm7, %v7020_v1 }
 0x4d9   :  { %5683 = vmatmul.mubr.msk.f32.vlgmr.msra.gmra.mrb[16].mxu1 %vm853_vm7, %v7028_v2 }
 0x5a8   :  { %v5679_v3 = vpop.f32.mrb[14].mxu1 }
 0x5a9   :  { %v1023_v4 = vmul.f32 0.25, %v5679_v3  ;;  %v929_v5 = vpop.f32.mrb[15].mxu1 }
 0x5aa   :  { %v1022_v6 = vmul.f32 0.25, %v929_v5 }
 0x5ab   :  { %v1030_v8 = vsel %vm1026_vm8, %v1023_v4, -inf }
 0x5ac   :  { %1031 = vmax.xlane.f32.xlu1 %v1030_v8  ;;  %v5684_v9 = vpop.f32.mrb[16].mxu1  ;;  %v1027_v11 = vsel %vm1026_vm8, %v1022_v6, -inf }
 0x5ad   :  { %1028 = vmax.xlane.f32.xlu0 %v1027_v11  ;;  %v1013_v12 = vpop.f32.mrb[17].mxu1  ;;  %v1025_v15 = vmul.f32 0.25, %v5684_v9 }
 0x5ae   :  { %v1024_v13 = vmul.f32 0.25, %v1013_v12 }
 0x5af   :  { %v1036_v18 = vsel %vm1026_vm8, %v1025_v15, -inf }
 0x5b0   :  { %v1033_v17 = vsel %vm1026_vm8, %v1024_v13, -inf }
 0x5b1   :  { %1034 = vmax.xlane.f32.xlu0 %v1033_v17 }
 0x5b5   :  { %1037 = vmax.xlane.f32.xlu0 %v1036_v18 }
 0x5bd   :  { %1071 = vrot.lane.b32.xlu1 %v7008_v60, %s6416_s27 }
 0x5c1   :  { %1243 = vrot.lane.b32.xlu1 %v7008_v60, %s6418_s21 }
 0x639   :  { %v1032_v19 = vpop.xlane.xlu1 %1031 }
 0x63a   :  { %v1040_v20 = vsub.f32 %v1023_v4, %v1032_v19  ;;  %v1029_v21 = vpop.xlane.xlu0 %1028 }
 0x63b   :  { %v1039_v22 = vsub.f32 %v1022_v6, %v1029_v21 }
 0x63c   :  { %v1045_v23 = vmul.f32 1.442695, %v1040_v20 }
 0x63d   :  { %v1043_v24 = vmul.f32 1.442695, %v1039_v22  ;;  %v1072_v26 = vpop.permute.xlu1 %1071 }
 0x63e   :  { %6262 = vpow2.f32 %v1045_v23  ;;  %5685 = vmatprep.subr.mxu1 %v1072_v26  ;;  %v1035_v28 = vpop.xlane.xlu0 %1034 }
 0x63f   :  { %6264 = vpow2.f32 %v1043_v24  ;;  %v1041_v29 = vsub.f32 %v1024_v13, %v1035_v28  ;;  %5686 = vmatpush3.msra.mxu1 %v1072_v26 }
 0x641   :  { %v1047_v30 = vmul.f32 1.442695, %v1041_v29  ;;  %v1244_v48 = vpop.permute.xlu1 %1243 }
 0x642   :  { %v1038_v41 = vpop.xlane.xlu0 %1037 }
 0x643   :  { %6266 = vpow2.f32 %v1047_v30  ;;  %v1042_v42 = vsub.f32 %v1025_v15, %v1038_v41 }
 0x645   :  { %v1049_v43 = vmul.f32 1.442695, %v1042_v42 }
 0x647   :  { %6268 = vpow2.f32 %v1049_v43 }
 0x648   :  { %v6263_v32 = vpop.eup %6262 }
 0x649   :  { %v6265_v34 = vpop.eup %6264  ;;  %v1054_v35 = vsel %vm1026_vm8, %v6263_v32, 0.0 }
 0x64a   :  { %1055 = vadd.xlane.f32.xlu0 %v1054_v35  ;;  %v1051_v36 = vsel %vm1026_vm8, %v6265_v34, 0.0 }
 0x64b   :  { %1052 = vadd.xlane.f32.xlu1 %v1051_v36 }
 0x64d   :  { %v6267_v37 = vpop.eup %6266 }
 0x64e   :  { %v1057_v39 = vsel %vm1026_vm8, %v6267_v37, 0.0 }
 0x64f   :  { %1058 = vadd.xlane.f32.xlu1 %v1057_v39 }
 0x651   :  { %v6269_v44 = vpop.eup %6268 }
 0x652   :  { %v1060_v46 = vsel %vm1026_vm8, %v6269_v44, 0.0 }
 0x660   :  { %1155 = vrot.lane.b32.xlu0 %v7010_v61, %s6416_s27  ;;  %1239 = vrot.lane.b32.xlu1 %v7001_v54, %s6418_s21 }
 0x664   :  { %1330 = vrot.lane.b32.xlu1 %v7010_v61, %s6418_s21 }
 0x668   :  { %1328 = vrot.lane.b32.xlu1 %v7028_v2, %s6418_s21 }
 0x66c   :  { %1461 = vrot.lane.b32.xlu1 %v7008_v60, %s6419_s22 }
 0x67f   :  { %1061 = vadd.xlane.f32.xlu0 %v1060_v46 }
 0x695   :  { %1241 = vrot.lane.b32.xlu0 %v7016_v62, %s6418_s21 }
 0x699   :  { %1326 = vrot.lane.b32.xlu0 %v7020_v1, %s6418_s21 }
 0x6d7   :  { %v1056_v49 = vpop.xlane.xlu0 %1055 }
 0x6d8   :  { %6270 = vrcp.f32 %v1056_v49  ;;  %v1053_v50 = vpop.xlane.xlu1 %1052 }
 0x6d9   :  { %6272 = vrcp.f32 %v1053_v50 }
 0x6db   :  { %v1156_v51 = vpop.permute.xlu0 %1155 }
 0x6dc   :  { %v1059_v52 = vpop.xlane.xlu1 %1058  ;;  %5690 = vmatprep.subr.mxu1 %v1156_v51 }
 0x6dd   :  { %6274 = vrcp.f32 %v1059_v52 }
 0x6e0   :  { %v1240_v4 = vpop.permute.xlu1 %1239 }
 0x6e2   :  { %v6271_v53 = vpop.eup %6270 }
 0x6e3   :  { %v6273_v55 = vpop.eup %6272  ;;  %v1068_v57 = vmul.f32 %v6271_v53, %v6263_v32 }
 0x6e4   :  { %v1067_v56 = vmul.f32 %v6273_v55, %v6265_v34  ;;  %v1331_v5 = vpop.permute.xlu1 %1330 }
 0x6e6   :  { %5687 = vmatprep.mubr.msk.f32.mxu1 %vm1026_vm8, %v1067_v56 }
 0x6e7   :  { %v6275_v58 = vpop.eup %6274  ;;  %5688 = vmatmul.mubr.msk.f32.vlgmr.msra.gmra.mrb[18].mxu1 %vm1026_vm8, %v1068_v57 }
 0x6e8   :  { %5691 = vmatpush3.msra.mxu1 %v1156_v51  ;;  %v1069_v59 = vmul.f32 %v6275_v58, %v6267_v37  ;;  %v1329_v11 = vpop.permute.xlu1 %1328 }
 0x6e9   :  { %5695 = vmatprep.subr.msk.mxu1 %vm853_vm7, %v1244_v48 }
 0x6ea   :  { %5692 = vmatprep.mubr.msk.f32.mxu1 %vm1026_vm8, %v1069_v59 }
 0x6ec   :  { %v1462_v13 = vpop.permute.xlu1 %1461 }
 0x70c   :  { %v1062_v3 = vpop.xlane.xlu0 %1061 }
 0x70d   :  { %6276 = vrcp.f32 %v1062_v3 }
 0x710   :  { %v1242_v8 = vpop.permute.xlu0 %1241 }
 0x714   :  { %v1327_v12 = vpop.permute.xlu0 %1326 }
 0x717   :  { %v6277_v6 = vpop.eup %6276 }
 0x718   :  { %v1070_v9 = vmul.f32 %v6277_v6, %v6269_v44 }
 0x71a   :  { %5693 = vmatmul.mubr.msk.f32.vlgmr.msra.gmra.mrb[20].mxu1 %vm1026_vm8, %v1070_v9 }
 0x71b   :  { %5696 = vmatpush3.xpose.msk.msra.mxu1 %vm853_vm7, %v1244_v48  ;;  %5697 = vmatprep.mubr.msk.f32.mxu1 %vm853_vm7, %v1240_v4 }
 0x71c   :  { %5700 = vmatprep.subr.msk.mxu1 %vm853_vm7, %v1331_v5 }
 0x71e   :  { %5698 = vmatmul.mubr.msk.f32.vlgmr.msra.gmra.mrb[22].mxu1 %vm853_vm7, %v1242_v8 }
 0x71f   :  { %5701 = vmatpush3.xpose.msk.msra.mxu1 %vm853_vm7, %v1331_v5  ;;  %5702 = vmatprep.mubr.msk.f32.mxu1 %vm853_vm7, %v1327_v12 }
 0x720   :  { %5705 = vmatprep.subr.mxu1 %v1462_v13 }
 0x722   :  { %5703 = vmatmul.mubr.msk.f32.vlgmr.msra.gmra.mrb[24].mxu1 %vm853_vm7, %v1329_v11 }
 0x723   :  { %5706 = vmatpush3.msra.mxu1 %v1462_v13 }
 0x7ba   :  { %v7070_v15 = vpop.f32.mrb[18].mxu1 }
 0x7bb   :  { %v7072_v17 = vpop.f32.mrb[19].mxu1 }
 0x7ed   :  { %v7074_v18 = vpop.f32.mrb[20].mxu1 }
 0x7ee   :  { %v7076_v19 = vpop.f32.mrb[21].mxu1 }
 0x7f1   :  { %v5699_v20 = vpop.f32.mrb[22].mxu1 }
 0x7f2   :  { %v1414_v21 = vmul.f32 0.25, %v5699_v20  ;;  %v1317_v22 = vpop.f32.mrb[23].mxu1 }
 0x7f3   :  { %v1413_v23 = vmul.f32 0.25, %v1317_v22 }
 0x7f4   :  { %v1420_v24 = vsel %vm1026_vm8, %v1414_v21, -inf }
 0x7f5   :  { %1421 = vmax.xlane.f32.xlu1 %v1420_v24  ;;  %v5704_v26 = vpop.f32.mrb[24].mxu1  ;;  %v1417_v28 = vsel %vm1026_vm8, %v1413_v23, -inf }
 0x7f6   :  { %v1416_v29 = vmul.f32 0.25, %v5704_v26  ;;  %1418 = vmax.xlane.f32.xlu0 %v1417_v28  ;;  %v1404_v30 = vpop.f32.mrb[25].mxu1 }
 0x7f7   :  { %v1415_v34 = vmul.f32 0.25, %v1404_v30 }
 0x7f8   :  { %v1426_v32 = vsel %vm1026_vm8, %v1416_v29, -inf }
 0x7f9   :  { %v1423_v35 = vsel %vm1026_vm8, %v1415_v34, -inf }
 0x7fa   :  { %1427 = vmax.xlane.f32.xlu0 %v1426_v32 }
 0x7fe   :  { %1424 = vmax.xlane.f32.xlu0 %v1423_v35 }
 0x806   :  { %1629 = vrot.lane.b32.xlu1 %v7001_v54, %s6420_s23 }
 0x80a   :  { %1545 = vrot.lane.b32.xlu1 %v7010_v61, %s6419_s22 }
 0x814   :  { %1633 = vrot.lane.b32.xlu0 %v7008_v60, %s6420_s23 }
 0x882   :  { %v1422_v36 = vpop.xlane.xlu1 %1421 }
 0x883   :  { %v1430_v37 = vsub.f32 %v1414_v21, %v1422_v36  ;;  %v1419_v39 = vpop.xlane.xlu0 %1418 }
 0x884   :  { %v1429_v41 = vsub.f32 %v1413_v23, %v1419_v39 }
 0x885   :  { %v1435_v42 = vmul.f32 1.442695, %v1430_v37 }
 0x886   :  { %v1433_v43 = vmul.f32 1.442695, %v1429_v41  ;;  %v1630_v44 = vpop.permute.xlu1 %1629 }
 0x887   :  { %6278 = vpow2.f32 %v1435_v42  ;;  %v1428_v46 = vpop.xlane.xlu0 %1427 }
 0x888   :  { %6280 = vpow2.f32 %v1433_v43  ;;  %v1432_v56 = vsub.f32 %v1416_v29, %v1428_v46 }
 0x88a   :  { %v1546_v48 = vpop.permute.xlu1 %1545  ;;  %v1439_v58 = vmul.f32 1.442695, %v1432_v56 }
 0x88b   :  { %5710 = vmatprep.subr.mxu0 %v1546_v48  ;;  %v1425_v49 = vpop.xlane.xlu0 %1424 }
 0x88c   :  { %5711 = vmatpush3.msra.mxu0 %v1546_v48  ;;  %v1431_v57 = vsub.f32 %v1415_v34, %v1425_v49  ;;  %6282 = vpow2.f32 %v1439_v58 }
 0x88e   :  { %v1437_v59 = vmul.f32 1.442695, %v1431_v57 }
 0x88f   :  { %v1634_v50 = vpop.permute.xlu0 %1633 }
 0x890   :  { %5715 = vmatprep.subr.msk.mxu1 %vm853_vm7, %v1634_v50  ;;  %6284 = vpow2.f32 %v1437_v59 }
 0x891   :  { %v6279_v51 = vpop.eup %6278 }
 0x892   :  { %v6281_v52 = vpop.eup %6280  ;;  %v1444_v53 = vsel %vm1026_vm8, %v6279_v51, 0.0 }
 0x893   :  { %1445 = vadd.xlane.f32.xlu0 %v1444_v53  ;;  %v1441_v55 = vsel %vm1026_vm8, %v6281_v52, 0.0 }
 0x894   :  { %1442 = vadd.xlane.f32.xlu1 %v1441_v55 }
 0x896   :  { %v6283_v3 = vpop.eup %6282 }
 0x897   :  { %v1450_v5 = vsel %vm1026_vm8, %v6283_v3, 0.0 }
 0x89a   :  { %v6285_v4 = vpop.eup %6284 }
 0x89b   :  { %v1447_v6 = vsel %vm1026_vm8, %v6285_v4, 0.0 }
 0x8a5   :  { %1720 = vrot.lane.b32.xlu1 %v7010_v61, %s6420_s23 }
 0x8a9   :  { %1631 = vrot.lane.b32.xlu0 %v7016_v62, %s6420_s23 }
 0x8c8   :  { %1451 = vadd.xlane.f32.xlu0 %v1450_v5 }
 0x8c9   :  { %1448 = vadd.xlane.f32.xlu1 %v1447_v6 }
 0x8da   :  { %1718 = vrot.lane.b32.xlu1 %v7028_v2, %s6420_s23 }
 0x8de   :  { %1716 = vrot.lane.b32.xlu0 %v7020_v1, %s6420_s23  ;;  %1851 = vrot.lane.b32.xlu1 %v7008_v60, %s6421_s24 }
 0x920   :  { %v1446_v8 = vpop.xlane.xlu0 %1445 }
 0x921   :  { %6286 = vrcp.f32 %v1446_v8  ;;  %v1443_v9 = vpop.xlane.xlu1 %1442 }
 0x922   :  { %6288 = vrcp.f32 %v1443_v9 }
 0x924   :  { %v1632_v22 = vpop.permute.xlu0 %1631 }
 0x925   :  { %v1721_v11 = vpop.permute.xlu1 %1720 }
 0x926   :  { %5720 = vmatprep.subr.msk.mxu0 %vm853_vm7, %v1721_v11 }
 0x92b   :  { %v6287_v12 = vpop.eup %6286 }
 0x92c   :  { %v6289_v13 = vpop.eup %6288  ;;  %v1458_v21 = vmul.f32 %v6287_v12, %v6279_v51 }
 0x92d   :  { %v1457_v20 = vmul.f32 %v6289_v13, %v6281_v52 }
 0x92f   :  { %5707 = vmatprep.mubr.msk.f32.mxu1 %vm1026_vm8, %v1457_v20 }
 0x930   :  { %5708 = vmatmul.mubr.msk.f32.vlgmr.msra.gmra.mrb[26].mxu1 %vm1026_vm8, %v1458_v21 }
 0x931   :  { %5716 = vmatpush3.xpose.msk.msra.mxu1 %vm853_vm7, %v1634_v50  ;;  %5717 = vmatprep.mubr.msk.f32.mxu1 %vm853_vm7, %v1630_v44 }
 0x934   :  { %5718 = vmatmul.mubr.msk.f32.vlgmr.msra.gmra.mrb[28].mxu1 %vm853_vm7, %v1632_v22 }
 0x955   :  { %v1452_v23 = vpop.xlane.xlu0 %1451 }
 0x956   :  { %6290 = vrcp.f32 %v1452_v23  ;;  %v1449_v24 = vpop.xlane.xlu1 %1448 }
 0x957   :  { %6292 = vrcp.f32 %v1449_v24 }
 0x959   :  { %v1717_v35 = vpop.permute.xlu0 %1716 }
 0x95a   :  { %v1719_v26 = vpop.permute.xlu1 %1718 }
 0x95e   :  { %v1852_v28 = vpop.permute.xlu1 %1851 }
 0x95f   :  { %5725 = vmatprep.subr.mxu1 %v1852_v28 }
 0x960   :  { %v6291_v29 = vpop.eup %6290  ;;  %5726 = vmatpush3.msra.mxu1 %v1852_v28 }
 0x961   :  { %v6293_v30 = vpop.eup %6292  ;;  %v1460_v34 = vmul.f32 %v6291_v29, %v6283_v3 }
 0x962   :  { %v1459_v32 = vmul.f32 %v6293_v30, %v6285_v4 }
 0x964   :  { %5712 = vmatprep.mubr.msk.f32.mxu0 %vm1026_vm8, %v1459_v32 }
 0x965   :  { %5713 = vmatmul.mubr.msk.f32.vlgmr.msra.gmra.mrb[16].mxu0 %vm1026_vm8, %v1460_v34 }
 0x966   :  { %5721 = vmatpush3.xpose.msk.msra.mxu0 %vm853_vm7, %v1721_v11  ;;  %5722 = vmatprep.mubr.msk.f32.mxu0 %vm853_vm7, %v1717_v35 }
 0x969   :  { %5723 = vmatmul.mubr.msk.f32.vlgmr.msra.gmra.mrb[18].mxu0 %vm853_vm7, %v1719_v26 }
 0xa03   :  { %v7114_v36 = vpop.f32.mrb[26].mxu1 }
 0xa04   :  { %v7116_v37 = vpop.f32.mrb[27].mxu1 }
 0xa07   :  { %v5719_v39 = vpop.f32.mrb[28].mxu1 }
 0xa08   :  { %v1804_v41 = vmul.f32 0.25, %v5719_v39  ;;  %v1707_v42 = vpop.f32.mrb[29].mxu1 }
 0xa09   :  { %v1803_v43 = vmul.f32 0.25, %v1707_v42 }
 0xa0a   :  { %v1810_v44 = vsel %vm1026_vm8, %v1804_v41, -inf }
 0xa0b   :  { %1811 = vmax.xlane.f32.xlu1 %v1810_v44  ;;  %v1807_v46 = vsel %vm1026_vm8, %v1803_v43, -inf }
 0xa0c   :  { %1808 = vmax.xlane.f32.xlu0 %v1807_v46 }
 0xa1c   :  { %2019 = vrot.lane.b32.xlu1 %v7001_v54, %s6422_s25 }
 0xa20   :  { %1935 = vrot.lane.b32.xlu1 %v7010_v61, %s6421_s24 }
 0xa38   :  { %v7124_v48 = vpop.f32.mrb[16].mxu0 }
 0xa39   :  { %v7126_v49 = vpop.f32.mrb[17].mxu0 }
 0xa3c   :  { %v5724_v50 = vpop.f32.mrb[18].mxu0 }
 0xa3d   :  { %v1806_v51 = vmul.f32 0.25, %v5724_v50  ;;  %v1794_v52 = vpop.f32.mrb[19].mxu0 }
 0xa3e   :  { %v1805_v53 = vmul.f32 0.25, %v1794_v52 }
 0xa3f   :  { %v1816_v55 = vsel %vm1026_vm8, %v1806_v51, -inf }
 0xa40   :  { %1817 = vmax.xlane.f32.xlu0 %v1816_v55  ;;  %v1813_v56 = vsel %vm1026_vm8, %v1805_v53, -inf }
 0xa44   :  { %1814 = vmax.xlane.f32.xlu0 %v1813_v56 }
 0xa5a   :  { %2023 = vrot.lane.b32.xlu0 %v7008_v60, %s6422_s25 }
 0xa98   :  { %v1812_v54 = vpop.xlane.xlu1 %1811 }
 0xa99   :  { %v1820_v57 = vsub.f32 %v1804_v41, %v1812_v54  ;;  %v1809_v58 = vpop.xlane.xlu0 %1808 }
 0xa9a   :  { %v1819_v59 = vsub.f32 %v1803_v43, %v1809_v58 }
 0xa9b   :  { %v1825_v3 = vmul.f32 1.442695, %v1820_v57 }
 0xa9c   :  { %v1823_v4 = vmul.f32 1.442695, %v1819_v59  ;;  %v2020_v5 = vpop.permute.xlu1 %2019 }
 0xa9d   :  { %6294 = vpow2.f32 %v1825_v3 }
 0xa9e   :  { %6296 = vpow2.f32 %v1823_v4 }
 0xaa0   :  { %v1936_v6 = vpop.permute.xlu1 %1935 }
 0xaa1   :  { %5730 = vmatprep.subr.mxu0 %v1936_v6 }
 0xaa2   :  { %5731 = vmatpush3.msra.mxu0 %v1936_v6 }
 0xaa7   :  { %v6295_v8 = vpop.eup %6294 }
 0xaa8   :  { %v6297_v9 = vpop.eup %6296  ;;  %v1834_v11 = vsel %vm1026_vm8, %v6295_v8, 0.0 }
 0xaa9   :  { %1835 = vadd.xlane.f32.xlu0 %v1834_v11  ;;  %v1831_v12 = vsel %vm1026_vm8, %v6297_v9, 0.0 }
 0xaaa   :  { %1832 = vadd.xlane.f32.xlu1 %v1831_v12 }
 0xabb   :  { %2110 = vrot.lane.b32.xlu1 %v7010_v61, %s6422_s25 }
 0xabf   :  { %2021 = vrot.lane.b32.xlu0 %v7016_v62, %s6422_s25 }
 0xacd   :  { %v1818_v13 = vpop.xlane.xlu0 %1817 }
 0xace   :  { %v1822_v20 = vsub.f32 %v1806_v51, %v1818_v13 }
 0xad0   :  { %v1829_v21 = vmul.f32 1.442695, %v1822_v20 }
 0xad1   :  { %v1815_v22 = vpop.xlane.xlu0 %1814 }
 0xad2   :  { %6298 = vpow2.f32 %v1829_v21  ;;  %v1821_v23 = vsub.f32 %v1805_v53, %v1815_v22 }
 0xad4   :  { %v1827_v24 = vmul.f32 1.442695, %v1821_v23 }
 0xad5   :  { %v2024_v26 = vpop.permute.xlu0 %2023 }
 0xad6   :  { %6300 = vpow2.f32 %v1827_v24  ;;  %5735 = vmatprep.subr.msk.mxu1 %vm853_vm7, %v2024_v26 }
 0xadc   :  { %v6299_v28 = vpop.eup %6298 }
 0xadd   :  { %v1840_v29 = vsel %vm1026_vm8, %v6299_v28, 0.0 }
 0xade   :  { %1841 = vadd.xlane.f32.xlu0 %v1840_v29 }
 0xae0   :  { %v6301_v30 = vpop.eup %6300 }
 0xae1   :  { %v1837_v32 = vsel %vm1026_vm8, %v6301_v30, 0.0 }
 0xae2   :  { %1838 = vadd.xlane.f32.xlu1 %v1837_v32 }
 0xaf3   :  { %2108 = vrot.lane.b32.xlu1 %v7028_v2, %s6422_s25 }
 0xaf4   :  { %2106 = vrot.lane.b32.xlu0 %v7020_v1, %s6422_s25 }
 0xb36   :  { %v1836_v62 = vpop.xlane.xlu0 %1835 }
 0xb37   :  { %6302 = vrcp.f32 %v1836_v62  ;;  %v1833_v34 = vpop.xlane.xlu1 %1832 }
 0xb38   :  { %6304 = vrcp.f32 %v1833_v34 }
 0xb3a   :  { %v2022_v1 = vpop.permute.xlu0 %2021 }
 0xb3b   :  { %v2111_v35 = vpop.permute.xlu1 %2110 }
 0xb3c   :  { %5740 = vmatprep.subr.msk.mxu0 %vm853_vm7, %v2111_v35 }
 0xb41   :  { %v6303_v39 = vpop.eup %6302 }
 0xb42   :  { %v6305_v41 = vpop.eup %6304  ;;  %v1848_v43 = vmul.f32 %v6303_v39, %v6295_v8 }
 0xb43   :  { %v1847_v42 = vmul.f32 %v6305_v41, %v6297_v9 }
 0xb45   :  { %5727 = vmatprep.mubr.msk.f32.mxu1 %vm1026_vm8, %v1847_v42 }
 0xb46   :  { %5728 = vmatmul.mubr.msk.f32.vlgmr.msra.gmra.mrb[30].mxu1 %vm1026_vm8, %v1848_v43 }
 0xb47   :  { %5736 = vmatpush3.xpose.msk.msra.mxu1 %vm853_vm7, %v2024_v26  ;;  %5737 = vmatprep.mubr.msk.f32.mxu1 %vm853_vm7, %v2020_v5 }
 0xb4a   :  { %5738 = vmatmul.mubr.msk.f32.vlgmr.msra.gmra.mrb[32].mxu1 %vm853_vm7, %v2022_v1 }
 0xb6b   :  { %v1842_v2 = vpop.xlane.xlu0 %1841 }
 0xb6c   :  { %6306 = vrcp.f32 %v1842_v2 }
 0xb6f   :  { %v1839_v44 = vpop.xlane.xlu1 %1838  ;;  %v2107_v53 = vpop.permute.xlu0 %2106 }
 0xb70   :  { %6308 = vrcp.f32 %v1839_v44 }
 0xb73   :  { %v2109_v55 = vpop.permute.xlu1 %2108 }
 0xb76   :  { %v6307_v46 = vpop.eup %6306 }
 0xb77   :  { %v1850_v52 = vmul.f32 %v6307_v46, %v6299_v28 }
 0xb7a   :  { %v6309_v50 = vpop.eup %6308 }
 0xb7b   :  { %v1849_v51 = vmul.f32 %v6309_v50, %v6301_v30 }
 0xb7d   :  { %5732 = vmatprep.mubr.msk.f32.mxu0 %vm1026_vm8, %v1849_v51 }
 0xb7e   :  { %5733 = vmatmul.mubr.msk.f32.vlgmr.msra.gmra.mrb[20].mxu0 %vm1026_vm8, %v1850_v52 }
 0xb7f   :  { %5741 = vmatpush3.xpose.msk.msra.mxu0 %vm853_vm7, %v2111_v35  ;;  %5742 = vmatprep.mubr.msk.f32.mxu0 %vm853_vm7, %v2107_v53 }
 0xb82   :  { %5743 = vmatmul.mubr.msk.f32.vlgmr.msra.gmra.mrb[22].mxu0 %vm853_vm7, %v2109_v55 }
 0xc19   :  { %v5729_v56 = vpop.f32.mrb[30].mxu1 }
 0xc1a   :  { %v1926_v54 = vpop.f32.mrb[31].mxu1 }
 0xc1d   :  { %v5739_v57 = vpop.f32.mrb[32].mxu1 }
 0xc1e   :  { %v2194_v58 = vmul.f32 0.25, %v5739_v57  ;;  %v2097_v59 = vpop.f32.mrb[33].mxu1 }
 0xc1f   :  { %v2193_v3 = vmul.f32 0.25, %v2097_v59 }
 0xc20   :  { %v2200_v4 = vsel %vm1026_vm8, %v2194_v58, -inf }
 0xc21   :  { %2201 = vmax.xlane.f32.xlu1 %v2200_v4  ;;  %v2197_v5 = vsel %vm1026_vm8, %v2193_v3, -inf  ;;  %v2471_v4 = vld [vmem:[%s7980_s8] sm:$0xff] }
 0xc22   :  { %2198 = vmax.xlane.f32.xlu0 %v2197_v5  ;;  %v2472_v5 = vld [vmem:[%s7980_s8 + $0x8] sm:$0xff] }
 0xc51   :  { %v7158_v6 = vpop.f32.mrb[20].mxu0 }
 0xc52   :  { %v7160_v8 = vpop.f32.mrb[21].mxu0 }
 0xc55   :  { %v5744_v9 = vpop.f32.mrb[22].mxu0 }
 0xc56   :  { %v2184_v11 = vpop.f32.mrb[23].mxu0  ;;  %v2196_v13 = vmul.f32 0.25, %v5744_v9  ;;  %v2473_v9 = vld [vmem:[%s7980_s8 + $0x10] sm:$0xff] }
 0xc57   :  { %v2195_v12 = vmul.f32 0.25, %v2184_v11  ;;  %v6071_v11 = vpack.c.bf16 %v2472_v5, %v2471_v4  ;;  %v5297_v4 = vld [vmem:[%s7974_s2 + $0x278] sm:$0xff] }
 0xc58   :  { %v2206_v21 = vsel %vm1026_vm8, %v2196_v13, -inf }
 0xc59   :  { %v2203_v20 = vsel %vm1026_vm8, %v2195_v12, -inf }
 0xc5a   :  { %2204 = vmax.xlane.f32.xlu0 %v2203_v20  ;;  %v2475_v20 = vld [vmem:[%s7980_s8 + $0x20] sm:$0xff] }
 0xc5e   :  { %2207 = vmax.xlane.f32.xlu0 %v2206_v21  ;;  %v2476_v21 = vld [vmem:[%s7980_s8 + $0x28] sm:$0xff] }
 0xcae   :  { %v2202_v22 = vpop.xlane.xlu1 %2201 }
 0xcaf   :  { %v2210_v23 = vsub.f32 %v2194_v58, %v2202_v22  ;;  %v2199_v24 = vpop.xlane.xlu0 %2198  ;;  %v6079_v22 = vpack.c.bf16 %v2476_v21, %v2475_v20  ;;  %v5301_v20 = vld [vmem:[%s7974_s2 + $0x298] sm:$0xff] }
 0xcb0   :  { %v2209_v26 = vsub.f32 %v2193_v3, %v2199_v24  ;;  %v2478_v24 = vld [vmem:[%s7980_s8 + $0x38] sm:$0xff] }
 0xcb1   :  { %v2215_v28 = vmul.f32 1.442695, %v2210_v23  ;;  %v2477_v23 = vld [vmem:[%s7980_s8 + $0x30] sm:$0xff] }
 0xcb2   :  { %v2213_v29 = vmul.f32 1.442695, %v2209_v26  ;;  %v6083_v26 = vpack.c.bf16 %v2478_v24, %v2477_v23  ;;  %v5303_v23 = vld [vmem:[%s7974_s2 + $0x2a8] sm:$0xff] }
 0xcb3   :  { %6310 = vpow2.f32 %v2215_v28 }
 0xcb4   :  { %6312 = vpow2.f32 %v2213_v29 }
 0xcbd   :  { %v6311_v30 = vpop.eup %6310 }
 0xcbe   :  { %v6313_v32 = vpop.eup %6312  ;;  %v2224_v62 = vsel %vm1026_vm8, %v6311_v30, 0.0 }
 0xcbf   :  { %2225 = vadd.xlane.f32.xlu0 %v2224_v62  ;;  %v2221_v34 = vsel %vm1026_vm8, %v6313_v32, 0.0 }
 0xcc0   :  { %2222 = vadd.xlane.f32.xlu1 %v2221_v34 }
 0xce7   :  { %v2205_v35 = vpop.xlane.xlu0 %2204 }
 0xce8   :  { %v2211_v39 = vsub.f32 %v2195_v12, %v2205_v35  ;;  %v2474_v12 = vld [vmem:[%s7980_s8 + $0x18] sm:$0xff] }
 0xcea   :  { %v2217_v41 = vmul.f32 1.442695, %v2211_v39 }
 0xceb   :  { %v2208_v42 = vpop.xlane.xlu0 %2207 }
 0xcec   :  { %6314 = vpow2.f32 %v2217_v41  ;;  %v2212_v43 = vsub.f32 %v2196_v13, %v2208_v42  ;;  %v6075_v13 = vpack.c.bf16 %v2474_v12, %v2473_v9  ;;  %v5298_v9 = vld [vmem:[%s7974_s2 + $0x280] sm:$0xff] }
 0xcee   :  { %v2219_v1 = vmul.f32 1.442695, %v2212_v43 }
 0xcf0   :  { %6316 = vpow2.f32 %v2219_v1 }
 0xcf6   :  { %v6315_v2 = vpop.eup %6314 }
 0xcf7   :  { %v2227_v44 = vsel %vm1026_vm8, %v6315_v2, 0.0 }
 0xcf8   :  { %2228 = vadd.xlane.f32.xlu1 %v2227_v44 }
 0xcfa   :  { %v6317_v46 = vpop.eup %6316 }
 0xcfb   :  { %v2230_v50 = vsel %vm1026_vm8, %v6317_v46, 0.0 }
 0xcfc   :  { %2231 = vadd.xlane.f32.xlu0 %v2230_v50 }
 0xd09   :  { %2241 = vrot.lane.b32.xlu1 %v7008_v60, %s6423_s26 }
 0xd0d   :  { %2413 = vrot.lane.b32.xlu1 %v7116_v37, %s6423_s26 }
 0xd11   :  { %2415 = vrot.lane.b32.xlu1 %v7114_v36, %s6423_s26 }
 0xd12   :  { %2325 = vrot.lane.b32.xlu0 %v7010_v61, %s6423_s26 }
 0xd15   :  { %2431 = vrot.lane.b32.xlu1 %v5729_v56, %s6421_s24 }
 0xd16   :  { %2429 = vrot.lane.b32.xlu0 %v1926_v54, %s6421_s24 }
 0xd4c   :  { %v2226_v60 = vpop.xlane.xlu0 %2225 }
 0xd4d   :  { %v2223_v51 = vpop.xlane.xlu1 %2222 }
 0xd4e   :  { %6318 = vrcp.f32 %v2223_v51 }
 0xd4f   :  { %6320 = vrcp.f32 %v2226_v60 }
 0xd58   :  { %v6319_v52 = vpop.eup %6318 }
 0xd59   :  { %v2237_v53 = vmul.f32 %v6319_v52, %v6313_v32  ;;  %v6321_v37 = vpop.eup %6320 }
 0xd5a   :  { %v2238_v58 = vmul.f32 %v6321_v37, %v6311_v30 }
 0xd5b   :  { %5747 = vmatprep.mubr.msk.f32.mxu1 %vm1026_vm8, %v2237_v53 }
 0xd85   :  { %v2229_v55 = vpop.xlane.xlu1 %2228 }
 0xd86   :  { %6322 = vrcp.f32 %v2229_v55 }
 0xd89   :  { %v2242_v57 = vpop.permute.xlu1 %2241  ;;  %v2232_v36 = vpop.xlane.xlu0 %2231 }
 0xd8a   :  { %6324 = vrcp.f32 %v2232_v36  ;;  %5745 = vmatprep.subr.mxu1 %v2242_v57 }
 0xd8b   :  { %5746 = vmatpush3.msra.mxu1 %v2242_v57  ;;  %v5292_v57 = vld [vmem:[%s7974_s2 + $0x250] sm:$0xff] }
 0xd8c   :  { %5748 = vmatmul.mubr.msk.f32.vlgmr.msra.gmra.mrb[34].mxu1 %vm1026_vm8, %v2238_v58  ;;  %6072 = vmatprep.subr.bf16.mxu1 %v6071_v11  ;;  %v5293_v58 = vld [vmem:[%s7974_s2 + $0x258] sm:$0xff] }
 0xd8d   :  { %v2326_v61 = vpop.permute.xlu0 %2325  ;;  %6074 = vmatpush3.bf16.msra.mxu1 %v6071_v11  ;;  %v2414_v62 = vpop.permute.xlu1 %2413  ;;  %v5299_v11 = vld [vmem:[%s7974_s2 + $0x288] sm:$0xff] }
 0xd8e   :  { %5750 = vmatprep.subr.mxu0 %v2326_v61  ;;  %6076 = vmatprep.subr.bf16.mxu1 %v6075_v13  ;;  %v6100_v12 = vpack.c.bf16 %v5299_v11, %v5298_v9 }
 0xd8f   :  { %5751 = vmatpush3.msra.mxu0 %v2326_v61  ;;  %v6091_v61 = vpack.c.bf16 %v5293_v58, %v5292_v57 }
 0xd90   :  { %v6323_v56 = vpop.eup %6322  ;;  %6087 = vmatprep.subr.bf16.mxu0 %v6417_v10 }
 0xd91   :  { %v2239_v54 = vmul.f32 %v6323_v56, %v6315_v2  ;;  %6078 = vmatpush3.bf16.msra.mxu1 %v6075_v13  ;;  %v2416_v34 = vpop.permute.xlu1 %2415  ;;  %v2430_v39 = vpop.permute.xlu0 %2429  ;;  %v5294_v56 = vld [vmem:[%s7974_s2 + $0x260] sm:$0xff]  ;;  %v5300_v13 = vld [vmem:[%s7974_s2 + $0x290] sm:$0xff] }
 0xd92   :  { %6080 = vmatprep.subr.bf16.mxu1 %v6079_v22  ;;  %v6103_v21 = vpack.c.bf16 %v5301_v20, %v5300_v13 }
 0xd93   :  { %5752 = vmatprep.mubr.msk.f32.mxu0 %vm1026_vm8, %v2239_v54  ;;  %v5295_v54 = vld [vmem:[%s7974_s2 + $0x268] sm:$0xff] }
 0xd94   :  { %v6325_v59 = vpop.eup %6324 }
 0xd95   :  { %v2240_v3 = vmul.f32 %v6325_v59, %v6317_v46  ;;  %6082 = vmatpush3.bf16.msra.mxu1 %v6079_v22  ;;  %v2432_v35 = vpop.permute.xlu1 %2431  ;;  %v6094_v59 = vpack.c.bf16 %v5295_v54, %v5294_v56  ;;  %v5302_v22 = vld [vmem:[%s7974_s2 + $0x2a0] sm:$0xff] }
 0xd96   :  { %6084 = vmatprep.subr.bf16.mxu1 %v6083_v26  ;;  %v6106_v24 = vpack.c.bf16 %v5303_v23, %v5302_v22  ;;  %v5320_v23 = vld [vmem:[%s7974_s2 + $0x300] sm:$0xff] }
 0xd97   :  { %5753 = vmatmul.mubr.msk.f32.vlgmr.msra.gmra.mrb[24].mxu0 %vm1026_vm8, %v2240_v3  ;;  %v5296_v3 = vld [vmem:[%s7974_s2 + $0x270] sm:$0xff] }
 0xd98   :  { %v6097_v5 = vpack.c.bf16 %v5297_v4, %v5296_v3 }
 0xd99   :  { %6086 = vmatpush3.bf16.msra.mxu1 %v6083_v26  ;;  %v5304_v26 = vld [vmem:[%s7974_s2 + $0x2b0] sm:$0xff] }
 0xd9a   :  { %6123 = vmatprep.subr.bf16.mxu1 %v6417_v10 }
 0xe5f   :  { %v5749_v28 = vpop.f32.mrb[34].mxu1 }
 0xe60   :  { %2447 = vrot.lane.b32.xlu1 %v5749_v28, %s6419_s22  ;;  %v2316_v29 = vpop.f32.mrb[35].mxu1  ;;  %v5305_v28 = vld [vmem:[%s7974_s2 + $0x2b8] sm:$0xff] }
 0xe61   :  { %2445 = vrot.lane.b32.xlu0 %v2316_v29, %s6419_s22  ;;  %v6109_v29 = vpack.c.bf16 %v5305_v28, %v5304_v26  ;;  %v5322_v26 = vld [vmem:[%s7974_s2 + $0x310] sm:$0xff] }
 0xe64   :  { %2419 = vrot.lane.b32.xlu1 %v7124_v48, %s6423_s26  ;;  %v2457_v48 = vsel %vm853_vm7, %v7072_v17, %v2414_v62 }
 0xe65   :  { %2417 = vrot.lane.b32.xlu0 %v7126_v49, %s6423_s26 }
 0xe68   :  { %2435 = vrot.lane.b32.xlu1 %v7158_v6, %s6421_s24  ;;  %v2458_v6 = vsel %vm853_vm7, %v7070_v15, %v2416_v34  ;;  %v5308_v34 = vld [vmem:[%s7974_s2 + $0x2d0] sm:$0xff] }
 0xe69   :  { %2433 = vrot.lane.b32.xlu0 %v7160_v8, %s6421_s24  ;;  %v2462_v8 = vsel %vm2461_vm9, %v2457_v48, %v2430_v39  ;;  %v2463_v42 = vsel %vm2461_vm9, %v2458_v6, %v2432_v35  ;;  %v5309_v35 = vld [vmem:[%s7974_s2 + $0x2d8] sm:$0xff]  ;;  %v5310_v48 = vld [vmem:[%s7974_s2 + $0x2e0] sm:$0xff] }
 0xe6a   :  { %v5754_v30 = vpop.f32.mrb[24].mxu0  ;;  %v6115_v39 = vpack.c.bf16 %v5309_v35, %v5308_v34  ;;  %v5326_v35 = vld [vmem:[%s7974_s2 + $0x330] sm:$0xff] }
 0xe6b   :  { %v2400_v32 = vpop.f32.mrb[25].mxu0 }
 0xe6c   :  { %2451 = vrot.lane.b32.xlu1 %v5754_v30, %s6419_s22  ;;  %v5306_v30 = vld [vmem:[%s7974_s2 + $0x2c0] sm:$0xff] }
 0xe6d   :  { %2449 = vrot.lane.b32.xlu0 %v2400_v32, %s6419_s22  ;;  %v5307_v32 = vld [vmem:[%s7974_s2 + $0x2c8] sm:$0xff] }
 0xe6e   :  { %v6112_v62 = vpack.c.bf16 %v5307_v32, %v5306_v30  ;;  %v5324_v32 = vld [vmem:[%s7974_s2 + $0x320] sm:$0xff] }
 0xed2   :  { %v2448_v49 = vpop.permute.xlu1 %2447 }
 0xed3   :  { %v2446_v41 = vpop.permute.xlu0 %2445  ;;  %v2468_v1 = vsel %vm2466_vm10, %v2463_v42, %v2448_v49  ;;  %v5311_v49 = vld [vmem:[%s7974_s2 + $0x2e8] sm:$0xff] }
 0xed4   :  { %v2467_v43 = vsel %vm2466_vm10, %v2462_v8, %v2446_v41  ;;  %v6118_v6 = vpack.c.bf16 %v5311_v49, %v5310_v48  ;;  %v5312_v8 = vld [vmem:[%s7974_s2 + $0x2f0] sm:$0xff]  ;;  %v5313_v41 = vld [vmem:[%s7974_s2 + $0x2f8] sm:$0xff]  ;;  %v5328_v49 = vld [vmem:[%s7974_s2 + $0x340] sm:$0xff] }
 0xed5   :  { %5771 = vmatprep.mubr.msk.f32.mxu1 %vm152_vm0, %v2467_v43  ;;  %v6121_v42 = vpack.c.bf16 %v5313_v41, %v5312_v8  ;;  %v5330_v41 = vld [vmem:[%s7974_s2 + $0x350] sm:$0xff] }
 0xed6   :  { %v2420_v2 = vpop.permute.xlu1 %2419  ;;  %5772 = vmatmul.mubr.msk.f32.vlgmr.msra.gmra.mrb[36].mxu1 %vm152_vm0, %v2468_v1  ;;  %v5289_v1 = vld [vmem:[%s7981_s9] ss:$0 sm:$0xff] }
 0xed7   :  { %v2418_v44 = vpop.permute.xlu0 %2417  ;;  %v2460_v51 = vsel %vm853_vm7, %v7074_v18, %v2420_v2  ;;  %v5291_v18 = vld [vmem:[%s7974_s2 + $0x248] sm:$0xff] }
 0xed8   :  { %v2459_v15 = vsel %vm853_vm7, %v7076_v19, %v2418_v44  ;;  %v5290_v19 = vld [vmem:[%s7974_s2 + $0x240] sm:$0xff] }
 0xed9   :  { %v6088_v36 = vpack.c.bf16 %v5291_v18, %v5290_v19 }
 0xeda   :  { %v2436_v17 = vpop.permute.xlu1 %2435 }
 0xedb   :  { %v2434_v46 = vpop.permute.xlu0 %2433  ;;  %v2465_v60 = vsel %vm2461_vm9, %v2460_v51, %v2436_v17  ;;  %6089 = vmatpush1.bf16.msra.mxu0 %v6088_v36 }
 0xedc   :  { %v2464_v52 = vsel %vm2461_vm9, %v2459_v15, %v2434_v46  ;;  %6090 = vmatprep.subr.bf16.mxu0 %v6417_v10 }
 0xede   :  { %v2452_v50 = vpop.permute.xlu1 %2451 }
 0xedf   :  { %v2450_v53 = vpop.permute.xlu0 %2449  ;;  %v2470_v37 = vsel %vm2466_vm10, %v2465_v60, %v2452_v50  ;;  %6092 = vmatpush1.bf16.msra.mxu0 %v6091_v61 }
 0xee0   :  { %v2469_v55 = vsel %vm2466_vm10, %v2464_v52, %v2450_v53  ;;  %6093 = vmatprep.subr.bf16.mxu0 %v6417_v10 }
 0xee1   :  { %5774 = vmatprep.mubr.msk.f32.mxu1 %vm152_vm0, %v2469_v55 }
 0xee2   :  { %5775 = vmatmul.mubr.msk.f32.gmra.mrb[38].mxu1 %vm152_vm0, %v2470_v37 }
 0xee3   :  { %6095 = vmatpush1.bf16.msra.mxu0 %v6094_v59 }
 0xee4   :  { %6096 = vmatprep.subr.bf16.mxu0 %v6417_v10 }
 0xee7   :  { %6098 = vmatpush1.bf16.msra.mxu0 %v6097_v5 }
 0xee8   :  { %6099 = vmatprep.subr.bf16.mxu0 %v6417_v10 }
 0xeeb   :  { %6101 = vmatpush1.bf16.msra.mxu0 %v6100_v12 }
 0xeec   :  { %6102 = vmatprep.subr.bf16.mxu0 %v6417_v10 }
 0xeef   :  { %6104 = vmatpush1.bf16.msra.mxu0 %v6103_v21 }
 0xef0   :  { %6105 = vmatprep.subr.bf16.mxu0 %v6417_v10 }
 0xef3   :  { %6107 = vmatpush1.bf16.msra.mxu0 %v6106_v24  ;;  %v5321_v24 = vld [vmem:[%s7974_s2 + $0x308] sm:$0xff] }
 0xef4   :  { %6108 = vmatprep.subr.bf16.mxu0 %v6417_v10  ;;  %v6124_v28 = vpack.c.bf16 %v5321_v24, %v5320_v23 }
 0xef6   :  { %6125 = vmatpush1.bf16.msra.mxu1 %v6124_v28 }
 0xef7   :  { %6110 = vmatpush1.bf16.msra.mxu0 %v6109_v29  ;;  %v5323_v29 = vld [vmem:[%s7974_s2 + $0x318] sm:$0xff]  ;;  %6126 = vmatprep.subr.bf16.mxu1 %v6417_v10 }
 0xef8   :  { %6111 = vmatprep.subr.bf16.mxu0 %v6417_v10  ;;  %v6127_v30 = vpack.c.bf16 %v5323_v29, %v5322_v26 }
 0xefa   :  { %6128 = vmatpush1.bf16.msra.mxu1 %v6127_v30 }
 0xefb   :  { %6113 = vmatpush1.bf16.msra.mxu0 %v6112_v62  ;;  %v5325_v62 = vld [vmem:[%s7974_s2 + $0x328] sm:$0xff]  ;;  %6129 = vmatprep.subr.bf16.mxu1 %v6417_v10 }
 0xefc   :  { %6114 = vmatprep.subr.bf16.mxu0 %v6417_v10  ;;  %v6130_v34 = vpack.c.bf16 %v5325_v62, %v5324_v32 }
 0xefe   :  { %6131 = vmatpush1.bf16.msra.mxu1 %v6130_v34 }
 0xeff   :  { %6116 = vmatpush1.bf16.msra.mxu0 %v6115_v39  ;;  %v5327_v39 = vld [vmem:[%s7974_s2 + $0x338] sm:$0xff]  ;;  %6132 = vmatprep.subr.bf16.mxu1 %v6417_v10 }
 0xf00   :  { %6117 = vmatprep.subr.bf16.mxu0 %v6417_v10  ;;  %v6133_v48 = vpack.c.bf16 %v5327_v39, %v5326_v35 }
 0xf02   :  { %6134 = vmatpush1.bf16.msra.mxu1 %v6133_v48 }
 0xf03   :  { %6119 = vmatpush1.bf16.msra.mxu0 %v6118_v6  ;;  %v5329_v6 = vld [vmem:[%s7974_s2 + $0x348] sm:$0xff]  ;;  %6135 = vmatprep.subr.bf16.mxu1 %v6417_v10 }
 0xf04   :  { %6120 = vmatprep.subr.bf16.mxu0 %v6417_v10  ;;  %v6136_v8 = vpack.c.bf16 %v5329_v6, %v5328_v49 }
 0xf06   :  { %6137 = vmatpush1.bf16.msra.mxu1 %v6136_v8 }
 0xf07   :  { %6122 = vmatpush1.bf16.msra.mxu0 %v6121_v42  ;;  %v5331_v42 = vld [vmem:[%s7974_s2 + $0x358] sm:$0xff]  ;;  %6138 = vmatprep.subr.bf16.mxu1 %v6417_v10 }
 0xf08   :  { %6159 = vmatprep.subr.bf16.mxu0 %v6417_v10 }
 0xfa9   :  { %v5773_v43 = vpop.f32.mrb[36].mxu1 }
 0xfaa   :  { %v2577_v2 = vadd.f32 %v5773_v43, %v642_v33  ;;  %v2557_v44 = vpop.f32.mrb[37].mxu1  ;;  %v6139_v43 = vpack.c.bf16 %v5331_v42, %v5330_v41 }
 0xfab   :  { %v2576_v17 = vadd.f32 %v2557_v44, %v641_v27 }
 0xfac   :  { %v2588_v46 = vadd.f32 %v5289_v1, %v2577_v2  ;;  %v5333_v2 = vld [vmem:[%s7974_s2 + $0x368] sm:$0xff]  ;;  %6140 = vmatpush1.bf16.msra.mxu1 %v6139_v43 }
 0xfad   :  { %v2587_v15 = vadd.f32 %v5289_v1, %v2576_v17  ;;  %6141 = vmatprep.subr.bf16.mxu1 %v6417_v10  ;;  %v5334_v17 = vld [vmem:[%s7974_s2 + $0x370] sm:$0xff] }
 0xfae   :  { %v2592_v50 = vrot.slane %v2588_v46, 7  ;;  %v2604_v51 = vrot.slane %v2588_v46, 1  ;;  %2621 = vrot.lane.b32.xlu1 %v2588_v46, %s6416_s27  ;;  %v5335_v46 = vld [vmem:[%s7974_s2 + $0x378] sm:$0xff] }
 0xfaf   :  { %v2591_v52 = vrot.slane %v2587_v15, 7  ;;  %v2603_v53 = vrot.slane %v2587_v15, 1  ;;  %2619 = vrot.lane.b32.xlu0 %v2587_v15, %s6416_s27  ;;  %v6145_v15 = vpack.c.bf16 %v5335_v46, %v5334_v17 }
 0xfb1   :  { %v2609_v60 = vsel %vm127_vm1, %v2603_v53, %v2604_v51  ;;  %v2597_v31 = vsel %vm114_vm2, %v2591_v52, %v2592_v50 }
 0xfb2   :  { %5316 = vmatprep.mubr.msk.f32.mxu0 %vm152_vm0, %v2609_v60  ;;  %v5339_v60 = vld [vmem:[%s7974_s2 + $0x398] sm:$0xff] }
 0xfb5   :  { %v5776_v25 = vpop.f32.mrb[38].mxu1 }
 0xfb6   :  { %v2579_v27 = vadd.f32 %v5776_v25, %v644_v47  ;;  %v2567_v33 = vpop.f32.mrb[39].mxu1  ;;  %v5340_v25 = vld [vmem:[%s7974_s2 + $0x3a0] sm:$0xff] }
 0xfb7   :  { %v2578_v55 = vadd.f32 %v2567_v33, %v643_v40 }
 0xfb8   :  { %v2590_v37 = vadd.f32 %v5289_v1, %v2579_v27  ;;  %v5341_v27 = vld [vmem:[%s7974_s2 + $0x3a8] sm:$0xff] }
 0xfb9   :  { %v2589_v19 = vadd.f32 %v5289_v1, %v2578_v55  ;;  %v5332_v1 = vld [vmem:[%s7974_s2 + $0x360] sm:$0xff]  ;;  %v6154_v33 = vpack.c.bf16 %v5341_v27, %v5340_v25  ;;  %v5342_v55 = vld [vmem:[%s7974_s2 + $0x3b0] sm:$0xff]  ;;  %v5355_v25 = vld [vmem:[%s7974_s2 + $0x3e8] sm:$0xff] }
 0xfba   :  { %v2594_v18 = vrot.slane %v2590_v37, 7  ;;  %v2606_v57 = vrot.slane %v2590_v37, 1  ;;  %2625 = vrot.lane.b32.xlu1 %v2590_v37, %s6416_s27  ;;  %v6142_v44 = vpack.c.bf16 %v5333_v2, %v5332_v1  ;;  %v5343_v37 = vld [vmem:[%s7974_s2 + $0x3b8] sm:$0xff] }
 0xfbb   :  { %v2593_v36 = vrot.slane %v2589_v19, 7  ;;  %v2605_v58 = vrot.slane %v2589_v19, 1  ;;  %2623 = vrot.lane.b32.xlu0 %v2589_v19, %s6416_s27  ;;  %v6157_v19 = vpack.c.bf16 %v5343_v37, %v5342_v55  ;;  %v5357_v55 = vld [vmem:[%s7974_s2 + $0x3f8] sm:$0xff] }
 0xfbc   :  { %v2598_v61 = vsel %vm114_vm2, %v2594_v18, %v2591_v52  ;;  %v2610_v45 = vsel %vm127_vm1, %v2606_v57, %v2603_v53  ;;  %6143 = vmatpush1.bf16.msra.mxu1 %v6142_v44  ;;  %v5338_v53 = vld [vmem:[%s7974_s2 + $0x390] sm:$0xff] }
 0xfbd   :  { %v2608_v38 = vsel %vm127_vm1, %v2604_v51, %v2605_v58  ;;  %v2607_v40 = vsel %vm127_vm1, %v2605_v58, %v2606_v57  ;;  %v2596_v47 = vsel %vm114_vm2, %v2592_v50, %v2593_v36  ;;  %v2595_v56 = vsel %vm114_vm2, %v2593_v36, %v2594_v18  ;;  %6144 = vmatprep.subr.bf16.mxu1 %v6417_v10  ;;  %v5336_v50 = vld [vmem:[%s7974_s2 + $0x380] sm:$0xff]  ;;  %v5337_v51 = vld [vmem:[%s7974_s2 + $0x388] sm:$0xff] }
 0xfbe   :  { %v2599_v54 = vsel %vm6632_vm3, 0.0, %v2598_v61  ;;  %v2612_v5 = vsel %vm6636_vm4, 0.0, %v2608_v38  ;;  %v2601_v12 = vsel %vm6648_vm5, 0.0, %v2596_v47  ;;  %v2614_v21 = vsel %vm6658_vm6, 0.0, %v2610_v45  ;;  %v5315_v18 = vld [vmem:[%s7975_s3 + $0x3] ss:$0 sm:$0xff] }
 0xfbf   :  { %v6148_v52 = vpack.c.bf16 %v5337_v51, %v5336_v50  ;;  %v5351_v50 = vld [vmem:[%s7974_s2 + $0x3c8] sm:$0xff]  ;;  %v5352_v51 = vld [vmem:[%s7974_s2 + $0x3d0] sm:$0xff] }
 0xfc0   :  { %6146 = vmatpush1.bf16.msra.mxu1 %v6145_v15  ;;  %v5350_v15 = vld [vmem:[%s7974_s2 + $0x3c0] sm:$0xff] }
 0xfc1   :  { %6147 = vmatprep.subr.bf16.mxu1 %v6417_v10 }
 0xfc4   :  { %6149 = vmatpush1.bf16.msra.mxu1 %v6148_v52  ;;  %v6160_v52 = vpack.c.bf16 %v5351_v50, %v5350_v15 }
 0xfc5   :  { %6150 = vmatprep.subr.bf16.mxu1 %v6417_v10 }
0x1020   :  { %v2622_v4 = vpop.permute.xlu1 %2621 }
0x1021   :  { %v2620_v59 = vpop.permute.xlu0 %2619  ;;  %v2632_v9 = vsel %vm152_vm0, %v2597_v31, %v2622_v4  ;;  %v6151_v31 = vpack.c.bf16 %v5339_v60, %v5338_v53  ;;  %v5353_v53 = vld [vmem:[%s7974_s2 + $0x3d8] sm:$0xff] }
0x1022   :  { %v2631_v3 = vsel %vm152_vm0, %v2599_v54, %v2620_v59  ;;  %v6163_v60 = vpack.c.bf16 %v5353_v53, %v5352_v51 }
0x1023   :  { %2745 = vmatmul.mubr.f32.vlgmr.msra.gmra.mrb[26].mxu0 %v2631_v3  ;;  %6152 = vmatpush1.bf16.msra.mxu1 %v6151_v31  ;;  %v5354_v31 = vld [vmem:[%s7974_s2 + $0x3e0] sm:$0xff] }
0x1024   :  { %5317 = vmatprep.mubr.msk.f32.mxu0 %vm152_vm0, %v2612_v5  ;;  %6153 = vmatprep.subr.bf16.mxu1 %v6417_v10  ;;  %v6166_v27 = vpack.c.bf16 %v5355_v25, %v5354_v31 }
0x1025   :  { %6161 = vmatpush1.bf16.msra.mxu0 %v6160_v52 }
0x1026   :  { %6162 = vmatprep.subr.bf16.mxu0 %v6417_v10 }
0x1027   :  { %2750 = vmatmul.mubr.f32.gmra.mrb[28].mxu0 %v2632_v9  ;;  %6155 = vmatpush1.bf16.msra.mxu1 %v6154_v33  ;;  %v5356_v33 = vld [vmem:[%s7974_s2 + $0x3f0] sm:$0xff] }
0x1028   :  { %5318 = vmatprep.mubr.msk.f32.mxu0 %vm152_vm0, %v2607_v40  ;;  %6156 = vmatprep.subr.bf16.mxu1 %v6417_v10  ;;  %v6169_v37 = vpack.c.bf16 %v5357_v55, %v5356_v33 }
0x1029   :  { %6164 = vmatpush1.bf16.msra.mxu0 %v6163_v60 }
0x102a   :  { %6165 = vmatprep.subr.bf16.mxu0 %v6417_v10 }
0x102b   :  { %6158 = vmatpush1.bf16.msra.mxu1 %v6157_v19  ;;  %v5358_v19 = vld [vmem:[%s7974_s2 + $0x400] sm:$0xff] }
0x102c   :  { %v2626_v20 = vpop.permute.xlu1 %2625 }
0x102d   :  { %v2624_v11 = vpop.permute.xlu0 %2623  ;;  %v2634_v22 = vsel %vm152_vm0, %v2595_v56, %v2626_v20  ;;  %6167 = vmatpush1.bf16.msra.mxu0 %v6166_v27 }
0x102e   :  { %v2633_v13 = vsel %vm152_vm0, %v2601_v12, %v2624_v11  ;;  %6168 = vmatprep.subr.bf16.mxu0 %v6417_v10 }
0x102f   :  { %2755 = vmatmul.mubr.f32.gmra.mrb[30].mxu0 %v2633_v13 }
0x1030   :  { %5319 = vmatprep.mubr.msk.f32.mxu0 %vm152_vm0, %v2614_v21 }
0x1031   :  { %6170 = vmatpush1.bf16.msra.mxu0 %v6169_v37 }
0x1032   :  { %6171 = vmatprep.subr.bf16.mxu0 %v6417_v10 }
0x1033   :  { %2760 = vmatmul.mubr.f32.gmra.mrb[32].mxu0 %v2634_v22 }
0x10f6   :  { %v2746_v57 = vpop.f32.mrb[26].mxu0 }
0x10f7   :  { %v2747_v36 = vadd.f32 %v5315_v18, %v2746_v57  ;;  %v2748_v58 = vpop.f32.mrb[27].mxu0 }
0x10f8   :  { %v5361_v58 = vld [vmem:[%s7974_s2 + $0x418] sm:$0xff] }
0x10f9   :  { %v2765_v61 = vmax.f32 %v2747_v36, 0.0  ;;  %v5360_v36 = vld [vmem:[%s7974_s2 + $0x410] sm:$0xff] }
0x10fa   :  { %v2751_v45 = vpop.f32.mrb[28].mxu0 }
0x10fb   :  { %v2752_v38 = vadd.f32 %v5315_v18, %v2751_v45  ;;  %v2753_v40 = vpop.f32.mrb[29].mxu0  ;;  %2797 = vrot.lane.b32.xlu0 %v2765_v61, %s6416_s27  ;;  %v2769_v56 = vrot.slane %v2765_v61, 7  ;;  %v2781_v54 = vrot.slane %v2765_v61, 1  ;;  %v6175_v61 = vpack.c.bf16 %v5361_v58, %v5360_v36  ;;  %v5362_v45 = vld [vmem:[%s7974_s2 + $0x420] sm:$0xff] }
0x10fd   :  { %v2766_v47 = vmax.f32 %v2752_v38, 0.0  ;;  %v5363_v38 = vld [vmem:[%s7974_s2 + $0x428] sm:$0xff] }
0x10fe   :  { %v6178_v40 = vpack.c.bf16 %v5363_v38, %v5362_v45 }
0x10ff   :  { %v2770_v59 = vrot.slane %v2766_v47, 7  ;;  %v2782_v3 = vrot.slane %v2766_v47, 1  ;;  %2799 = vrot.lane.b32.xlu1 %v2766_v47, %s6416_s27  ;;  %v5364_v47 = vld [vmem:[%s7974_s2 + $0x430] sm:$0xff] }
0x1101   :  { %v2787_v4 = vsel %vm127_vm1, %v2781_v54, %v2782_v3  ;;  %v2775_v5 = vsel %vm114_vm2, %v2769_v56, %v2770_v59 }
0x1102   :  { %v2756_v9 = vpop.f32.mrb[30].mxu0  ;;  %5346 = vmatprep.mubr.msk.f32.mxu1 %vm152_vm0, %v2787_v4 }
0x1103   :  { %v2757_v11 = vadd.f32 %v5315_v18, %v2756_v9  ;;  %v2758_v12 = vpop.f32.mrb[31].mxu0  ;;  %v5369_v9 = vld [vmem:[%s7974_s2 + $0x458] sm:$0xff] }
0x1104   :  { %v5370_v12 = vld [vmem:[%s7974_s2 + $0x460] sm:$0xff] }
0x1105   :  { %v2767_v13 = vmax.f32 %v2757_v11, 0.0 }
0x1106   :  { %v2761_v20 = vpop.f32.mrb[32].mxu0 }
0x1107   :  { %v2771_v21 = vrot.slane %v2767_v13, 7  ;;  %v2783_v22 = vrot.slane %v2767_v13, 1  ;;  %v2762_v23 = vadd.f32 %v5315_v18, %v2761_v20  ;;  %v2763_v24 = vpop.f32.mrb[33].mxu0  ;;  %2801 = vrot.lane.b32.xlu0 %v2767_v13, %s6416_s27  ;;  %v5359_v18 = vld [vmem:[%s7974_s2 + $0x408] sm:$0xff] }
0x1108   :  { %v6172_v57 = vpack.c.bf16 %v5359_v18, %v5358_v19  ;;  %v5371_v13 = vld [vmem:[%s7974_s2 + $0x468] sm:$0xff]  ;;  %v5345_v24 = vld [vmem:[%s7975_s3 + $0x4] ss:$0 sm:$0xff] }
0x1109   :  { %v2768_v26 = vmax.f32 %v2762_v23, 0.0  ;;  %v2786_v28 = vsel %vm127_vm1, %v2782_v3, %v2783_v22  ;;  %v2774_v29 = vsel %vm114_vm2, %v2770_v59, %v2771_v21  ;;  %v5366_v59 = vld [vmem:[%s7974_s2 + $0x440] sm:$0xff]  ;;  %v5367_v3 = vld [vmem:[%s7974_s2 + $0x448] sm:$0xff]  ;;  %v6190_v20 = vpack.c.bf16 %v5371_v13, %v5370_v12 }
0x110a   :  { %v2790_v8 = vsel %vm6636_vm4, 0.0, %v2786_v28  ;;  %v2779_v1 = vsel %vm6648_vm5, 0.0, %v2774_v29  ;;  %6173 = vmatpush1.bf16.msra.mxu0 %v6172_v57  ;;  %v6184_v4 = vpack.c.bf16 %v5367_v3, %v5366_v59  ;;  %v5394_v12 = vld [vmem:[%s7978_s6 + $0x40] sm:$0xff]  ;;  %v5395_v13 = vld [vmem:[%s7978_s6 + $0x48] sm:$0xff] }
0x110b   :  { %v2772_v30 = vrot.slane %v2768_v26, 7  ;;  %v2784_v32 = vrot.slane %v2768_v26, 1  ;;  %2803 = vrot.lane.b32.xlu1 %v2768_v26, %s6416_s27  ;;  %6174 = vmatprep.subr.bf16.mxu0 %v6417_v10 }
0x110d   :  { %v2776_v62 = vsel %vm114_vm2, %v2772_v30, %v2769_v56  ;;  %v2785_v34 = vsel %vm127_vm1, %v2783_v22, %v2784_v32  ;;  %v2788_v35 = vsel %vm127_vm1, %v2784_v32, %v2781_v54  ;;  %v2773_v39 = vsel %vm114_vm2, %v2771_v21, %v2772_v30  ;;  %v5365_v56 = vld [vmem:[%s7974_s2 + $0x438] sm:$0xff]  ;;  %v5372_v21 = vld [vmem:[%s7974_s2 + $0x470] sm:$0xff] }
0x110e   :  { %v2777_v48 = vsel %vm6632_vm3, 0.0, %v2776_v62  ;;  %v2792_v44 = vsel %vm6658_vm6, 0.0, %v2788_v35  ;;  %6176 = vmatpush1.bf16.msra.mxu0 %v6175_v61  ;;  %v6181_v54 = vpack.c.bf16 %v5365_v56, %v5364_v47  ;;  %v5373_v22 = vld [vmem:[%s7974_s2 + $0x478] sm:$0xff] }
0x110f   :  { %6177 = vmatprep.subr.bf16.mxu0 %v6417_v10  ;;  %v6193_v23 = vpack.c.bf16 %v5373_v22, %v5372_v21  ;;  %v5375_v21 = vld [vmem:[%s7975_s3 + $0x5] ss:$0 sm:$0xff] }
0x1112   :  { %6179 = vmatpush1.bf16.msra.mxu0 %v6178_v40 }
0x1113   :  { %6180 = vmatprep.subr.bf16.mxu0 %v6417_v10 }
0x1116   :  { %6182 = vmatpush1.bf16.msra.mxu0 %v6181_v54 }
0x1117   :  { %6183 = vmatprep.subr.bf16.mxu0 %v6417_v10 }
0x111a   :  { %6185 = vmatpush1.bf16.msra.mxu0 %v6184_v4  ;;  %v5384_v4 = vld [vmem:[%s7976_s4 + $0x60] sm:$0xff] }
0x111b   :  { %6186 = vmatprep.subr.bf16.mxu0 %v6417_v10 }
0x116d   :  { %v2798_v49 = vpop.permute.xlu0 %2797 }
0x116e   :  { %v2809_v6 = vsel %vm152_vm0, %v2777_v48, %v2798_v49 }
0x116f   :  { %2923 = vmatmul.mubr.f32.vlgmr.msra.gmra.mrb[40].mxu1 %v2809_v6 }
0x1170   :  { %5347 = vmatprep.mubr.msk.f32.mxu1 %vm152_vm0, %v2790_v8  ;;  %v5380_v8 = vld [vmem:[%s7976_s4 + $0x40] sm:$0xff] }
0x1171   :  { %v2800_v41 = vpop.permute.xlu1 %2799 }
0x1172   :  { %v2810_v42 = vsel %vm152_vm0, %v2775_v5, %v2800_v41  ;;  %v5368_v5 = vld [vmem:[%s7974_s2 + $0x450] sm:$0xff]  ;;  %v5381_v41 = vld [vmem:[%s7976_s4 + $0x48] sm:$0xff] }
0x1173   :  { %2928 = vmatmul.mubr.f32.gmra.mrb[42].mxu1 %v2810_v42  ;;  %v6187_v11 = vpack.c.bf16 %v5369_v9, %v5368_v5  ;;  %v5382_v42 = vld [vmem:[%s7976_s4 + $0x50] sm:$0xff]  ;;  %v6203_v5 = vpack.c.bf16 %v5385_v7, %v5384_v4  ;;  %v5387_v9 = vld [vmem:[%s7976_s4 + $0x78] sm:$0xff] }
0x1174   :  { %5348 = vmatprep.mubr.msk.f32.mxu1 %vm152_vm0, %v2785_v34 }
0x1175   :  { %6188 = vmatpush1.bf16.msra.mxu0 %v6187_v11  ;;  %v6207_v11 = vpack.c.bf16 %v5387_v9, %v5386_v14 }
0x1176   :  { %6189 = vmatprep.subr.bf16.mxu0 %v6417_v10 }
0x1179   :  { %v2802_v43 = vpop.permute.xlu0 %2801  ;;  %6191 = vmatpush1.bf16.msra.mxu0 %v6190_v20  ;;  %v6211_v20 = vpack.c.bf16 %v5395_v13, %v5394_v12 }
0x117a   :  { %v2811_v2 = vsel %vm152_vm0, %v2779_v1, %v2802_v43  ;;  %6192 = vmatprep.subr.bf16.mxu0 %v6417_v10  ;;  %v6195_v43 = vpack.c.bf16 %v5381_v41, %v5380_v8  ;;  %v5383_v1 = vld [vmem:[%s7976_s4 + $0x58] sm:$0xff]  ;;  %v5400_v8 = vld [vmem:[%s7978_s6 + $0x70] sm:$0xff]  ;;  %s6392_s4 = scalar_lea.vmem %s5165_s15, 16 }
0x117b   :  { %2933 = vmatmul.mubr.f32.gmra.mrb[44].mxu1 %v2811_v2  ;;  %v5401_v41 = vld [vmem:[%s7978_s6 + $0x78] sm:$0xff]  ;;  %p6393_p0 = scmp.ne.s32.totalorder %s5165_s15, %s6392_s4  ;;  %p6398_p2 = scmp.lt.s32.totalorder %s6396_s0, %s6392_s4 }
0x117c   :  { %5349 = vmatprep.mubr.msk.f32.mxu1 %vm152_vm0, %v2792_v44  ;;  %6196 = vmatprep.subr.bf16.mxu1 %v6195_v43 }
0x117d   :  { %v2804_v17 = vpop.permute.xlu1 %2803  ;;  %6194 = vmatpush1.bf16.msra.mxu0 %v6193_v23  ;;  %6198 = vmatpush3.bf16.msra.mxu1 %v6195_v43  ;;  %p6399_p3 = por %p6398_p2, %p6397_p1 }
0x117e   :  { %v2812_v46 = vsel %vm152_vm0, %v2773_v39, %v2804_v17  ;;  %v6199_v17 = vpack.c.bf16 %v5383_v1, %v5382_v42 }
0x117f   :  { %2938 = vmatmul.mubr.f32.gmra.mrb[46].mxu1 %v2812_v46  ;;  %p6400_p4 = pnand %p6399_p3, %p6393_p0 }
0x1180   :  { %6200 = vmatprep.subr.bf16.mxu1 %v6199_v17 }
0x1181   :  { %6202 = vmatpush3.bf16.msra.mxu1 %v6199_v17 }
0x1182   :  { %6204 = vmatprep.subr.bf16.mxu1 %v6203_v5 }
0x1185   :  { %6206 = vmatpush3.bf16.msra.mxu1 %v6203_v5 }
0x1186   :  { %6208 = vmatprep.subr.bf16.mxu1 %v6207_v11 }
0x1189   :  { %6210 = vmatpush3.bf16.msra.mxu1 %v6207_v11 }
0x118a   :  { %6212 = vmatprep.subr.bf16.mxu1 %v6211_v20 }
0x1242   :  { %v2924_v26 = vpop.f32.mrb[40].mxu1 }
0x1243   :  { %v2925_v28 = vadd.f32 %v5345_v24, %v2924_v26  ;;  %v2926_v29 = vpop.f32.mrb[41].mxu1 }
0x1244   :  { %v5396_v29 = vld [vmem:[%s7978_s6 + $0x50] sm:$0xff] }
0x1245   :  { %v2943_v30 = vmax.f32 %v2925_v28, 0.0 }
0x1246   :  { %v2929_v32 = vpop.f32.mrb[42].mxu1 }
0x1247   :  { %v2930_v62 = vadd.f32 %v5345_v24, %v2929_v32  ;;  %v2931_v34 = vpop.f32.mrb[43].mxu1  ;;  %2975 = vrot.lane.b32.xlu0 %v2943_v30, %s6416_s27  ;;  %v2947_v39 = vrot.slane %v2943_v30, 7  ;;  %v2959_v48 = vrot.slane %v2943_v30, 1  ;;  %v5397_v30 = vld [vmem:[%s7978_s6 + $0x58] sm:$0xff] }
0x1249   :  { %v2944_v35 = vmax.f32 %v2930_v62, 0.0 }
0x124b   :  { %v2948_v49 = vrot.slane %v2944_v35, 7  ;;  %v2960_v6 = vrot.slane %v2944_v35, 1  ;;  %2977 = vrot.lane.b32.xlu1 %v2944_v35, %s6416_s27  ;;  %v6215_v35 = vpack.c.bf16 %v5397_v30, %v5396_v29 }
0x124d   :  { %v2965_v2 = vsel %vm127_vm1, %v2959_v48, %v2960_v6  ;;  %v2953_v44 = vsel %vm114_vm2, %v2947_v39, %v2948_v49 }
0x124e   :  { %v2934_v46 = vpop.f32.mrb[44].mxu1  ;;  %5376 = vmatprep.mubr.msk.f32.mxu0 %vm152_vm0, %v2965_v2  ;;  %v6223_v2 = vpack.c.bf16 %v5401_v41, %v5400_v8 }
0x124f   :  { %v2935_v15 = vadd.f32 %v5345_v24, %v2934_v46  ;;  %v2936_v50 = vpop.f32.mrb[45].mxu1 }
0x1250   :  { %v6390_v50 = vld [vmem:[%s7973_s1] sm:$0xff] }
0x1251   :  { %v2945_v51 = vmax.f32 %v2935_v15, 0.0 }
0x1252   :  { %v2939_v52 = vpop.f32.mrb[46].mxu1 }
0x1253   :  { %v2949_v53 = vrot.slane %v2945_v51, 7  ;;  %v2961_v60 = vrot.slane %v2945_v51, 1  ;;  %v2940_v31 = vadd.f32 %v5345_v24, %v2939_v52  ;;  %v2941_v25 = vpop.f32.mrb[47].mxu1  ;;  %2979 = vrot.lane.b32.xlu0 %v2945_v51, %s6416_s27  ;;  %v6391_v51 = vld [vmem:[%s7973_s1 + $0x8] sm:$0xff]  ;;  %v5389_v52 = vld [vmem:[%s7977_s5 + $0x1] ss:$0 sm:$0xff] }
0x1255   :  { %v2946_v27 = vmax.f32 %v2940_v31, 0.0  ;;  %v2964_v33 = vsel %vm127_vm1, %v2960_v6, %v2961_v60  ;;  %v2952_v55 = vsel %vm114_vm2, %v2948_v49, %v2949_v53 }
0x1256   :  { %v2968_v40 = vsel %vm6636_vm4, 0.0, %v2964_v33  ;;  %v2957_v63 = vsel %vm6648_vm5, 0.0, %v2952_v55  ;;  %v5403_v33 = vld [vmem:[%s7979_s7 + $0x1] ss:$0 sm:$0xff] }
0x1257   :  { %v2950_v37 = vrot.slane %v2946_v27, 7  ;;  %v2962_v19 = vrot.slane %v2946_v27, 1  ;;  %2981 = vrot.lane.b32.xlu1 %v2946_v27, %s6416_s27 }
0x1259   :  { %v2954_v18 = vsel %vm114_vm2, %v2950_v37, %v2947_v39  ;;  %v2963_v57 = vsel %vm127_vm1, %v2961_v60, %v2962_v19  ;;  %v2966_v36 = vsel %vm127_vm1, %v2962_v19, %v2959_v48  ;;  %v2951_v58 = vsel %vm114_vm2, %v2949_v53, %v2950_v37  ;;  %v5398_v39 = vld [vmem:[%s7978_s6 + $0x60] sm:$0xff]  ;;  %v5399_v48 = vld [vmem:[%s7978_s6 + $0x68] sm:$0xff] }
0x125a   :  { %v2955_v61 = vsel %vm6632_vm3, 0.0, %v2954_v18  ;;  %v2970_v59 = vsel %vm6658_vm6, 0.0, %v2966_v36  ;;  %v6219_v49 = vpack.c.bf16 %v5399_v48, %v5398_v39 }
0x12b9   :  { %v2976_v45 = vpop.permute.xlu0 %2975 }
0x12ba   :  { %v2987_v38 = vsel %vm152_vm0, %v2955_v61, %v2976_v45 }
0x12bb   :  { %3101 = vmatmul.mubr.f32.vlgmr.msra.gmra.mrb[34].mxu0 %v2987_v38 }
0x12bc   :  { %5377 = vmatprep.mubr.msk.f32.mxu0 %vm152_vm0, %v2968_v40 }
0x12bd   :  { %v2978_v47 = vpop.permute.xlu1 %2977 }
0x12be   :  { %v2988_v56 = vsel %vm152_vm0, %v2953_v44, %v2978_v47 }
0x12bf   :  { %3106 = vmatmul.mubr.f32.gmra.mrb[36].mxu0 %v2988_v56 }
0x12c0   :  { %5378 = vmatprep.mubr.msk.f32.mxu0 %vm152_vm0, %v2963_v57 }
0x12c5   :  { %v2980_v16 = vpop.permute.xlu0 %2979 }
0x12c6   :  { %v2989_v54 = vsel %vm152_vm0, %v2957_v63, %v2980_v16 }
0x12c7   :  { %3111 = vmatmul.mubr.f32.gmra.mrb[38].mxu0 %v2989_v54 }
0x12c8   :  { %5379 = vmatprep.mubr.msk.f32.mxu0 %vm152_vm0, %v2970_v59 }
0x12c9   :  { %v2982_v0 = vpop.permute.xlu1 %2981 }
0x12ca   :  { %v2990_v3 = vsel %vm152_vm0, %v2951_v58, %v2982_v0 }
0x12cb   :  { %3116 = vmatmul.mubr.f32.gmra.mrb[40].mxu0 %v2990_v3 }
0x138e   :  { %v3102_v22 = vpop.f32.mrb[34].mxu0 }
0x138f   :  { %v7648_v23 = vadd.f32 %v5375_v21, %v3102_v22  ;;  %v3104_v24 = vpop.f32.mrb[35].mxu0 }
0x1391   :  { %v3121_v26 = vmax.f32 %v7648_v23, 0.0 }
0x1392   :  { %v3107_v28 = vpop.f32.mrb[36].mxu0 }
0x1393   :  { %v7657_v32 = vadd.f32 %v5375_v21, %v3107_v28  ;;  %v3109_v62 = vpop.f32.mrb[37].mxu0  ;;  %5793 = vmatprep.mubr.msk.f32.mxu1 %vm152_vm0, %v3121_v26 }
0x1395   :  { %v3122_v34 = vmax.f32 %v7657_v32, 0.0 }
0x1397   :  { %5794 = vmatmul.mubr.msk.f32.vlgmr.msra.gmra.mrb[48].mxu1 %vm152_vm0, %v3122_v34 }
0x1398   :  { %6214 = vmatpush3.bf16.msra.mxu1 %v6211_v20 }
0x1399   :  { %6216 = vmatprep.subr.bf16.mxu1 %v6215_v35 }
0x139a   :  { %v3112_v6 = vpop.f32.mrb[38].mxu0 }
0x139b   :  { %v7678_v42 = vadd.f32 %v5375_v21, %v3112_v6  ;;  %v3114_v43 = vpop.f32.mrb[39].mxu0 }
0x139c   :  { %6218 = vmatpush3.bf16.msra.mxu1 %v6215_v35 }
0x139d   :  { %v3123_v1 = vmax.f32 %v7678_v42, 0.0  ;;  %6220 = vmatprep.subr.bf16.mxu1 %v6219_v49 }
0x139e   :  { %v3117_v44 = vpop.f32.mrb[40].mxu0 }
0x139f   :  { %v7681_v17 = vadd.f32 %v5375_v21, %v3117_v44  ;;  %v3119_v46 = vpop.f32.mrb[41].mxu0  ;;  %5796 = vmatprep.mubr.msk.f32.mxu1 %vm152_vm0, %v3123_v1 }
0x13a0   :  { %6222 = vmatpush3.bf16.msra.mxu1 %v6219_v49 }
0x13a1   :  { %v3124_v15 = vmax.f32 %v7681_v17, 0.0  ;;  %6224 = vmatprep.subr.bf16.mxu1 %v6223_v2 }
0x13a3   :  { %5797 = vmatmul.mubr.msk.f32.gmra.mrb[50].mxu1 %vm152_vm0, %v3124_v15 }
0x13a4   :  { %6226 = vmatpush3.bf16.msra.mxu1 %v6223_v2  ;;  %5815 = vmatprep.mubr.msk.f32.mxu1 %vm152_vm0, %v6390_v50 }
0x13a7   :  { %5816 = vmatmul.mubr.msk.f32.vlgmr.msra.gmra.mrb[52].mxu1 %vm152_vm0, %v6391_v51 }
0x146a   :  { %v5795_v53 = vpop.f32.mrb[48].mxu1 }
0x146b   :  { %v3220_v60 = vpop.f32.mrb[49].mxu1  ;;  %v7716_v57 = vadd.f32 %v5795_v53, %v5389_v52 }
0x146c   :  { %v7701_v31 = vadd.f32 %v5389_v52, %v3220_v60 }
0x146e   :  { %5820 = vmatprep.mubr.msk.f32.mxu1 %vm853_vm7, %v7701_v31 }
0x1476   :  { %v5798_v25 = vpop.f32.mrb[50].mxu1 }
0x1477   :  { %v3230_v27 = vpop.f32.mrb[51].mxu1  ;;  %v7728_v58 = vadd.f32 %v5798_v25, %v5389_v52 }
0x1478   :  { %v7720_v36 = vadd.f32 %v5389_v52, %v3230_v27 }
0x147a   :  { %v5817_v55 = vpop.f32.mrb[52].mxu1 }
0x147b   :  { %v3322_v37 = vpop.f32.mrb[53].mxu1  ;;  %v7710_v18 = vadd.f32 %v5817_v55, %v5403_v33 }
0x147c   :  { %v7708_v19 = vadd.f32 %v5403_v33, %v3322_v37 }
0x147e   :  { %5818 = vmatprep.subr.msk.mxu1 %vm853_vm7, %v7708_v19 }
0x147f   :  { %5819 = vmatpush3.xpose.msk.msra.mxu1 %vm853_vm7, %v7708_v19 }
0x1480   :  { %5823 = vmatprep.subr.msk.mxu1 %vm853_vm7, %v7710_v18 }
0x1482   :  { %5821 = vmatmul.mubr.msk.f32.vlgmr.msra.gmra.mrb[54].mxu1 %vm853_vm7, %v7716_v57 }
0x1483   :  { %5824 = vmatpush3.xpose.msk.msra.mxu1 %vm853_vm7, %v7710_v18  ;;  %5825 = vmatprep.mubr.msk.f32.mxu1 %vm853_vm7, %v7720_v36 }
0x1486   :  { %5826 = vmatmul.mubr.msk.f32.vlgmr.msra.gmra.mrb[56].mxu1 %vm853_vm7, %v7728_v58 }
0x1555   :  { %v5822_v61 = vpop.f32.mrb[54].mxu1 }
0x1556   :  { %v3500_v45 = vmul.f32 0.25, %v5822_v61  ;;  %v3406_v38 = vpop.f32.mrb[55].mxu1 }
0x1557   :  { %v3499_v40 = vmul.f32 0.25, %v3406_v38 }
0x1558   :  { %v3506_v47 = vsel %vm1026_vm8, %v3500_v45, -inf }
0x1559   :  { %3507 = vmax.xlane.f32.xlu1 %v3506_v47  ;;  %v5827_v56 = vpop.f32.mrb[56].mxu1  ;;  %v3503_v16 = vsel %vm1026_vm8, %v3499_v40, -inf }
0x155a   :  { %v3502_v63 = vmul.f32 0.25, %v5827_v56  ;;  %3504 = vmax.xlane.f32.xlu0 %v3503_v16  ;;  %v3490_v54 = vpop.f32.mrb[57].mxu1 }
0x155b   :  { %v3501_v0 = vmul.f32 0.25, %v3490_v54 }
0x155c   :  { %v3512_v59 = vsel %vm1026_vm8, %v3502_v63, -inf }
0x155d   :  { %v3509_v3 = vsel %vm1026_vm8, %v3501_v0, -inf }
0x155e   :  { %3513 = vmax.xlane.f32.xlu0 %v3512_v59 }
0x1562   :  { %3510 = vmax.xlane.f32.xlu0 %v3509_v3 }
0x156a   :  { %3547 = vrot.lane.b32.xlu1 %v7708_v19, %s6416_s27 }
0x156e   :  { %3631 = vrot.lane.b32.xlu1 %v7710_v18, %s6416_s27 }
0x1572   :  { %3715 = vrot.lane.b32.xlu1 %v7701_v31, %s6418_s21 }
0x1576   :  { %3806 = vrot.lane.b32.xlu1 %v7710_v18, %s6418_s21 }
0x1578   :  { %3719 = vrot.lane.b32.xlu0 %v7708_v19, %s6418_s21 }
0x15e6   :  { %v3508_v4 = vpop.xlane.xlu1 %3507 }
0x15e7   :  { %v3516_v7 = vsub.f32 %v3500_v45, %v3508_v4  ;;  %v3505_v5 = vpop.xlane.xlu0 %3504 }
0x15e8   :  { %v3515_v14 = vsub.f32 %v3499_v40, %v3505_v5 }
0x15e9   :  { %v3521_v9 = vmul.f32 1.442695, %v3516_v7 }
0x15ea   :  { %v3519_v11 = vmul.f32 1.442695, %v3515_v14  ;;  %v3548_v12 = vpop.permute.xlu1 %3547 }
0x15eb   :  { %6326 = vpow2.f32 %v3521_v9  ;;  %5828 = vmatprep.subr.mxu1 %v3548_v12  ;;  %v3514_v13 = vpop.xlane.xlu0 %3513 }
0x15ec   :  { %6328 = vpow2.f32 %v3519_v11  ;;  %5829 = vmatpush3.msra.mxu1 %v3548_v12  ;;  %v3518_v6 = vsub.f32 %v3502_v63, %v3514_v13 }
0x15ee   :  { %v3632_v20 = vpop.permute.xlu1 %3631  ;;  %v3525_v8 = vmul.f32 1.442695, %v3518_v6 }
0x15ef   :  { %5833 = vmatprep.subr.mxu1 %v3632_v20  ;;  %v3511_v21 = vpop.xlane.xlu0 %3510 }
0x15f0   :  { %v3517_v22 = vsub.f32 %v3501_v0, %v3511_v21 }
0x15f2   :  { %v3523_v24 = vmul.f32 1.442695, %v3517_v22  ;;  %v3716_v28 = vpop.permute.xlu1 %3715 }
0x15f3   :  { %5840 = vmatprep.mubr.msk.f32.mxu0 %vm853_vm7, %v3716_v28  ;;  %v3720_v29 = vpop.permute.xlu0 %3719 }
0x15f4   :  { %6330 = vpow2.f32 %v3523_v24  ;;  %5838 = vmatprep.subr.msk.mxu0 %vm853_vm7, %v3720_v29 }
0x15f5   :  { %v6327_v30 = vpop.eup %6326  ;;  %5839 = vmatpush3.xpose.msk.msra.mxu0 %vm853_vm7, %v3720_v29  ;;  %6332 = vpow2.f32 %v3525_v8 }
0x15f6   :  { %v6329_v62 = vpop.eup %6328  ;;  %v3530_v35 = vsel %vm1026_vm8, %v6327_v30, 0.0  ;;  %v3807_v2 = vpop.permute.xlu1 %3806 }
0x15f7   :  { %3531 = vadd.xlane.f32.xlu0 %v3530_v35  ;;  %v3527_v39 = vsel %vm1026_vm8, %v6329_v62, 0.0 }
0x15f8   :  { %3528 = vadd.xlane.f32.xlu1 %v3527_v39 }
0x15fe   :  { %v6331_v48 = vpop.eup %6330 }
0x15ff   :  { %v3533_v49 = vsel %vm1026_vm8, %v6331_v48, 0.0  ;;  %v6333_v41 = vpop.eup %6332 }
0x1600   :  { %3534 = vadd.xlane.f32.xlu1 %v3533_v49  ;;  %v3536_v43 = vsel %vm1026_vm8, %v6333_v41, 0.0 }
0x160d   :  { %3717 = vrot.lane.b32.xlu0 %v7716_v57, %s6418_s21 }
0x1611   :  { %3804 = vrot.lane.b32.xlu1 %v7728_v58, %s6418_s21 }
0x162c   :  { %3537 = vadd.xlane.f32.xlu0 %v3536_v43 }
0x1642   :  { %3802 = vrot.lane.b32.xlu0 %v7720_v36, %s6418_s21 }
0x1684   :  { %v3532_v44 = vpop.xlane.xlu0 %3531 }
0x1685   :  { %6334 = vrcp.f32 %v3532_v44  ;;  %v3529_v46 = vpop.xlane.xlu1 %3528 }
0x1686   :  { %6336 = vrcp.f32 %v3529_v46 }
0x1688   :  { %v3718_v50 = vpop.permute.xlu0 %3717 }
0x1689   :  { %5841 = vmatmul.mubr.msk.f32.vlgmr.msra.gmra.mrb[42].mxu0 %vm853_vm7, %v3718_v50 }
0x168d   :  { %v3535_v51 = vpop.xlane.xlu1 %3534 }
0x168e   :  { %6338 = vrcp.f32 %v3535_v51 }
0x168f   :  { %v6335_v52 = vpop.eup %6334 }
0x1690   :  { %v6337_v53 = vpop.eup %6336  ;;  %v3544_v25 = vmul.f32 %v6335_v52, %v6327_v30 }
0x1691   :  { %v3543_v60 = vmul.f32 %v6337_v53, %v6329_v62  ;;  %v3805_v38 = vpop.permute.xlu1 %3804 }
0x1693   :  { %5830 = vmatprep.mubr.msk.f32.mxu1 %vm1026_vm8, %v3543_v60 }
0x1694   :  { %5831 = vmatmul.mubr.msk.f32.vlgmr.msra.gmra.mrb[58].mxu1 %vm1026_vm8, %v3544_v25 }
0x1695   :  { %5834 = vmatpush3.msra.mxu1 %v3632_v20 }
0x1696   :  { %5843 = vmatprep.subr.msk.mxu1 %vm853_vm7, %v3807_v2 }
0x1698   :  { %v6339_v27 = vpop.eup %6338 }
0x1699   :  { %v3545_v33 = vmul.f32 %v6339_v27, %v6331_v48 }
0x169b   :  { %5835 = vmatprep.mubr.msk.f32.mxu1 %vm1026_vm8, %v3545_v33 }
0x16b9   :  { %v3538_v55 = vpop.xlane.xlu0 %3537 }
0x16ba   :  { %6340 = vrcp.f32 %v3538_v55 }
0x16bd   :  { %v3803_v45 = vpop.permute.xlu0 %3802 }
0x16c4   :  { %v6341_v37 = vpop.eup %6340 }
0x16c5   :  { %v3546_v61 = vmul.f32 %v6341_v37, %v6333_v41 }
0x16c7   :  { %5836 = vmatmul.mubr.msk.f32.vlgmr.msra.gmra.mrb[60].mxu1 %vm1026_vm8, %v3546_v61 }
0x16c8   :  { %5844 = vmatpush3.xpose.msk.msra.mxu1 %vm853_vm7, %v3807_v2  ;;  %5845 = vmatprep.mubr.msk.f32.mxu1 %vm853_vm7, %v3803_v45 }
0x16cb   :  { %5846 = vmatmul.mubr.msk.f32.vlgmr.msra.gmra.mrb[62].mxu1 %vm853_vm7, %v3805_v38 }
0x175c   :  { %v5842_v40 = vpop.f32.mrb[42].mxu0 }
0x175d   :  { %v3890_v47 = vmul.f32 0.25, %v5842_v40  ;;  %v3793_v56 = vpop.f32.mrb[43].mxu0 }
0x175e   :  { %v3889_v16 = vmul.f32 0.25, %v3793_v56 }
0x175f   :  { %v3896_v63 = vsel %vm1026_vm8, %v3890_v47, -inf }
0x1760   :  { %3897 = vmax.xlane.f32.xlu1 %v3896_v63  ;;  %v3893_v54 = vsel %vm1026_vm8, %v3889_v16, -inf }
0x1761   :  { %3894 = vmax.xlane.f32.xlu0 %v3893_v54 }
0x1767   :  { %v7770_v59 = vpop.f32.mrb[58].mxu1 }
0x1768   :  { %v7772_v0 = vpop.f32.mrb[59].mxu1 }
0x179a   :  { %v7774_v3 = vpop.f32.mrb[60].mxu1 }
0x179b   :  { %v7776_v4 = vpop.f32.mrb[61].mxu1 }
0x179e   :  { %v5847_v7 = vpop.f32.mrb[62].mxu1 }
0x179f   :  { %v3880_v5 = vpop.f32.mrb[63].mxu1  ;;  %v3892_v9 = vmul.f32 0.25, %v5847_v7 }
0x17a0   :  { %v3891_v14 = vmul.f32 0.25, %v3880_v5 }
0x17a1   :  { %v3902_v12 = vsel %vm1026_vm8, %v3892_v9, -inf }
0x17a2   :  { %v3899_v11 = vsel %vm1026_vm8, %v3891_v14, -inf }
0x17a3   :  { %3900 = vmax.xlane.f32.xlu0 %v3899_v11 }
0x17a7   :  { %3903 = vmax.xlane.f32.xlu0 %v3902_v12 }
0x17ed   :  { %v3898_v13 = vpop.xlane.xlu1 %3897 }
0x17ee   :  { %v3906_v20 = vsub.f32 %v3890_v47, %v3898_v13  ;;  %v3895_v21 = vpop.xlane.xlu0 %3894 }
0x17ef   :  { %v3905_v22 = vsub.f32 %v3889_v16, %v3895_v21 }
0x17f0   :  { %v3911_v24 = vmul.f32 1.442695, %v3906_v20 }
0x17f1   :  { %v3909_v28 = vmul.f32 1.442695, %v3905_v22 }
0x17f2   :  { %6342 = vpow2.f32 %v3911_v24 }
0x17f3   :  { %6344 = vpow2.f32 %v3909_v28 }
0x17fc   :  { %v6343_v29 = vpop.eup %6342 }
0x17fd   :  { %v6345_v30 = vpop.eup %6344  ;;  %v3920_v62 = vsel %vm1026_vm8, %v6343_v29, 0.0 }
0x17fe   :  { %3921 = vadd.xlane.f32.xlu0 %v3920_v62  ;;  %v3917_v35 = vsel %vm1026_vm8, %v6345_v30, 0.0 }
0x17ff   :  { %3918 = vadd.xlane.f32.xlu1 %v3917_v35 }
0x1810   :  { %3937 = vrot.lane.b32.xlu1 %v7708_v19, %s6419_s22 }
0x1814   :  { %4109 = vrot.lane.b32.xlu0 %v7708_v19, %s6420_s23  ;;  %4021 = vrot.lane.b32.xlu1 %v7710_v18, %s6419_s22 }
0x1818   :  { %4107 = vrot.lane.b32.xlu0 %v7716_v57, %s6420_s23  ;;  %4105 = vrot.lane.b32.xlu1 %v7701_v31, %s6420_s23 }
0x181c   :  { %4196 = vrot.lane.b32.xlu1 %v7710_v18, %s6420_s23 }
0x1830   :  { %v3901_v39 = vpop.xlane.xlu0 %3900 }
0x1831   :  { %v3907_v48 = vsub.f32 %v3891_v14, %v3901_v39 }
0x1833   :  { %v3913_v49 = vmul.f32 1.442695, %v3907_v48 }
0x1834   :  { %v3904_v6 = vpop.xlane.xlu0 %3903 }
0x1835   :  { %6346 = vpow2.f32 %v3913_v49  ;;  %v3908_v8 = vsub.f32 %v3892_v9, %v3904_v6 }
0x1837   :  { %v3915_v41 = vmul.f32 1.442695, %v3908_v8 }
0x1839   :  { %6348 = vpow2.f32 %v3915_v41 }
0x183f   :  { %v6347_v43 = vpop.eup %6346 }
0x1840   :  { %v3923_v2 = vsel %vm1026_vm8, %v6347_v43, 0.0 }
0x1841   :  { %3924 = vadd.xlane.f32.xlu1 %v3923_v2 }
0x1843   :  { %v6349_v44 = vpop.eup %6348 }
0x1844   :  { %v3926_v46 = vsel %vm1026_vm8, %v6349_v44, 0.0 }
0x1845   :  { %3927 = vadd.xlane.f32.xlu0 %v3926_v46 }
0x1852   :  { %4194 = vrot.lane.b32.xlu1 %v7728_v58, %s6420_s23 }
0x185b   :  { %4192 = vrot.lane.b32.xlu0 %v7720_v36, %s6420_s23 }
0x188b   :  { %v3922_v50 = vpop.xlane.xlu0 %3921 }
0x188c   :  { %6350 = vrcp.f32 %v3922_v50  ;;  %v3919_v51 = vpop.xlane.xlu1 %3918 }
0x188d   :  { %6352 = vrcp.f32 %v3919_v51 }
0x188f   :  { %v4110_v53 = vpop.permute.xlu0 %4109 }
0x1890   :  { %v3938_v52 = vpop.permute.xlu1 %3937 }
0x1891   :  { %5848 = vmatprep.subr.mxu0 %v3938_v52 }
0x1892   :  { %5849 = vmatpush3.msra.mxu0 %v3938_v52 }
0x1893   :  { %5858 = vmatprep.subr.msk.mxu0 %vm853_vm7, %v4110_v53  ;;  %v4108_v45 = vpop.permute.xlu0 %4107 }
0x1894   :  { %v4022_v60 = vpop.permute.xlu1 %4021 }
0x1895   :  { %5853 = vmatprep.subr.mxu1 %v4022_v60 }
0x1896   :  { %v6351_v25 = vpop.eup %6350  ;;  %5854 = vmatpush3.msra.mxu1 %v4022_v60 }
0x1897   :  { %v6353_v27 = vpop.eup %6352  ;;  %v3934_v37 = vmul.f32 %v6351_v25, %v6343_v29 }
0x1898   :  { %v4106_v33 = vpop.permute.xlu1 %4105  ;;  %v3933_v55 = vmul.f32 %v6353_v27, %v6345_v30 }
0x189a   :  { %5850 = vmatprep.mubr.msk.f32.mxu0 %vm1026_vm8, %v3933_v55 }
0x189b   :  { %5851 = vmatmul.mubr.msk.f32.vlgmr.msra.gmra.mrb[44].mxu0 %vm1026_vm8, %v3934_v37 }
0x189c   :  { %5859 = vmatpush3.xpose.msk.msra.mxu0 %vm853_vm7, %v4110_v53  ;;  %v4197_v61 = vpop.permute.xlu1 %4196  ;;  %5860 = vmatprep.mubr.msk.f32.mxu0 %vm853_vm7, %v4106_v33 }
0x189d   :  { %5863 = vmatprep.subr.msk.mxu1 %vm853_vm7, %v4197_v61 }
0x189f   :  { %5861 = vmatmul.mubr.msk.f32.vlgmr.msra.gmra.mrb[46].mxu0 %vm853_vm7, %v4108_v45 }
0x18ce   :  { %v3925_v38 = vpop.xlane.xlu1 %3924 }
0x18cf   :  { %6354 = vrcp.f32 %v3925_v38 }
0x18d2   :  { %v3928_v40 = vpop.xlane.xlu0 %3927  ;;  %v4195_v7 = vpop.permute.xlu1 %4194 }
0x18d3   :  { %6356 = vrcp.f32 %v3928_v40 }
0x18d6   :  { %v4193_v54 = vpop.permute.xlu0 %4192 }
0x18d9   :  { %v6355_v47 = vpop.eup %6354 }
0x18da   :  { %v3935_v56 = vmul.f32 %v6355_v47, %v6347_v43 }
0x18dc   :  { %5855 = vmatprep.mubr.msk.f32.mxu1 %vm1026_vm8, %v3935_v56 }
0x18dd   :  { %v6357_v16 = vpop.eup %6356 }
0x18de   :  { %v3936_v63 = vmul.f32 %v6357_v16, %v6349_v44 }
0x18e0   :  { %5856 = vmatmul.mubr.msk.f32.vlgmr.msra.gmra.mrb[64].mxu1 %vm1026_vm8, %v3936_v63 }
0x18e1   :  { %5864 = vmatpush3.xpose.msk.msra.mxu1 %vm853_vm7, %v4197_v61  ;;  %5865 = vmatprep.mubr.msk.f32.mxu1 %vm853_vm7, %v4193_v54 }
0x18e4   :  { %5866 = vmatmul.mubr.msk.f32.vlgmr.msra.gmra.mrb[66].mxu1 %vm853_vm7, %v4195_v7 }
0x196e   :  { %v7812_v5 = vpop.f32.mrb[44].mxu0 }
0x196f   :  { %v7814_v14 = vpop.f32.mrb[45].mxu0 }
0x1972   :  { %v5862_v9 = vpop.f32.mrb[46].mxu0 }
0x1973   :  { %v4280_v11 = vmul.f32 0.25, %v5862_v9  ;;  %v4183_v12 = vpop.f32.mrb[47].mxu0 }
0x1974   :  { %v4279_v13 = vmul.f32 0.25, %v4183_v12 }
0x1975   :  { %v4286_v20 = vsel %vm1026_vm8, %v4280_v11, -inf }
0x1976   :  { %4287 = vmax.xlane.f32.xlu1 %v4286_v20  ;;  %v4283_v21 = vsel %vm1026_vm8, %v4279_v13, -inf }
0x1977   :  { %4284 = vmax.xlane.f32.xlu0 %v4283_v21 }
0x19b3   :  { %v7818_v22 = vpop.f32.mrb[64].mxu1 }
0x19b4   :  { %v7820_v24 = vpop.f32.mrb[65].mxu1 }
0x19b7   :  { %v5867_v28 = vpop.f32.mrb[66].mxu1 }
0x19b8   :  { %v4270_v29 = vpop.f32.mrb[67].mxu1  ;;  %v4282_v62 = vmul.f32 0.25, %v5867_v28 }
0x19b9   :  { %v4281_v30 = vmul.f32 0.25, %v4270_v29 }
0x19ba   :  { %v4292_v39 = vsel %vm1026_vm8, %v4282_v62, -inf }
0x19bb   :  { %v4289_v35 = vsel %vm1026_vm8, %v4281_v30, -inf }
0x19bc   :  { %4290 = vmax.xlane.f32.xlu0 %v4289_v35 }
0x19c0   :  { %4293 = vmax.xlane.f32.xlu0 %v4292_v39 }
0x1a03   :  { %v4288_v48 = vpop.xlane.xlu1 %4287 }
0x1a04   :  { %v4296_v49 = vsub.f32 %v4280_v11, %v4288_v48  ;;  %v4285_v6 = vpop.xlane.xlu0 %4284 }
0x1a05   :  { %v4295_v8 = vsub.f32 %v4279_v13, %v4285_v6 }
0x1a06   :  { %v4301_v41 = vmul.f32 1.442695, %v4296_v49 }
0x1a07   :  { %v4299_v43 = vmul.f32 1.442695, %v4295_v8 }
0x1a08   :  { %6358 = vpow2.f32 %v4301_v41 }
0x1a09   :  { %6360 = vpow2.f32 %v4299_v43 }
0x1a12   :  { %v6359_v2 = vpop.eup %6358 }
0x1a13   :  { %v6361_v44 = vpop.eup %6360  ;;  %v4310_v46 = vsel %vm1026_vm8, %v6359_v2, 0.0 }
0x1a14   :  { %4311 = vadd.xlane.f32.xlu0 %v4310_v46  ;;  %v4307_v50 = vsel %vm1026_vm8, %v6361_v44, 0.0 }
0x1a15   :  { %4308 = vadd.xlane.f32.xlu1 %v4307_v50 }
0x1a26   :  { %4327 = vrot.lane.b32.xlu1 %v7708_v19, %s6421_s24 }
0x1a2a   :  { %4499 = vrot.lane.b32.xlu0 %v7708_v19, %s6422_s25  ;;  %4411 = vrot.lane.b32.xlu1 %v7710_v18, %s6421_s24 }
0x1a2e   :  { %4497 = vrot.lane.b32.xlu0 %v7716_v57, %s6422_s25  ;;  %4495 = vrot.lane.b32.xlu1 %v7701_v31, %s6422_s25 }
0x1a32   :  { %4586 = vrot.lane.b32.xlu1 %v7710_v18, %s6422_s25 }
0x1a49   :  { %v4291_v51 = vpop.xlane.xlu0 %4290 }
0x1a4a   :  { %v4297_v52 = vsub.f32 %v4281_v30, %v4291_v51 }
0x1a4c   :  { %v4303_v53 = vmul.f32 1.442695, %v4297_v52 }
0x1a4d   :  { %v4294_v60 = vpop.xlane.xlu0 %4293 }
0x1a4e   :  { %6362 = vpow2.f32 %v4303_v53  ;;  %v4298_v25 = vsub.f32 %v4282_v62, %v4294_v60 }
0x1a50   :  { %v4305_v27 = vmul.f32 1.442695, %v4298_v25 }
0x1a52   :  { %6364 = vpow2.f32 %v4305_v27 }
0x1a58   :  { %v6363_v33 = vpop.eup %6362 }
0x1a59   :  { %v4313_v55 = vsel %vm1026_vm8, %v6363_v33, 0.0 }
0x1a5a   :  { %4314 = vadd.xlane.f32.xlu1 %v4313_v55 }
0x1a5c   :  { %v6365_v37 = vpop.eup %6364 }
0x1a5d   :  { %v4316_v57 = vsel %vm1026_vm8, %v6365_v37, 0.0 }
0x1a5e   :  { %4317 = vadd.xlane.f32.xlu0 %v4316_v57 }
0x1a6b   :  { %4584 = vrot.lane.b32.xlu1 %v7728_v58, %s6422_s25 }
0x1a74   :  { %4582 = vrot.lane.b32.xlu0 %v7720_v36, %s6422_s25 }
0x1aa1   :  { %v4312_v31 = vpop.xlane.xlu0 %4311 }
0x1aa2   :  { %6366 = vrcp.f32 %v4312_v31  ;;  %v4309_v61 = vpop.xlane.xlu1 %4308 }
0x1aa3   :  { %6368 = vrcp.f32 %v4309_v61 }
0x1aa5   :  { %v4500_v38 = vpop.permute.xlu0 %4499 }
0x1aa6   :  { %v4328_v45 = vpop.permute.xlu1 %4327 }
0x1aa7   :  { %5868 = vmatprep.subr.mxu0 %v4328_v45 }
0x1aa8   :  { %5869 = vmatpush3.msra.mxu0 %v4328_v45 }
0x1aa9   :  { %5878 = vmatprep.subr.msk.mxu0 %vm853_vm7, %v4500_v38  ;;  %v4498_v54 = vpop.permute.xlu0 %4497 }
0x1aaa   :  { %v4412_v40 = vpop.permute.xlu1 %4411 }
0x1aab   :  { %5873 = vmatprep.subr.mxu1 %v4412_v40 }
0x1aac   :  { %v6367_v47 = vpop.eup %6366  ;;  %5874 = vmatpush3.msra.mxu1 %v4412_v40 }
0x1aad   :  { %v6369_v56 = vpop.eup %6368  ;;  %v4324_v63 = vmul.f32 %v6367_v47, %v6359_v2 }
0x1aae   :  { %v4496_v16 = vpop.permute.xlu1 %4495  ;;  %v4323_v58 = vmul.f32 %v6369_v56, %v6361_v44 }
0x1ab0   :  { %5870 = vmatprep.mubr.msk.f32.mxu0 %vm1026_vm8, %v4323_v58 }
0x1ab1   :  { %5871 = vmatmul.mubr.msk.f32.vlgmr.msra.gmra.mrb[48].mxu0 %vm1026_vm8, %v4324_v63 }
0x1ab2   :  { %5879 = vmatpush3.xpose.msk.msra.mxu0 %vm853_vm7, %v4500_v38  ;;  %v4587_v36 = vpop.permute.xlu1 %4586  ;;  %5880 = vmatprep.mubr.msk.f32.mxu0 %vm853_vm7, %v4496_v16 }
0x1ab3   :  { %5883 = vmatprep.subr.msk.mxu1 %vm853_vm7, %v4587_v36 }
0x1ab5   :  { %5881 = vmatmul.mubr.msk.f32.vlgmr.msra.gmra.mrb[50].mxu0 %vm853_vm7, %v4498_v54 }
0x1ae7   :  { %v4315_v7 = vpop.xlane.xlu1 %4314 }
0x1ae8   :  { %6370 = vrcp.f32 %v4315_v7 }
0x1aeb   :  { %v4318_v9 = vpop.xlane.xlu0 %4317  ;;  %v4585_v28 = vpop.permute.xlu1 %4584 }
0x1aec   :  { %6372 = vrcp.f32 %v4318_v9 }
0x1aef   :  { %v4583_v21 = vpop.permute.xlu0 %4582 }
0x1af2   :  { %v6371_v11 = vpop.eup %6370 }
0x1af3   :  { %v4325_v12 = vmul.f32 %v6371_v11, %v6363_v33 }
0x1af5   :  { %5875 = vmatprep.mubr.msk.f32.mxu1 %vm1026_vm8, %v4325_v12 }
0x1af6   :  { %v6373_v13 = vpop.eup %6372 }
0x1af7   :  { %v4326_v20 = vmul.f32 %v6373_v13, %v6365_v37 }
0x1af9   :  { %5876 = vmatmul.mubr.msk.f32.vlgmr.msra.gmra.mrb[68].mxu1 %vm1026_vm8, %v4326_v20 }
0x1afa   :  { %5884 = vmatpush3.xpose.msk.msra.mxu1 %vm853_vm7, %v4587_v36  ;;  %5885 = vmatprep.mubr.msk.f32.mxu1 %vm853_vm7, %v4583_v21 }
0x1afd   :  { %5886 = vmatmul.mubr.msk.f32.vlgmr.msra.gmra.mrb[70].mxu1 %vm853_vm7, %v4585_v28 }
0x1b84   :  { %v5872_v29 = vpop.f32.mrb[48].mxu0 }
0x1b85   :  { %v4402_v30 = vpop.f32.mrb[49].mxu0 }
0x1b88   :  { %v5882_v62 = vpop.f32.mrb[50].mxu0 }
0x1b89   :  { %v4670_v35 = vmul.f32 0.25, %v5882_v62  ;;  %v4573_v39 = vpop.f32.mrb[51].mxu0  ;;  %v5447_v62 = vld [vmem:[%s7980_s8 + $0x48] sm:$0xff] }
0x1b8a   :  { %v4669_v48 = vmul.f32 0.25, %v4573_v39 }
0x1b8b   :  { %v4676_v49 = vsel %vm1026_vm8, %v4670_v35, -inf }
0x1b8c   :  { %4677 = vmax.xlane.f32.xlu1 %v4676_v49  ;;  %v4673_v6 = vsel %vm1026_vm8, %v4669_v48, -inf }
0x1b8d   :  { %4674 = vmax.xlane.f32.xlu0 %v4673_v6  ;;  %v5450_v6 = vld [vmem:[%s7980_s8 + $0x60] sm:$0xff] }
0x1bcc   :  { %v7858_v8 = vpop.f32.mrb[68].mxu1 }
0x1bcd   :  { %v7860_v41 = vpop.f32.mrb[69].mxu1 }
0x1bd0   :  { %v5887_v43 = vpop.f32.mrb[70].mxu1 }
0x1bd1   :  { %v4660_v2 = vpop.f32.mrb[71].mxu1  ;;  %v4672_v46 = vmul.f32 0.25, %v5887_v43  ;;  %v5451_v43 = vld [vmem:[%s7980_s8 + $0x68] sm:$0xff] }
0x1bd2   :  { %v4671_v44 = vmul.f32 0.25, %v4660_v2  ;;  %v6235_v2 = vpack.c.bf16 %v5451_v43, %v5450_v6 }
0x1bd3   :  { %v4682_v51 = vsel %vm1026_vm8, %v4672_v46, -inf }
0x1bd4   :  { %v4679_v50 = vsel %vm1026_vm8, %v4671_v44, -inf }
0x1bd5   :  { %4680 = vmax.xlane.f32.xlu0 %v4679_v50 }
0x1bd9   :  { %4683 = vmax.xlane.f32.xlu0 %v4682_v51 }
0x1c19   :  { %v4678_v52 = vpop.xlane.xlu1 %4677 }
0x1c1a   :  { %v4686_v53 = vsub.f32 %v4670_v35, %v4678_v52  ;;  %v4675_v60 = vpop.xlane.xlu0 %4674  ;;  %v5448_v35 = vld [vmem:[%s7980_s8 + $0x50] sm:$0xff] }
0x1c1b   :  { %v4685_v25 = vsub.f32 %v4669_v48, %v4675_v60  ;;  %v5449_v48 = vld [vmem:[%s7980_s8 + $0x58] sm:$0xff] }
0x1c1c   :  { %v4691_v27 = vmul.f32 1.442695, %v4686_v53  ;;  %v6231_v49 = vpack.c.bf16 %v5449_v48, %v5448_v35 }
0x1c1d   :  { %v4689_v33 = vmul.f32 1.442695, %v4685_v25 }
0x1c1e   :  { %6374 = vpow2.f32 %v4691_v27 }
0x1c1f   :  { %6376 = vpow2.f32 %v4689_v33 }
0x1c28   :  { %v6375_v55 = vpop.eup %6374 }
0x1c29   :  { %v6377_v37 = vpop.eup %6376  ;;  %v4700_v57 = vsel %vm1026_vm8, %v6375_v55, 0.0 }
0x1c2a   :  { %4701 = vadd.xlane.f32.xlu0 %v4700_v57  ;;  %v4697_v31 = vsel %vm1026_vm8, %v6377_v37, 0.0 }
0x1c2b   :  { %4698 = vadd.xlane.f32.xlu1 %v4697_v31 }
0x1c62   :  { %v4681_v61 = vpop.xlane.xlu0 %4680 }
0x1c63   :  { %v4687_v45 = vsub.f32 %v4671_v44, %v4681_v61  ;;  %v5452_v44 = vld [vmem:[%s7980_s8 + $0x70] sm:$0xff] }
0x1c65   :  { %v4693_v38 = vmul.f32 1.442695, %v4687_v45 }
0x1c66   :  { %v4684_v40 = vpop.xlane.xlu0 %4683 }
0x1c67   :  { %6378 = vpow2.f32 %v4693_v38  ;;  %v4688_v47 = vsub.f32 %v4672_v46, %v4684_v40  ;;  %v5453_v46 = vld [vmem:[%s7980_s8 + $0x78] sm:$0xff] }
0x1c68   :  { %v6239_v50 = vpack.c.bf16 %v5453_v46, %v5452_v44 }
0x1c69   :  { %v4695_v56 = vmul.f32 1.442695, %v4688_v47 }
0x1c6b   :  { %6380 = vpow2.f32 %v4695_v56 }
0x1c71   :  { %v6379_v16 = vpop.eup %6378 }
0x1c72   :  { %v4703_v58 = vsel %vm1026_vm8, %v6379_v16, 0.0 }
0x1c73   :  { %4704 = vadd.xlane.f32.xlu1 %v4703_v58 }
0x1c75   :  { %v6381_v63 = vpop.eup %6380 }
0x1c76   :  { %v4706_v36 = vsel %vm1026_vm8, %v6381_v63, 0.0 }
0x1c77   :  { %4707 = vadd.xlane.f32.xlu0 %v4706_v36 }
0x1c84   :  { %4717 = vrot.lane.b32.xlu1 %v7708_v19, %s6423_s26 }
0x1c88   :  { %4889 = vrot.lane.b32.xlu1 %v7814_v14, %s6423_s26 }
0x1c8c   :  { %4891 = vrot.lane.b32.xlu1 %v7812_v5, %s6423_s26 }
0x1c8d   :  { %4801 = vrot.lane.b32.xlu0 %v7710_v18, %s6423_s26 }
0x1c90   :  { %4907 = vrot.lane.b32.xlu1 %v5872_v29, %s6421_s24 }
0x1c91   :  { %4905 = vrot.lane.b32.xlu0 %v4402_v30, %s6421_s24  ;;  %v5446_v30 = vld [vmem:[%s7980_s8 + $0x40] sm:$0xff] }
0x1c92   :  { %v6227_v39 = vpack.c.bf16 %v5447_v62, %v5446_v30 }
0x1cb7   :  { %v4702_v19 = vpop.xlane.xlu0 %4701 }
0x1cb8   :  { %v4699_v54 = vpop.xlane.xlu1 %4698 }
0x1cb9   :  { %6382 = vrcp.f32 %v4699_v54 }
0x1cba   :  { %6384 = vrcp.f32 %v4702_v19 }
0x1cc3   :  { %v6383_v7 = vpop.eup %6382 }
0x1cc4   :  { %v4713_v9 = vmul.f32 %v6383_v7, %v6377_v37  ;;  %v6385_v14 = vpop.eup %6384  ;;  %v6425_v7 = vmov 0.0  }
0x1cc5   :  { %v4714_v13 = vmul.f32 %v6385_v14, %v6375_v55 }
0x1cc6   :  { %5890 = vmatprep.mubr.msk.f32.mxu0 %vm1026_vm8, %v4713_v9 }
0x1d00   :  { %v4705_v11 = vpop.xlane.xlu1 %4704 }
0x1d01   :  { %6386 = vrcp.f32 %v4705_v11 }
0x1d04   :  { %v4718_v12 = vpop.permute.xlu1 %4717  ;;  %v4708_v5 = vpop.xlane.xlu0 %4707 }
0x1d05   :  { %6388 = vrcp.f32 %v4708_v5  ;;  %5888 = vmatprep.subr.mxu0 %v4718_v12 }
0x1d06   :  { %5889 = vmatpush3.msra.mxu0 %v4718_v12 }
0x1d07   :  { %5891 = vmatmul.mubr.msk.f32.vlgmr.msra.gmra.mrb[52].mxu0 %vm1026_vm8, %v4714_v13  ;;  %6228 = vmatprep.subr.bf16.mxu0 %v6227_v39 }
0x1d08   :  { %v4802_v18 = vpop.permute.xlu0 %4801  ;;  %6230 = vmatpush3.bf16.msra.mxu0 %v6227_v39  ;;  %v4890_v25 = vpop.permute.xlu1 %4889 }
0x1d09   :  { %5893 = vmatprep.subr.mxu1 %v4802_v18  ;;  %6232 = vmatprep.subr.bf16.mxu0 %v6231_v49 }
0x1d0a   :  { %5894 = vmatpush3.msra.mxu1 %v4802_v18 }
0x1d0b   :  { %v6387_v20 = vpop.eup %6386  ;;  %6243 = vmatprep.subr.bf16.mxu1 %v6417_v10 }
0x1d0c   :  { %v4715_v21 = vmul.f32 %v6387_v20, %v6379_v16  ;;  %6234 = vmatpush3.bf16.msra.mxu0 %v6231_v49  ;;  %v4892_v27 = vpop.permute.xlu1 %4891  ;;  %v4906_v55 = vpop.permute.xlu0 %4905 }
0x1d0d   :  { %6236 = vmatprep.subr.bf16.mxu0 %v6235_v2 }
0x1d0e   :  { %5895 = vmatprep.mubr.msk.f32.mxu1 %vm1026_vm8, %v4715_v21  ;;  %v5067_v21 = vld [vmem:[%s7982_s10] sm:$0x1] }
0x1d0f   :  { %v6389_v28 = vpop.eup %6388 }
0x1d10   :  { %v4716_v29 = vmul.f32 %v6389_v28, %v6381_v63  ;;  %6238 = vmatpush3.bf16.msra.mxu0 %v6235_v2  ;;  %v4908_v33 = vpop.permute.xlu1 %4907 }
0x1d11   :  { %6240 = vmatprep.subr.bf16.mxu0 %v6239_v50 }
0x1d12   :  { %5896 = vmatmul.mubr.msk.f32.vlgmr.msra.gmra.mrb[72].mxu1 %vm1026_vm8, %v4716_v29 }
0x1d13   :  { %5928 = vmatprep.mubr.msk.f32.mxu1 %vm6424_vm11, %v6425_v7 }
0x1d14   :  { %6242 = vmatpush3.bf16.msra.mxu0 %v6239_v50 }
0x1dda   :  { %v5892_v51 = vpop.f32.mrb[52].mxu0 }
0x1ddb   :  { %4923 = vrot.lane.b32.xlu1 %v5892_v51, %s6419_s22  ;;  %v4792_v52 = vpop.f32.mrb[53].mxu0 }
0x1ddc   :  { %4921 = vrot.lane.b32.xlu0 %v4792_v52, %s6419_s22 }
0x1ddf   :  { %4895 = vrot.lane.b32.xlu1 %v7818_v22, %s6423_s26  ;;  %v4933_v22 = vsel %vm853_vm7, %v7772_v0, %v4890_v25 }
0x1de0   :  { %4893 = vrot.lane.b32.xlu0 %v7820_v24, %s6423_s26  ;;  %v4937_v37 = vsel %vm2461_vm9, %v4933_v22, %v4906_v55 }
0x1de3   :  { %4911 = vrot.lane.b32.xlu1 %v7858_v8, %s6421_s24  ;;  %v4934_v8 = vsel %vm853_vm7, %v7770_v59, %v4892_v27 }
0x1de4   :  { %4909 = vrot.lane.b32.xlu0 %v7860_v41, %s6421_s24  ;;  %v4938_v57 = vsel %vm2461_vm9, %v4934_v8, %v4908_v33 }
0x1de5   :  { %v5897_v53 = vpop.f32.mrb[72].mxu1 }
0x1de6   :  { %v4876_v60 = vpop.f32.mrb[73].mxu1 }
0x1de7   :  { %4927 = vrot.lane.b32.xlu1 %v5897_v53, %s6419_s22 }
0x1de8   :  { %4925 = vrot.lane.b32.xlu0 %v4876_v60, %s6419_s22 }
0x1e4d   :  { %v4924_v24 = vpop.permute.xlu1 %4923 }
0x1e4e   :  { %v4922_v41 = vpop.permute.xlu0 %4921  ;;  %v4942_v61 = vsel %vm2466_vm10, %v4938_v57, %v4924_v24 }
0x1e4f   :  { %v4941_v31 = vsel %vm2466_vm10, %v4937_v37, %v4922_v41 }
0x1e50   :  { %5914 = vmatprep.mubr.msk.f32.mxu0 %vm152_vm0, %v4941_v31 }
0x1e51   :  { %v4896_v45 = vpop.permute.xlu1 %4895  ;;  %5915 = vmatmul.mubr.msk.f32.vlgmr.msra.gmra.mrb[54].mxu0 %vm152_vm0, %v4942_v61 }
0x1e52   :  { %v4894_v38 = vpop.permute.xlu0 %4893  ;;  %v4936_v56 = vsel %vm853_vm7, %v7774_v3, %v4896_v45  ;;  %v5459_v3 = vld [vmem:[%s7981_s9 + $0x1] ss:$0 sm:$0xff] }
0x1e53   :  { %v4935_v59 = vsel %vm853_vm7, %v7776_v4, %v4894_v38 }
0x1e55   :  { %v4912_v0 = vpop.permute.xlu1 %4911 }
0x1e56   :  { %v4910_v40 = vpop.permute.xlu0 %4909  ;;  %v4940_v63 = vsel %vm2461_vm9, %v4936_v56, %v4912_v0 }
0x1e57   :  { %v4939_v16 = vsel %vm2461_vm9, %v4935_v59, %v4910_v40 }
0x1e59   :  { %v4928_v47 = vpop.permute.xlu1 %4927 }
0x1e5a   :  { %v4926_v58 = vpop.permute.xlu0 %4925  ;;  %v4944_v54 = vsel %vm2466_vm10, %v4940_v63, %v4928_v47 }
0x1e5b   :  { %v4943_v36 = vsel %vm2466_vm10, %v4939_v16, %v4926_v58 }
0x1e5c   :  { %5917 = vmatprep.mubr.msk.f32.mxu0 %vm152_vm0, %v4943_v36 }
0x1e5d   :  { %5918 = vmatmul.mubr.msk.f32.gmra.mrb[56].mxu0 %vm152_vm0, %v4944_v54 }
0x1f24   :  { %v5916_v4 = vpop.f32.mrb[54].mxu0 }
0x1f25   :  { %v5052_v9 = vadd.f32 %v5916_v4, %v3122_v34  ;;  %v5032_v19 = vpop.f32.mrb[55].mxu0 }
0x1f26   :  { %v5051_v11 = vadd.f32 %v5032_v19, %v3121_v26 }
0x1f27   :  { %v5064_v14 = vadd.f32 %v5459_v3, %v5052_v9 }
0x1f28   :  { %v5063_v12 = vadd.f32 %v5459_v3, %v5051_v11 }
0x1f2a   :  { %v6244_v5 = vpack.c.bf16 %v5064_v14, %v5063_v12 }
0x1f2c   :  { %6246 = vmatpush3.bf16.xpose.msk.msra.mxu1 %vm6245_vm12, %v6244_v5 }
0x1f2d   :  { %6247 = vmatprep.subr.bf16.mxu1 %v6417_v10  ;;  %v5069_v10 = vstv %s7983_s11 }
0x1f30   :  { %v5919_v13 = vpop.f32.mrb[56].mxu0 }
0x1f31   :  { %v5054_v18 = vadd.f32 %v5919_v13, %v3124_v15  ;;  %v5042_v20 = vpop.f32.mrb[57].mxu0 }
0x1f32   :  { %v5053_v32 = vadd.f32 %v5042_v20, %v3123_v1 }
0x1f33   :  { %v5066_v34 = vadd.f32 %v5459_v3, %v5054_v18 }
0x1f34   :  { %v5065_v23 = vadd.f32 %v5459_v3, %v5053_v32 }
0x1f36   :  { %v6248_v26 = vpack.c.bf16 %v5066_v34, %v5065_v23 }
0x1f38   :  { %6250 = vmatpush3.bf16.xpose.msk.msra.mxu1 %vm6245_vm12, %v6248_v26 }
0x1f3f   :  { %5929 = vmatmul.mubr.msk.f32.vlgmr.msra.gmra.mrb[74].mxu1 %vm152_vm0, %v5067_v21 }
0x2012   :  { %v5151_v17 = vpop.f32.mrb[74].mxu1 }
0x2013   :  { %v5152_v15 = vadd.f32 %v5151_v17, %v5069_v10  ;;  %v5930_v42 = vpop.f32.mrb[75].mxu1 }
0x2015   :  { %v5155_v1 = vmax.f32 %v5152_v15, 0.0 }
0x2017   :  { %5157 = vst.msk [vmem:[#allocation3] sm:$0x1] %vm5156_vm13, %v5155_v1 }
0x2018   :  { %6403 = shalt.err (!%p6400_p4)
}
0x2019   :  { %s6404_s11 = scalar_lea.hbm %s7984_s12, 16 }
0x201a   :  { %p6405_p5 = scmp.ne.s32.totalorder %s7984_s12, %s6404_s11  ;;  %p6408_p6 = scmp.lt.u32.totalorder %s6404_s11, %s7984_s12 }
0x201c   :  { %p6410_p7 = pnand %p6408_p6, %p6405_p5 }
0x201e   :  { %6413 = shalt.err (!%p6410_p7)
}
0x201f   :  { %5167 = dma.vmem_to_hbm [thread:$0]  %s5165_s15, 16, %s7984_s12, [#allocation4]  }
0x2020   :  { %6414 = dma.done.wait [#allocation4], 16  }
0x2021   :  { %6415 = vsyncadd [#allocation4], 4294967280 }
0x2022   :  { %5171 = vsyncpa [#allocation4], 1 }

</bundles_post_ra>
